<compile_context>
chip_gen: v5e
topology: v5e:2x2
jax: 0.10.0
libtpu: 0.0.40
codegen_flags: <defaults>
</compile_context>

<pallas_src>
import numpy as np
import jax
import jax.numpy as jnp
from jax.experimental import pallas as pl
from jax.experimental.pallas import tpu as pltpu


def encoder_layer_kernel(
    # inputs
    x_ref, x1_ref, mask_ref,
    wq_ref, wk_ref, wv_ref,
    wh_ref, bh_ref, wh1_ref, bh1_ref,
    lt_w1_ref, lt_b1_ref, lt_w2_ref, lt_b2_ref,
    lt1_w1_ref, lt1_b1_ref, lt1_w2_ref, lt1_b2_ref,
    ln1_g_ref, ln1_b_ref, ln2_g_ref, ln2_b_ref,
    # outputs
    oc_ref, oc1_ref, a_ref,
):
    f32 = jnp.float32
    bf16 = jnp.bfloat16

    x = x_ref[0]          # (S, D) f32
    x1 = x1_ref[0]        # (S, D) f32
    mask = mask_ref[...]  # (S, S) f32

    S, D = x.shape
    H = a_ref.shape[1]
    d_k = D // H

    xb = x.astype(bf16)
    x1b = x1.astype(bf16)

    # ---- QKV projections (bf16 MXU inputs, f32 accumulation). ----
    # 1/sqrt(d_k) is pre-folded into wq (prepare_params), so `q` is already the scaled Q
    # used both for the scores and for H = A @ Q (exactly like the torch module).
    q = jnp.dot(xb, wq_ref[...], preferred_element_type=f32)    # (S, D)
    k = jnp.dot(xb, wk_ref[...], preferred_element_type=f32)    # (S, D)
    v = jnp.dot(x1b, wv_ref[...], preferred_element_type=f32)   # (S, D)  (V from x1)

    # split heads: (S, D) -> (H, S, d_k), d_k stays on lanes
    def split_heads(z):
        return jnp.swapaxes(z.reshape(S, H, d_k), 0, 1)

    q3 = split_heads(q)
    k3 = split_heads(k)
    v3 = split_heads(v)
    q3b = q3.astype(bf16)
    k3b = k3.astype(bf16)
    v3b = v3.astype(bf16)

    # ---- attention scores + softmax, all heads batched (leading batch dim) ----
    scores = jnp.einsum("hqd,hkd->hqk", q3b, k3b,
                        preferred_element_type=f32)              # (H, S, S)
    scores = scores + mask[None, :, :]
    scores = scores - jnp.max(scores, axis=-1, keepdims=True)
    e = jnp.exp(scores)
    denom = jnp.sum(e, axis=-1, keepdims=True)
    A = e * pl.reciprocal(denom, approx=True)                    # (H, S, S), f32
    a_ref[0] = A.astype(a_ref.dtype)

    # ---- fused A @ [Q | V]: one batched matmul with N = 2*d_k ----
    qv3b = jnp.concatenate([q3b, v3b], axis=-1)                  # (H, S, 2*d_k) bf16
    hq_hv = jnp.einsum("hqk,hkd->hqd", A.astype(bf16), qv3b,
                       preferred_element_type=f32)               # (H, S, 2*d_k)

    merged = jnp.swapaxes(hq_hv, 0, 1)                           # (S, H, 2*d_k)
    h_cat = merged[:, :, :d_k].reshape(S, D)                     # H  = A @ Q (merged heads)
    h_cat1 = merged[:, :, d_k:].reshape(S, D)                    # H1 = A @ V (merged heads)

    attn_out = jnp.dot(h_cat.astype(bf16), wh_ref[...],
                       preferred_element_type=f32) + bh_ref[...]
    attn_out1 = jnp.dot(h_cat1.astype(bf16), wh1_ref[...],
                        preferred_element_type=f32) + bh1_ref[...]

    def layernorm(z, g, b):
        mu = jnp.mean(z, axis=-1, keepdims=True)
        var = jnp.mean((z - mu) * (z - mu), axis=-1, keepdims=True)
        return (z - mu) * jax.lax.rsqrt(var + 1e-6) * g + b      # eps=1e-6 (module spec)

    def ffn(z, w1_ref, b1_ref, w2_ref, b2_ref):
        hid = jnp.maximum(
            jnp.dot(z.astype(bf16), w1_ref[...], preferred_element_type=f32)
            + b1_ref[...], 0.0)
        return (jnp.dot(hid.astype(bf16), w2_ref[...], preferred_element_type=f32)
                + b2_ref[...])

    ln1_g, ln1_b = ln1_g_ref[...], ln1_b_ref[...]
    ln2_g, ln2_b = ln2_g_ref[...], ln2_b_ref[...]

    # branch 0 : x
    oa = layernorm(x + attn_out, ln1_g, ln1_b)
    ob = ffn(oa, lt_w1_ref, lt_b1_ref, lt_w2_ref, lt_b2_ref)
    oc = layernorm(oa + ob, ln2_g, ln2_b)

    # branch 1 : x1
    oa1 = layernorm(x1 + attn_out1, ln1_g, ln1_b)
    ob1 = ffn(oa1, lt1_w1_ref, lt1_b1_ref, lt1_w2_ref, lt1_b2_ref)
    oc1 = layernorm(oa1 + ob1, ln2_g, ln2_b)

    oc_ref[0] = oc.astype(oc_ref.dtype)
    oc1_ref[0] = oc1.astype(oc1_ref.dtype)


def prepare_params(params, num_heads):
    """One-time parameter prep: fold 1/sqrt(d_k) into W_q and cast matmul weights to
    bf16 (halves weight HBM/DMA bytes and VMEM footprint).  Biases / LayerNorm affine
    params stay f32 (added after f32 accumulation)."""
    D = params["wq_t"].shape[0]
    d_k = D // num_heads
    scale = np.float32(1.0 / np.sqrt(d_k))
    kp = dict(params)
    kp["wq_t"] = (params["wq_t"] * scale).astype(jnp.bfloat16)
    for name in ("wk_t", "wv_t", "wh_t", "wh1_t",
                 "lt_w1_t", "lt_w2_t", "lt1_w1_t", "lt1_w2_t"):
        kp[name] = params[name].astype(jnp.bfloat16)
    return kp


def encoder_layer(x, x1, attn_mask, kparams, num_heads):
    B, S, D = x.shape
    Hd = kparams["lt_w1_t"].shape[1]

    def bcast2(shape):
        return pl.BlockSpec(shape, lambda b: (0, 0))

    in_specs = [
        pl.BlockSpec((1, S, D), lambda b: (b, 0, 0)),    # x
        pl.BlockSpec((1, S, D), lambda b: (b, 0, 0)),    # x1
        bcast2((S, S)),                                  # attn_mask
        bcast2((D, D)), bcast2((D, D)), bcast2((D, D)),  # wq, wk, wv (bf16)
        bcast2((D, D)), bcast2((1, D)),                  # wh (bf16), bh
        bcast2((D, D)), bcast2((1, D)),                  # wh1 (bf16), bh1
        bcast2((D, Hd)), bcast2((1, Hd)),                # lt.w1, lt.b1
        bcast2((Hd, D)), bcast2((1, D)),                 # lt.w2, lt.b2
        bcast2((D, Hd)), bcast2((1, Hd)),                # lt1.w1, lt1.b1
        bcast2((Hd, D)), bcast2((1, D)),                 # lt1.w2, lt1.b2
        bcast2((1, D)), bcast2((1, D)),                  # ln1 gamma/beta
        bcast2((1, D)), bcast2((1, D)),                  # ln2 gamma/beta
    ]
    out_specs = (
        pl.BlockSpec((1, S, D), lambda b: (b, 0, 0)),
        pl.BlockSpec((1, S, D), lambda b: (b, 0, 0)),
        pl.BlockSpec((1, num_heads, S, S), lambda b: (b, 0, 0, 0)),
    )
    out_shape = (
        jax.ShapeDtypeStruct((B, S, D), jnp.float32),
        jax.ShapeDtypeStruct((B, S, D), jnp.float32),
        jax.ShapeDtypeStruct((B, num_heads, S, S), jnp.float32),
    )

    args = (
        x, x1, attn_mask,
        kparams["wq_t"], kparams["wk_t"], kparams["wv_t"],
        kparams["wh_t"], kparams["bh"], kparams["wh1_t"], kparams["bh1"],
        kparams["lt_w1_t"], kparams["lt_b1"], kparams["lt_w2_t"], kparams["lt_b2"],
        kparams["lt1_w1_t"], kparams["lt1_b1"], kparams["lt1_w2_t"], kparams["lt1_b2"],
        kparams["ln1_g"], kparams["ln1_b"], kparams["ln2_g"], kparams["ln2_b"],
    )

    # Advisory cost estimate so XLA schedules around the fused layer correctly.
    flops = int(2 * B * S * D * D * 5          # QKV + 2 output projections
                + 6 * B * S * S * D            # scores + fused A@[Q|V]
                + 8 * B * S * D * Hd)          # two 2-layer FFNs
    transcendentals = int(B * num_heads * S * S      # exp
                          + B * num_heads * S        # reciprocal
                          + 4 * B * S)               # rsqrt in 4 layernorms
    bytes_in = sum(int(np.prod(a.shape)) * a.dtype.itemsize for a in args)
    bytes_out = int((2 * B * S * D + B * num_heads * S * S) * 4)
    cost = pl.CostEstimate(flops=flops, transcendentals=transcendentals,
                           bytes_accessed=bytes_in + bytes_out)

    return pl.pallas_call(
        encoder_layer_kernel,
        out_shape=out_shape,
        grid_spec=pltpu.PrefetchScalarGridSpec(
            num_scalar_prefetch=0,
            grid=(B,),
            in_specs=in_specs,
            out_specs=out_specs,
        ),
        compiler_params=pltpu.CompilerParams(
            dimension_semantics=("parallel",),
            vmem_limit_bytes=64 * 1024 * 1024,
        ),
        cost_estimate=cost,
    )(*args)


def ref_forward(x, x1, mask, p, num_heads):
    """Pure-JAX (f32) mirror of the PyTorch EncoderLayer forward, for validation."""
    B, S, D = x.shape
    dk = D // num_heads
    q = x @ p["wq_t"]
    k = x @ p["wk_t"]
    v = x1 @ p["wv_t"]

    def split(z):
        return z.reshape(B, S, num_heads, dk).transpose(0, 2, 1, 3)

    Q, K, V = split(q), split(k), split(v)
    Q = Q / np.sqrt(dk)
    scores = Q @ jnp.swapaxes(K, 2, 3) + mask[None, None]
    A = jax.nn.softmax(scores, axis=-1)
    H1 = A @ V
    H = A @ Q

    def merge(z):
        return z.transpose(0, 2, 1, 3).reshape(B, S, D)

    attn = merge(H) @ p["wh_t"] + p["bh"][0]
    attn1 = merge(H1) @ p["wh1_t"] + p["bh1"][0]

    def ln(z, g, b):
        mu = z.mean(-1, keepdims=True)
        var = ((z - mu) ** 2).mean(-1, keepdims=True)
        return (z - mu) / jnp.sqrt(var + 1e-6) * g[0] + b[0]

    oa = ln(x + attn, p["ln1_g"], p["ln1_b"])
    ob = jnp.maximum(oa @ p["lt_w1_t"] + p["lt_b1"][0], 0.0) @ p["lt_w2_t"] + p["lt_b2"][0]
    oc = ln(oa + ob, p["ln2_g"], p["ln2_b"])
    oa1 = ln(x1 + attn1, p["ln1_g"], p["ln1_b"])
    ob1 = jnp.maximum(oa1 @ p["lt1_w1_t"] + p["lt1_b1"][0], 0.0) @ p["lt1_w2_t"] + p["lt1_b2"][0]
    oc1 = ln(oa1 + ob1, p["ln2_g"], p["ln2_b"])
    return oc, oc1, A


def init_params(key, D, Hd):
    ks = jax.random.split(key, 16)

    def w(k, shape, fan_in):
        return (jax.random.normal(k, shape, jnp.float32) / np.sqrt(fan_in)).astype(jnp.float32)

    return {
        # weights stored pre-transposed: (in, out); canonical f32 copies
        "wq_t": w(ks[0], (D, D), D),
        "wk_t": w(ks[1], (D, D), D),
        "wv_t": w(ks[2], (D, D), D),
        "wh_t": w(ks[3], (D, D), D),
        "bh": w(ks[4], (1, D), D),
        "wh1_t": w(ks[5], (D, D), D),
        "bh1": w(ks[6], (1, D), D),
        "lt_w1_t": w(ks[7], (D, Hd), D),
        "lt_b1": w(ks[8], (1, Hd), D),
        "lt_w2_t": w(ks[9], (Hd, D), Hd),
        "lt_b2": w(ks[10], (1, D), Hd),
        "lt1_w1_t": w(ks[11], (D, Hd), D),
        "lt1_b1": w(ks[12], (1, Hd), D),
        "lt1_w2_t": w(ks[13], (Hd, D), Hd),
        "lt1_b2": w(ks[14], (1, D), Hd),
        # LayerNorm affine params (PyTorch default init: gamma=1, beta=0)
        "ln1_g": jnp.ones((1, D), jnp.float32),
        "ln1_b": jnp.zeros((1, D), jnp.float32),
        "ln2_g": jnp.ones((1, D), jnp.float32),
        "ln2_b": jnp.zeros((1, D), jnp.float32),
    }


if __name__ == "__main__":
    B, S, D, H, HID = 2, 16, 64, 4, 64

    key = jax.random.PRNGKey(0)
    kx, kx1, km, kp = jax.random.split(key, 4)
    x = jax.random.normal(kx, (B, S, D), jnp.float32)
    x1 = jax.random.normal(kx1, (B, S, D), jnp.float32)
    # additive attention mask, broadcast over (batch, head) like in the torch code
    attn_mask = 0.1 * jax.random.normal(km, (S, S), jnp.float32)

    params = init_params(kp, D, HID)
    kparams = prepare_params(params, H)   # one-time: fold 1/sqrt(d_k) into W_q, bf16-cast weights

    oc, oc1, a = encoder_layer(x, x1, attn_mask, kparams, H)
    jax.block_until_ready((oc, oc1, a))

    # validate against the f32 pure-JAX reference (bf16 matmuls + approx reciprocal
    # in the kernel -> use a loose tolerance)
    oc_r, oc1_r, a_r = ref_forward(x, x1, attn_mask, params, H)
    np.testing.assert_allclose(np.asarray(oc), np.asarray(oc_r), rtol=3e-2, atol=3e-2)
    np.testing.assert_allclose(np.asarray(oc1), np.asarray(oc1_r), rtol=3e-2, atol=3e-2)
    np.testing.assert_allclose(np.asarray(a), np.asarray(a_r), rtol=3e-2, atol=3e-2)

    print("KERNEL_OK")
</pallas_src>

<mosaic_0001>
module attributes {stable_mosaic.version = 11 : i64} {
  func.func @encoder_layer_kernel(%arg0: i32, %arg1: memref<1x16x64xf32, #tpu.memory_space<vmem>>, %arg2: memref<1x16x64xf32, #tpu.memory_space<vmem>>, %arg3: memref<16x16xf32, #tpu.memory_space<vmem>>, %arg4: memref<64x64xbf16, #tpu.memory_space<vmem>>, %arg5: memref<64x64xbf16, #tpu.memory_space<vmem>>, %arg6: memref<64x64xbf16, #tpu.memory_space<vmem>>, %arg7: memref<64x64xbf16, #tpu.memory_space<vmem>>, %arg8: memref<1x64xf32, #tpu.memory_space<vmem>>, %arg9: memref<64x64xbf16, #tpu.memory_space<vmem>>, %arg10: memref<1x64xf32, #tpu.memory_space<vmem>>, %arg11: memref<64x64xbf16, #tpu.memory_space<vmem>>, %arg12: memref<1x64xf32, #tpu.memory_space<vmem>>, %arg13: memref<64x64xbf16, #tpu.memory_space<vmem>>, %arg14: memref<1x64xf32, #tpu.memory_space<vmem>>, %arg15: memref<64x64xbf16, #tpu.memory_space<vmem>>, %arg16: memref<1x64xf32, #tpu.memory_space<vmem>>, %arg17: memref<64x64xbf16, #tpu.memory_space<vmem>>, %arg18: memref<1x64xf32, #tpu.memory_space<vmem>>, %arg19: memref<1x64xf32, #tpu.memory_space<vmem>>, %arg20: memref<1x64xf32, #tpu.memory_space<vmem>>, %arg21: memref<1x64xf32, #tpu.memory_space<vmem>>, %arg22: memref<1x64xf32, #tpu.memory_space<vmem>>, %arg23: memref<1x16x64xf32, #tpu.memory_space<vmem>>, %arg24: memref<1x16x64xf32, #tpu.memory_space<vmem>>, %arg25: memref<1x4x16x16xf32, #tpu.memory_space<vmem>>) attributes {dimension_semantics = [#tpu.dimension_semantics<parallel>], iteration_bounds = array<i64: 2>, scalar_prefetch = 0 : i64, scratch_operands = 0 : i64, tpu.core_type = #tpu.core_type<tc>, window_params = [{transform_indices = @transform_0, window_bounds = array<i64: 1, 16, 64>}, {transform_indices = @transform_1, window_bounds = array<i64: 1, 16, 64>}, {pipeline_mode = #tpu.pipeline_mode<synchronous>, transform_indices = @transform_2, window_bounds = array<i64: 16, 16>}, {pipeline_mode = #tpu.pipeline_mode<synchronous>, transform_indices = @transform_3, window_bounds = array<i64: 64, 64>}, {pipeline_mode = #tpu.pipeline_mode<synchronous>, transform_indices = @transform_4, window_bounds = array<i64: 64, 64>}, {pipeline_mode = #tpu.pipeline_mode<synchronous>, transform_indices = @transform_5, window_bounds = array<i64: 64, 64>}, {pipeline_mode = #tpu.pipeline_mode<synchronous>, transform_indices = @transform_6, window_bounds = array<i64: 64, 64>}, {pipeline_mode = #tpu.pipeline_mode<synchronous>, transform_indices = @transform_7, window_bounds = array<i64: 1, 64>}, {pipeline_mode = #tpu.pipeline_mode<synchronous>, transform_indices = @transform_8, window_bounds = array<i64: 64, 64>}, {pipeline_mode = #tpu.pipeline_mode<synchronous>, transform_indices = @transform_9, window_bounds = array<i64: 1, 64>}, {pipeline_mode = #tpu.pipeline_mode<synchronous>, transform_indices = @transform_10, window_bounds = array<i64: 64, 64>}, {pipeline_mode = #tpu.pipeline_mode<synchronous>, transform_indices = @transform_11, window_bounds = array<i64: 1, 64>}, {pipeline_mode = #tpu.pipeline_mode<synchronous>, transform_indices = @transform_12, window_bounds = array<i64: 64, 64>}, {pipeline_mode = #tpu.pipeline_mode<synchronous>, transform_indices = @transform_13, window_bounds = array<i64: 1, 64>}, {pipeline_mode = #tpu.pipeline_mode<synchronous>, transform_indices = @transform_14, window_bounds = array<i64: 64, 64>}, {pipeline_mode = #tpu.pipeline_mode<synchronous>, transform_indices = @transform_15, window_bounds = array<i64: 1, 64>}, {pipeline_mode = #tpu.pipeline_mode<synchronous>, transform_indices = @transform_16, window_bounds = array<i64: 64, 64>}, {pipeline_mode = #tpu.pipeline_mode<synchronous>, transform_indices = @transform_17, window_bounds = array<i64: 1, 64>}, {pipeline_mode = #tpu.pipeline_mode<synchronous>, transform_indices = @transform_18, window_bounds = array<i64: 1, 64>}, {pipeline_mode = #tpu.pipeline_mode<synchronous>, transform_indices = @transform_19, window_bounds = array<i64: 1, 64>}, {pipeline_mode = #tpu.pipeline_mode<synchronous>, transform_indices = @transform_20, window_bounds = array<i64: 1, 64>}, {pipeline_mode = #tpu.pipeline_mode<synchronous>, transform_indices = @transform_21, window_bounds = array<i64: 1, 64>}, {transform_indices = @transform_22, window_bounds = array<i64: 1, 16, 64>}, {transform_indices = @transform_23, window_bounds = array<i64: 1, 16, 64>}, {transform_indices = @transform_24, window_bounds = array<i64: 1, 4, 16, 16>}]} {
    %c0 = arith.constant 0 : index
    %c0_0 = arith.constant 0 : index
    %c0_1 = arith.constant 0 : index
    %0 = vector.load %arg1[%c0, %c0_0, %c0_1] : memref<1x16x64xf32, #tpu.memory_space<vmem>>, vector<1x16x64xf32>
    %1 = vector.shape_cast %0 : vector<1x16x64xf32> to vector<16x64xf32>
    %c0_2 = arith.constant 0 : index
    %c0_3 = arith.constant 0 : index
    %c0_4 = arith.constant 0 : index
    %2 = vector.load %arg2[%c0_2, %c0_3, %c0_4] : memref<1x16x64xf32, #tpu.memory_space<vmem>>, vector<1x16x64xf32>
    %3 = vector.shape_cast %2 : vector<1x16x64xf32> to vector<16x64xf32>
    %c0_5 = arith.constant 0 : index
    %c0_6 = arith.constant 0 : index
    %4 = vector.load %arg3[%c0_5, %c0_6] : memref<16x16xf32, #tpu.memory_space<vmem>>, vector<16x16xf32>
    %5 = arith.truncf %1 : vector<16x64xf32> to vector<16x64xbf16>
    %6 = arith.truncf %3 : vector<16x64xf32> to vector<16x64xbf16>
    %c0_7 = arith.constant 0 : index
    %c0_8 = arith.constant 0 : index
    %7 = vector.load %arg4[%c0_7, %c0_8] : memref<64x64xbf16, #tpu.memory_space<vmem>>, vector<64x64xbf16>
    %cst = arith.constant dense<0.000000e+00> : vector<16x64xf32>
    %8 = tpu.matmul %5, %7, %cst {dimension_numbers = #tpu.dot_dimension_numbers<[1], [0], [0], [1], [0, 0, 1, 1], [], []>} : vector<16x64xbf16>, vector<64x64xbf16>, vector<16x64xf32> -> vector<16x64xf32>
    %c0_9 = arith.constant 0 : index
    %c0_10 = arith.constant 0 : index
    %9 = vector.load %arg5[%c0_9, %c0_10] : memref<64x64xbf16, #tpu.memory_space<vmem>>, vector<64x64xbf16>
    %cst_11 = arith.constant dense<0.000000e+00> : vector<16x64xf32>
    %10 = tpu.matmul %5, %9, %cst_11 {dimension_numbers = #tpu.dot_dimension_numbers<[1], [0], [0], [1], [0, 0, 1, 1], [], []>} : vector<16x64xbf16>, vector<64x64xbf16>, vector<16x64xf32> -> vector<16x64xf32>
    %c0_12 = arith.constant 0 : index
    %c0_13 = arith.constant 0 : index
    %11 = vector.load %arg6[%c0_12, %c0_13] : memref<64x64xbf16, #tpu.memory_space<vmem>>, vector<64x64xbf16>
    %cst_14 = arith.constant dense<0.000000e+00> : vector<16x64xf32>
    %12 = tpu.matmul %6, %11, %cst_14 {dimension_numbers = #tpu.dot_dimension_numbers<[1], [0], [0], [1], [0, 0, 1, 1], [], []>} : vector<16x64xbf16>, vector<64x64xbf16>, vector<16x64xf32> -> vector<16x64xf32>
    %13 = vector.shape_cast %8 : vector<16x64xf32> to vector<16x4x16xf32>
    %14 = tpu.transpose %13, [1, 0, 2] : vector<16x4x16xf32> -> vector<4x16x16xf32>
    %15 = vector.shape_cast %10 : vector<16x64xf32> to vector<16x4x16xf32>
    %16 = tpu.transpose %15, [1, 0, 2] : vector<16x4x16xf32> -> vector<4x16x16xf32>
    %17 = vector.shape_cast %12 : vector<16x64xf32> to vector<16x4x16xf32>
    %18 = tpu.transpose %17, [1, 0, 2] : vector<16x4x16xf32> -> vector<4x16x16xf32>
    %19 = arith.truncf %14 : vector<4x16x16xf32> to vector<4x16x16xbf16>
    %20 = arith.truncf %16 : vector<4x16x16xf32> to vector<4x16x16xbf16>
    %21 = arith.truncf %18 : vector<4x16x16xf32> to vector<4x16x16xbf16>
    "tpu.trace_start"() <{level = 10 : i32, message = "hqd,hkd->hqk"}> : () -> ()
    %cst_15 = arith.constant dense<0.000000e+00> : vector<4x16x16xf32>
    %22 = tpu.matmul %19, %20, %cst_15 {dimension_numbers = #tpu.dot_dimension_numbers<[2], [2], [1], [1], [0, 0, 0, 1, 1, 1], [0], [0]>} : vector<4x16x16xbf16>, vector<4x16x16xbf16>, vector<4x16x16xf32> -> vector<4x16x16xf32>
    "tpu.trace_stop"() : () -> ()
    %23 = vector.shape_cast %4 : vector<16x16xf32> to vector<1x16x16xf32>
    %24 = vector.broadcast %23 : vector<1x16x16xf32> to vector<4x16x16xf32>
    %25 = arith.addf %22, %24 : vector<4x16x16xf32>
    %cst_16 = arith.constant dense<0xFF800000> : vector<4x16xf32>
    %26 = vector.multi_reduction <maximumf>, %25, %cst_16 [2] : vector<4x16x16xf32> to vector<4x16xf32>
    %27 = vector.shape_cast %26 : vector<4x16xf32> to vector<4x16x1xf32>
    %28 = vector.broadcast %27 : vector<4x16x1xf32> to vector<4x16x16xf32>
    %29 = arith.subf %25, %28 : vector<4x16x16xf32>
    %30 = math.exp %29 : vector<4x16x16xf32>
    %cst_17 = arith.constant dense<0.000000e+00> : vector<4x16xf32>
    %31 = vector.multi_reduction <add>, %30, %cst_17 [2] : vector<4x16x16xf32> to vector<4x16xf32>
    %32 = vector.shape_cast %31 : vector<4x16xf32> to vector<4x16x1xf32>
    %33 = tpu.reciprocal %32 {approx = true} : vector<4x16x1xf32> -> vector<4x16x1xf32>
    %34 = vector.broadcast %33 : vector<4x16x1xf32> to vector<4x16x16xf32>
    %35 = arith.mulf %30, %34 : vector<4x16x16xf32>
    %c0_18 = arith.constant 0 : index
    %c0_19 = arith.constant 0 : index
    %c0_20 = arith.constant 0 : index
    %c0_21 = arith.constant 0 : index
    %36 = vector.load %arg25[%c0_18, %c0_19, %c0_20, %c0_21] : memref<1x4x16x16xf32, #tpu.memory_space<vmem>>, vector<1x4x16x16xf32>
    %37 = vector.shape_cast %36 : vector<1x4x16x16xf32> to vector<4x16x16xf32>
    %38 = vector.shape_cast %35 : vector<4x16x16xf32> to vector<1x4x16x16xf32>
    tpu.vector_store %arg25[%c0_18, %c0_19, %c0_20, %c0_21], %38 {strides = array<i32>} : memref<1x4x16x16xf32, #tpu.memory_space<vmem>>, vector<1x4x16x16xf32>,
    %39 = tpu.concatenate %19, %21 in 2 : vector<4x16x16xbf16>, vector<4x16x16xbf16> -> vector<4x16x32xbf16>
    %40 = arith.truncf %35 : vector<4x16x16xf32> to vector<4x16x16xbf16>
    "tpu.trace_start"() <{level = 10 : i32, message = "hqk,hkd->hqd"}> : () -> ()
    %cst_22 = arith.constant dense<0.000000e+00> : vector<4x16x32xf32>
    %41 = tpu.matmul %40, %39, %cst_22 {dimension_numbers = #tpu.dot_dimension_numbers<[2], [1], [1], [2], [0, 0, 0, 1, 1, 2], [0], [0]>} : vector<4x16x16xbf16>, vector<4x16x32xbf16>, vector<4x16x32xf32> -> vector<4x16x32xf32>
    "tpu.trace_stop"() : () -> ()
    %42 = tpu.transpose %41, [1, 0, 2] : vector<4x16x32xf32> -> vector<16x4x32xf32>
    %43 = vector.extract_strided_slice %42 {offsets = [0, 0, 0], sizes = [16, 4, 16], strides = [1, 1, 1]} : vector<16x4x32xf32> to vector<16x4x16xf32>
    %44 = vector.shape_cast %43 : vector<16x4x16xf32> to vector<16x64xf32>
    %45 = vector.extract_strided_slice %42 {offsets = [0, 0, 16], sizes = [16, 4, 16], strides = [1, 1, 1]} : vector<16x4x32xf32> to vector<16x4x16xf32>
    %46 = vector.shape_cast %45 : vector<16x4x16xf32> to vector<16x64xf32>
    %47 = arith.truncf %44 : vector<16x64xf32> to vector<16x64xbf16>
    %c0_23 = arith.constant 0 : index
    %c0_24 = arith.constant 0 : index
    %48 = vector.load %arg7[%c0_23, %c0_24] : memref<64x64xbf16, #tpu.memory_space<vmem>>, vector<64x64xbf16>
    %cst_25 = arith.constant dense<0.000000e+00> : vector<16x64xf32>
    %49 = tpu.matmul %47, %48, %cst_25 {dimension_numbers = #tpu.dot_dimension_numbers<[1], [0], [0], [1], [0, 0, 1, 1], [], []>} : vector<16x64xbf16>, vector<64x64xbf16>, vector<16x64xf32> -> vector<16x64xf32>
    %c0_26 = arith.constant 0 : index
    %c0_27 = arith.constant 0 : index
    %50 = vector.load %arg8[%c0_26, %c0_27] : memref<1x64xf32, #tpu.memory_space<vmem>>, vector<1x64xf32>
    %51 = vector.broadcast %50 : vector<1x64xf32> to vector<16x64xf32>
    %52 = arith.addf %49, %51 : vector<16x64xf32>
    %53 = arith.truncf %46 : vector<16x64xf32> to vector<16x64xbf16>
    %c0_28 = arith.constant 0 : index
    %c0_29 = arith.constant 0 : index
    %54 = vector.load %arg9[%c0_28, %c0_29] : memref<64x64xbf16, #tpu.memory_space<vmem>>, vector<64x64xbf16>
    %cst_30 = arith.constant dense<0.000000e+00> : vector<16x64xf32>
    %55 = tpu.matmul %53, %54, %cst_30 {dimension_numbers = #tpu.dot_dimension_numbers<[1], [0], [0], [1], [0, 0, 1, 1], [], []>} : vector<16x64xbf16>, vector<64x64xbf16>, vector<16x64xf32> -> vector<16x64xf32>
    %c0_31 = arith.constant 0 : index
    %c0_32 = arith.constant 0 : index
    %56 = vector.load %arg10[%c0_31, %c0_32] : memref<1x64xf32, #tpu.memory_space<vmem>>, vector<1x64xf32>
    %57 = vector.broadcast %56 : vector<1x64xf32> to vector<16x64xf32>
    %58 = arith.addf %55, %57 : vector<16x64xf32>
    %c0_33 = arith.constant 0 : index
    %c0_34 = arith.constant 0 : index
    %59 = vector.load %arg19[%c0_33, %c0_34] : memref<1x64xf32, #tpu.memory_space<vmem>>, vector<1x64xf32>
    %c0_35 = arith.constant 0 : index
    %c0_36 = arith.constant 0 : index
    %60 = vector.load %arg20[%c0_35, %c0_36] : memref<1x64xf32, #tpu.memory_space<vmem>>, vector<1x64xf32>
    %c0_37 = arith.constant 0 : index
    %c0_38 = arith.constant 0 : index
    %61 = vector.load %arg21[%c0_37, %c0_38] : memref<1x64xf32, #tpu.memory_space<vmem>>, vector<1x64xf32>
    %c0_39 = arith.constant 0 : index
    %c0_40 = arith.constant 0 : index
    %62 = vector.load %arg22[%c0_39, %c0_40] : memref<1x64xf32, #tpu.memory_space<vmem>>, vector<1x64xf32>
    %63 = arith.addf %1, %52 : vector<16x64xf32>
    %cst_41 = arith.constant dense<0.000000e+00> : vector<16xf32>
    %64 = vector.multi_reduction <add>, %63, %cst_41 [1] : vector<16x64xf32> to vector<16xf32>
    %65 = vector.shape_cast %64 : vector<16xf32> to vector<16x1xf32>
    %cst_42 = arith.constant 6.400000e+01 : f32
    %66 = vector.broadcast %cst_42 : f32 to vector<16x1xf32>
    %67 = arith.divf %65, %66 : vector<16x1xf32>
    %68 = vector.broadcast %67 : vector<16x1xf32> to vector<16x64xf32>
    %69 = arith.subf %63, %68 : vector<16x64xf32>
    %70 = vector.broadcast %67 : vector<16x1xf32> to vector<16x64xf32>
    %71 = arith.subf %63, %70 : vector<16x64xf32>
    %72 = arith.mulf %69, %71 : vector<16x64xf32>
    %cst_43 = arith.constant dense<0.000000e+00> : vector<16xf32>
    %73 = vector.multi_reduction <add>, %72, %cst_43 [1] : vector<16x64xf32> to vector<16xf32>
    %74 = vector.shape_cast %73 : vector<16xf32> to vector<16x1xf32>
    %cst_44 = arith.constant 6.400000e+01 : f32
    %75 = vector.broadcast %cst_44 : f32 to vector<16x1xf32>
    %76 = arith.divf %74, %75 : vector<16x1xf32>
    %77 = vector.broadcast %67 : vector<16x1xf32> to vector<16x64xf32>
    %78 = arith.subf %63, %77 : vector<16x64xf32>
    %cst_45 = arith.constant 9.99999997E-7 : f32
    %79 = vector.broadcast %cst_45 : f32 to vector<16x1xf32>
    %80 = arith.addf %76, %79 : vector<16x1xf32>
    %81 = math.rsqrt %80 : vector<16x1xf32>
    %82 = vector.broadcast %81 : vector<16x1xf32> to vector<16x64xf32>
    %83 = arith.mulf %78, %82 : vector<16x64xf32>
    %84 = vector.broadcast %59 : vector<1x64xf32> to vector<16x64xf32>
    %85 = arith.mulf %83, %84 : vector<16x64xf32>
    %86 = vector.broadcast %60 : vector<1x64xf32> to vector<16x64xf32>
    %87 = arith.addf %85, %86 : vector<16x64xf32>
    %88 = arith.truncf %87 : vector<16x64xf32> to vector<16x64xbf16>
    %c0_46 = arith.constant 0 : index
    %c0_47 = arith.constant 0 : index
    %89 = vector.load %arg11[%c0_46, %c0_47] : memref<64x64xbf16, #tpu.memory_space<vmem>>, vector<64x64xbf16>
    %cst_48 = arith.constant dense<0.000000e+00> : vector<16x64xf32>
    %90 = tpu.matmul %88, %89, %cst_48 {dimension_numbers = #tpu.dot_dimension_numbers<[1], [0], [0], [1], [0, 0, 1, 1], [], []>} : vector<16x64xbf16>, vector<64x64xbf16>, vector<16x64xf32> -> vector<16x64xf32>
    %c0_49 = arith.constant 0 : index
    %c0_50 = arith.constant 0 : index
    %91 = vector.load %arg12[%c0_49, %c0_50] : memref<1x64xf32, #tpu.memory_space<vmem>>, vector<1x64xf32>
    %92 = vector.broadcast %91 : vector<1x64xf32> to vector<16x64xf32>
    %93 = arith.addf %90, %92 : vector<16x64xf32>
    %cst_51 = arith.constant 0.000000e+00 : f32
    %94 = vector.broadcast %cst_51 : f32 to vector<16x64xf32>
    %95 = arith.maximumf %93, %94 : vector<16x64xf32>
    %96 = arith.truncf %95 : vector<16x64xf32> to vector<16x64xbf16>
    %c0_52 = arith.constant 0 : index
    %c0_53 = arith.constant 0 : index
    %97 = vector.load %arg13[%c0_52, %c0_53] : memref<64x64xbf16, #tpu.memory_space<vmem>>, vector<64x64xbf16>
    %cst_54 = arith.constant dense<0.000000e+00> : vector<16x64xf32>
    %98 = tpu.matmul %96, %97, %cst_54 {dimension_numbers = #tpu.dot_dimension_numbers<[1], [0], [0], [1], [0, 0, 1, 1], [], []>} : vector<16x64xbf16>, vector<64x64xbf16>, vector<16x64xf32> -> vector<16x64xf32>
    %c0_55 = arith.constant 0 : index
    %c0_56 = arith.constant 0 : index
    %99 = vector.load %arg14[%c0_55, %c0_56] : memref<1x64xf32, #tpu.memory_space<vmem>>, vector<1x64xf32>
    %100 = vector.broadcast %99 : vector<1x64xf32> to vector<16x64xf32>
    %101 = arith.addf %98, %100 : vector<16x64xf32>
    %102 = arith.addf %87, %101 : vector<16x64xf32>
    %cst_57 = arith.constant dense<0.000000e+00> : vector<16xf32>
    %103 = vector.multi_reduction <add>, %102, %cst_57 [1] : vector<16x64xf32> to vector<16xf32>
    %104 = vector.shape_cast %103 : vector<16xf32> to vector<16x1xf32>
    %cst_58 = arith.constant 6.400000e+01 : f32
    %105 = vector.broadcast %cst_58 : f32 to vector<16x1xf32>
    %106 = arith.divf %104, %105 : vector<16x1xf32>
    %107 = vector.broadcast %106 : vector<16x1xf32> to vector<16x64xf32>
    %108 = arith.subf %102, %107 : vector<16x64xf32>
    %109 = vector.broadcast %106 : vector<16x1xf32> to vector<16x64xf32>
    %110 = arith.subf %102, %109 : vector<16x64xf32>
    %111 = arith.mulf %108, %110 : vector<16x64xf32>
    %cst_59 = arith.constant dense<0.000000e+00> : vector<16xf32>
    %112 = vector.multi_reduction <add>, %111, %cst_59 [1] : vector<16x64xf32> to vector<16xf32>
    %113 = vector.shape_cast %112 : vector<16xf32> to vector<16x1xf32>
    %cst_60 = arith.constant 6.400000e+01 : f32
    %114 = vector.broadcast %cst_60 : f32 to vector<16x1xf32>
    %115 = arith.divf %113, %114 : vector<16x1xf32>
    %116 = vector.broadcast %106 : vector<16x1xf32> to vector<16x64xf32>
    %117 = arith.subf %102, %116 : vector<16x64xf32>
    %cst_61 = arith.constant 9.99999997E-7 : f32
    %118 = vector.broadcast %cst_61 : f32 to vector<16x1xf32>
    %119 = arith.addf %115, %118 : vector<16x1xf32>
    %120 = math.rsqrt %119 : vector<16x1xf32>
    %121 = vector.broadcast %120 : vector<16x1xf32> to vector<16x64xf32>
    %122 = arith.mulf %117, %121 : vector<16x64xf32>
    %123 = vector.broadcast %61 : vector<1x64xf32> to vector<16x64xf32>
    %124 = arith.mulf %122, %123 : vector<16x64xf32>
    %125 = vector.broadcast %62 : vector<1x64xf32> to vector<16x64xf32>
    %126 = arith.addf %124, %125 : vector<16x64xf32>
    %127 = arith.addf %3, %58 : vector<16x64xf32>
    %cst_62 = arith.constant dense<0.000000e+00> : vector<16xf32>
    %128 = vector.multi_reduction <add>, %127, %cst_62 [1] : vector<16x64xf32> to vector<16xf32>
    %129 = vector.shape_cast %128 : vector<16xf32> to vector<16x1xf32>
    %cst_63 = arith.constant 6.400000e+01 : f32
    %130 = vector.broadcast %cst_63 : f32 to vector<16x1xf32>
    %131 = arith.divf %129, %130 : vector<16x1xf32>
    %132 = vector.broadcast %131 : vector<16x1xf32> to vector<16x64xf32>
    %133 = arith.subf %127, %132 : vector<16x64xf32>
    %134 = vector.broadcast %131 : vector<16x1xf32> to vector<16x64xf32>
    %135 = arith.subf %127, %134 : vector<16x64xf32>
    %136 = arith.mulf %133, %135 : vector<16x64xf32>
    %cst_64 = arith.constant dense<0.000000e+00> : vector<16xf32>
    %137 = vector.multi_reduction <add>, %136, %cst_64 [1] : vector<16x64xf32> to vector<16xf32>
    %138 = vector.shape_cast %137 : vector<16xf32> to vector<16x1xf32>
    %cst_65 = arith.constant 6.400000e+01 : f32
    %139 = vector.broadcast %cst_65 : f32 to vector<16x1xf32>
    %140 = arith.divf %138, %139 : vector<16x1xf32>
    %141 = vector.broadcast %131 : vector<16x1xf32> to vector<16x64xf32>
    %142 = arith.subf %127, %141 : vector<16x64xf32>
    %cst_66 = arith.constant 9.99999997E-7 : f32
    %143 = vector.broadcast %cst_66 : f32 to vector<16x1xf32>
    %144 = arith.addf %140, %143 : vector<16x1xf32>
    %145 = math.rsqrt %144 : vector<16x1xf32>
    %146 = vector.broadcast %145 : vector<16x1xf32> to vector<16x64xf32>
    %147 = arith.mulf %142, %146 : vector<16x64xf32>
    %148 = vector.broadcast %59 : vector<1x64xf32> to vector<16x64xf32>
    %149 = arith.mulf %147, %148 : vector<16x64xf32>
    %150 = vector.broadcast %60 : vector<1x64xf32> to vector<16x64xf32>
    %151 = arith.addf %149, %150 : vector<16x64xf32>
    %152 = arith.truncf %151 : vector<16x64xf32> to vector<16x64xbf16>
    %c0_67 = arith.constant 0 : index
    %c0_68 = arith.constant 0 : index
    %153 = vector.load %arg15[%c0_67, %c0_68] : memref<64x64xbf16, #tpu.memory_space<vmem>>, vector<64x64xbf16>
    %cst_69 = arith.constant dense<0.000000e+00> : vector<16x64xf32>
    %154 = tpu.matmul %152, %153, %cst_69 {dimension_numbers = #tpu.dot_dimension_numbers<[1], [0], [0], [1], [0, 0, 1, 1], [], []>} : vector<16x64xbf16>, vector<64x64xbf16>, vector<16x64xf32> -> vector<16x64xf32>
    %c0_70 = arith.constant 0 : index
    %c0_71 = arith.constant 0 : index
    %155 = vector.load %arg16[%c0_70, %c0_71] : memref<1x64xf32, #tpu.memory_space<vmem>>, vector<1x64xf32>
    %156 = vector.broadcast %155 : vector<1x64xf32> to vector<16x64xf32>
    %157 = arith.addf %154, %156 : vector<16x64xf32>
    %cst_72 = arith.constant 0.000000e+00 : f32
    %158 = vector.broadcast %cst_72 : f32 to vector<16x64xf32>
    %159 = arith.maximumf %157, %158 : vector<16x64xf32>
    %160 = arith.truncf %159 : vector<16x64xf32> to vector<16x64xbf16>
    %c0_73 = arith.constant 0 : index
    %c0_74 = arith.constant 0 : index
    %161 = vector.load %arg17[%c0_73, %c0_74] : memref<64x64xbf16, #tpu.memory_space<vmem>>, vector<64x64xbf16>
    %cst_75 = arith.constant dense<0.000000e+00> : vector<16x64xf32>
    %162 = tpu.matmul %160, %161, %cst_75 {dimension_numbers = #tpu.dot_dimension_numbers<[1], [0], [0], [1], [0, 0, 1, 1], [], []>} : vector<16x64xbf16>, vector<64x64xbf16>, vector<16x64xf32> -> vector<16x64xf32>
    %c0_76 = arith.constant 0 : index
    %c0_77 = arith.constant 0 : index
    %163 = vector.load %arg18[%c0_76, %c0_77] : memref<1x64xf32, #tpu.memory_space<vmem>>, vector<1x64xf32>
    %164 = vector.broadcast %163 : vector<1x64xf32> to vector<16x64xf32>
    %165 = arith.addf %162, %164 : vector<16x64xf32>
    %166 = arith.addf %151, %165 : vector<16x64xf32>
    %cst_78 = arith.constant dense<0.000000e+00> : vector<16xf32>
    %167 = vector.multi_reduction <add>, %166, %cst_78 [1] : vector<16x64xf32> to vector<16xf32>
    %168 = vector.shape_cast %167 : vector<16xf32> to vector<16x1xf32>
    %cst_79 = arith.constant 6.400000e+01 : f32
    %169 = vector.broadcast %cst_79 : f32 to vector<16x1xf32>
    %170 = arith.divf %168, %169 : vector<16x1xf32>
    %171 = vector.broadcast %170 : vector<16x1xf32> to vector<16x64xf32>
    %172 = arith.subf %166, %171 : vector<16x64xf32>
    %173 = vector.broadcast %170 : vector<16x1xf32> to vector<16x64xf32>
    %174 = arith.subf %166, %173 : vector<16x64xf32>
    %175 = arith.mulf %172, %174 : vector<16x64xf32>
    %cst_80 = arith.constant dense<0.000000e+00> : vector<16xf32>
    %176 = vector.multi_reduction <add>, %175, %cst_80 [1] : vector<16x64xf32> to vector<16xf32>
    %177 = vector.shape_cast %176 : vector<16xf32> to vector<16x1xf32>
    %cst_81 = arith.constant 6.400000e+01 : f32
    %178 = vector.broadcast %cst_81 : f32 to vector<16x1xf32>
    %179 = arith.divf %177, %178 : vector<16x1xf32>
    %180 = vector.broadcast %170 : vector<16x1xf32> to vector<16x64xf32>
    %181 = arith.subf %166, %180 : vector<16x64xf32>
    %cst_82 = arith.constant 9.99999997E-7 : f32
    %182 = vector.broadcast %cst_82 : f32 to vector<16x1xf32>
    %183 = arith.addf %179, %182 : vector<16x1xf32>
    %184 = math.rsqrt %183 : vector<16x1xf32>
    %185 = vector.broadcast %184 : vector<16x1xf32> to vector<16x64xf32>
    %186 = arith.mulf %181, %185 : vector<16x64xf32>
    %187 = vector.broadcast %61 : vector<1x64xf32> to vector<16x64xf32>
    %188 = arith.mulf %186, %187 : vector<16x64xf32>
    %189 = vector.broadcast %62 : vector<1x64xf32> to vector<16x64xf32>
    %190 = arith.addf %188, %189 : vector<16x64xf32>
    %c0_83 = arith.constant 0 : index
    %c0_84 = arith.constant 0 : index
    %c0_85 = arith.constant 0 : index
    %191 = vector.load %arg23[%c0_83, %c0_84, %c0_85] : memref<1x16x64xf32, #tpu.memory_space<vmem>>, vector<1x16x64xf32>
    %192 = vector.shape_cast %191 : vector<1x16x64xf32> to vector<16x64xf32>
    %193 = vector.shape_cast %126 : vector<16x64xf32> to vector<1x16x64xf32>
    tpu.vector_store %arg23[%c0_83, %c0_84, %c0_85], %193 {strides = array<i32>} : memref<1x16x64xf32, #tpu.memory_space<vmem>>, vector<1x16x64xf32>,
    %c0_86 = arith.constant 0 : index
    %c0_87 = arith.constant 0 : index
    %c0_88 = arith.constant 0 : index
    %194 = vector.load %arg24[%c0_86, %c0_87, %c0_88] : memref<1x16x64xf32, #tpu.memory_space<vmem>>, vector<1x16x64xf32>
    %195 = vector.shape_cast %194 : vector<1x16x64xf32> to vector<16x64xf32>
    %196 = vector.shape_cast %190 : vector<16x64xf32> to vector<1x16x64xf32>
    tpu.vector_store %arg24[%c0_86, %c0_87, %c0_88], %196 {strides = array<i32>} : memref<1x16x64xf32, #tpu.memory_space<vmem>>, vector<1x16x64xf32>,
    return
  }
  func.func @transform_0(%arg0: i32) -> (i32, i32, i32) {
    %c0_i32 = arith.constant 0 : i32
    %c0_i32_0 = arith.constant 0 : i32
    %c0_i32_1 = arith.constant 0 : i32
    return %arg0, %c0_i32, %c0_i32_0 : i32, i32, i32
  }
  func.func @transform_1(%arg0: i32) -> (i32, i32, i32) {
    %c0_i32 = arith.constant 0 : i32
    %c0_i32_0 = arith.constant 0 : i32
    %c0_i32_1 = arith.constant 0 : i32
    return %arg0, %c0_i32, %c0_i32_0 : i32, i32, i32
  }
  func.func @transform_2(%arg0: i32) -> (i32, i32) {
    %c0_i32 = arith.constant 0 : i32
    %c0_i32_0 = arith.constant 0 : i32
    %c0_i32_1 = arith.constant 0 : i32
    return %c0_i32, %c0_i32_0 : i32, i32
  }
  func.func @transform_3(%arg0: i32) -> (i32, i32) {
    %c0_i32 = arith.constant 0 : i32
    %c0_i32_0 = arith.constant 0 : i32
    %c0_i32_1 = arith.constant 0 : i32
    return %c0_i32, %c0_i32_0 : i32, i32
  }
  func.func @transform_4(%arg0: i32) -> (i32, i32) {
    %c0_i32 = arith.constant 0 : i32
    %c0_i32_0 = arith.constant 0 : i32
    %c0_i32_1 = arith.constant 0 : i32
    return %c0_i32, %c0_i32_0 : i32, i32
  }
  func.func @transform_5(%arg0: i32) -> (i32, i32) {
    %c0_i32 = arith.constant 0 : i32
    %c0_i32_0 = arith.constant 0 : i32
    %c0_i32_1 = arith.constant 0 : i32
    return %c0_i32, %c0_i32_0 : i32, i32
  }
  func.func @transform_6(%arg0: i32) -> (i32, i32) {
    %c0_i32 = arith.constant 0 : i32
    %c0_i32_0 = arith.constant 0 : i32
    %c0_i32_1 = arith.constant 0 : i32
    return %c0_i32, %c0_i32_0 : i32, i32
  }
  func.func @transform_7(%arg0: i32) -> (i32, i32) {
    %c0_i32 = arith.constant 0 : i32
    %c0_i32_0 = arith.constant 0 : i32
    %c0_i32_1 = arith.constant 0 : i32
    return %c0_i32, %c0_i32_0 : i32, i32
  }
  func.func @transform_8(%arg0: i32) -> (i32, i32) {
    %c0_i32 = arith.constant 0 : i32
    %c0_i32_0 = arith.constant 0 : i32
    %c0_i32_1 = arith.constant 0 : i32
    return %c0_i32, %c0_i32_0 : i32, i32
  }
  func.func @transform_9(%arg0: i32) -> (i32, i32) {
    %c0_i32 = arith.constant 0 : i32
    %c0_i32_0 = arith.constant 0 : i32
    %c0_i32_1 = arith.constant 0 : i32
    return %c0_i32, %c0_i32_0 : i32, i32
  }
  func.func @transform_10(%arg0: i32) -> (i32, i32) {
    %c0_i32 = arith.constant 0 : i32
    %c0_i32_0 = arith.constant 0 : i32
    %c0_i32_1 = arith.constant 0 : i32
    return %c0_i32, %c0_i32_0 : i32, i32
  }
  func.func @transform_11(%arg0: i32) -> (i32, i32) {
    %c0_i32 = arith.constant 0 : i32
    %c0_i32_0 = arith.constant 0 : i32
    %c0_i32_1 = arith.constant 0 : i32
    return %c0_i32, %c0_i32_0 : i32, i32
  }
  func.func @transform_12(%arg0: i32) -> (i32, i32) {
    %c0_i32 = arith.constant 0 : i32
    %c0_i32_0 = arith.constant 0 : i32
    %c0_i32_1 = arith.constant 0 : i32
    return %c0_i32, %c0_i32_0 : i32, i32
  }
  func.func @transform_13(%arg0: i32) -> (i32, i32) {
    %c0_i32 = arith.constant 0 : i32
    %c0_i32_0 = arith.constant 0 : i32
    %c0_i32_1 = arith.constant 0 : i32
    return %c0_i32, %c0_i32_0 : i32, i32
  }
  func.func @transform_14(%arg0: i32) -> (i32, i32) {
    %c0_i32 = arith.constant 0 : i32
    %c0_i32_0 = arith.constant 0 : i32
    %c0_i32_1 = arith.constant 0 : i32
    return %c0_i32, %c0_i32_0 : i32, i32
  }
  func.func @transform_15(%arg0: i32) -> (i32, i32) {
    %c0_i32 = arith.constant 0 : i32
    %c0_i32_0 = arith.constant 0 : i32
    %c0_i32_1 = arith.constant 0 : i32
    return %c0_i32, %c0_i32_0 : i32, i32
  }
  func.func @transform_16(%arg0: i32) -> (i32, i32) {
    %c0_i32 = arith.constant 0 : i32
    %c0_i32_0 = arith.constant 0 : i32
    %c0_i32_1 = arith.constant 0 : i32
    return %c0_i32, %c0_i32_0 : i32, i32
  }
  func.func @transform_17(%arg0: i32) -> (i32, i32) {
    %c0_i32 = arith.constant 0 : i32
    %c0_i32_0 = arith.constant 0 : i32
    %c0_i32_1 = arith.constant 0 : i32
    return %c0_i32, %c0_i32_0 : i32, i32
  }
  func.func @transform_18(%arg0: i32) -> (i32, i32) {
    %c0_i32 = arith.constant 0 : i32
    %c0_i32_0 = arith.constant 0 : i32
    %c0_i32_1 = arith.constant 0 : i32
    return %c0_i32, %c0_i32_0 : i32, i32
  }
  func.func @transform_19(%arg0: i32) -> (i32, i32) {
    %c0_i32 = arith.constant 0 : i32
    %c0_i32_0 = arith.constant 0 : i32
    %c0_i32_1 = arith.constant 0 : i32
    return %c0_i32, %c0_i32_0 : i32, i32
  }
  func.func @transform_20(%arg0: i32) -> (i32, i32) {
    %c0_i32 = arith.constant 0 : i32
    %c0_i32_0 = arith.constant 0 : i32
    %c0_i32_1 = arith.constant 0 : i32
    return %c0_i32, %c0_i32_0 : i32, i32
  }
  func.func @transform_21(%arg0: i32) -> (i32, i32) {
    %c0_i32 = arith.constant 0 : i32
    %c0_i32_0 = arith.constant 0 : i32
    %c0_i32_1 = arith.constant 0 : i32
    return %c0_i32, %c0_i32_0 : i32, i32
  }
  func.func @transform_22(%arg0: i32) -> (i32, i32, i32) {
    %c0_i32 = arith.constant 0 : i32
    %c0_i32_0 = arith.constant 0 : i32
    %c0_i32_1 = arith.constant 0 : i32
    return %arg0, %c0_i32, %c0_i32_0 : i32, i32, i32
  }
  func.func @transform_23(%arg0: i32) -> (i32, i32, i32) {
    %c0_i32 = arith.constant 0 : i32
    %c0_i32_0 = arith.constant 0 : i32
    %c0_i32_1 = arith.constant 0 : i32
    return %arg0, %c0_i32, %c0_i32_0 : i32, i32, i32
  }
  func.func @transform_24(%arg0: i32) -> (i32, i32, i32, i32) {
    %c0_i32 = arith.constant 0 : i32
    %c0_i32_0 = arith.constant 0 : i32
    %c0_i32_1 = arith.constant 0 : i32
    %c0_i32_2 = arith.constant 0 : i32
    return %arg0, %c0_i32, %c0_i32_0, %c0_i32_1 : i32, i32, i32, i32
  }
}

</mosaic_0001>

<bundles_post_ra>
// kernel: tpu_custom_call.1
= control target key start
LH: loop header
LB: loop body
LE: loop exit
PB: predicated region body
PF: predicated region fallthrough
CT: control target
= control target key end

     0   :  { %s6014_s0 = inlined_call_operand.hbm [shape: f32[2,16,64], index: 0, kind: input, shape index: {}]   ;;  %s6015_s1 = inlined_call_operand.hbm [shape: f32[2,16,64], index: 1, kind: input, shape index: {}]   ;;  %s6016_s2 = inlined_call_operand.hbm [shape: f32[16,16], index: 2, kind: input, shape index: {}]   ;;  %s6017_s3 = inlined_call_operand.hbm [shape: bf16[64,64], index: 3, kind: input, shape index: {}]   ;;  %s6018_s4 = inlined_call_operand.hbm [shape: bf16[64,64], index: 4, kind: input, shape index: {}]   ;;  %s6019_s5 = inlined_call_operand.hbm [shape: bf16[64,64], index: 5, kind: input, shape index: {}]   ;;  %s6020_s6 = inlined_call_operand.hbm [shape: bf16[64,64], index: 6, kind: input, shape index: {}]   ;;  %s6021_s7 = inlined_call_operand.vmem [shape: f32[1,64], index: 7, kind: input, shape index: {}]   ;;  %s6022_s8 = inlined_call_operand.hbm [shape: bf16[64,64], index: 8, kind: input, shape index: {}]   ;;  %s6023_s9 = inlined_call_operand.vmem [shape: f32[1,64], index: 9, kind: input, shape index: {}]   ;;  %s6024_s10 = inlined_call_operand.hbm [shape: bf16[64,64], index: 10, kind: input, shape index: {}]   ;;  %s6025_s11 = inlined_call_operand.vmem [shape: f32[1,64], index: 11, kind: input, shape index: {}]   ;;  %s6026_s12 = inlined_call_operand.hbm [shape: bf16[64,64], index: 12, kind: input, shape index: {}]   ;;  %s6027_s13 = inlined_call_operand.vmem [shape: f32[1,64], index: 13, kind: input, shape index: {}]   ;;  %s6028_s14 = inlined_call_operand.hbm [shape: bf16[64,64], index: 14, kind: input, shape index: {}]   ;;  %s6029_s15 = inlined_call_operand.vmem [shape: f32[1,64], index: 15, kind: input, shape index: {}]   ;;  %s6030_s16 = inlined_call_operand.hbm [shape: bf16[64,64], index: 16, kind: input, shape index: {}]   ;;  %s6031_s17 = inlined_call_operand.vmem [shape: f32[1,64], index: 17, kind: input, shape index: {}]   ;;  %s6032_s18 = inlined_call_operand.vmem [shape: f32[1,64], index: 18, kind: input, shape index: {}]   ;;  %s6033_s19 = inlined_call_operand.vmem [shape: f32[1,64], index: 19, kind: input, shape index: {}]   ;;  %s6034_s20 = inlined_call_operand.vmem [shape: f32[1,64], index: 20, kind: input, shape index: {}]   ;;  %s6035_s21 = inlined_call_operand.vmem [shape: f32[1,64], index: 21, kind: input, shape index: {}]   ;;  %s6036_s22 = inlined_call_operand.hbm [shape: f32[2,16,64], index: 22, kind: output, shape index: {0}]   ;;  %s6037_s23 = inlined_call_operand.hbm [shape: f32[2,16,64], index: 23, kind: output, shape index: {1}]   ;;  %s6038_s24 = inlined_call_operand.hbm [shape: f32[2,4,16,16], index: 24, kind: output, shape index: {2}]  }
   0x1   :  { %6055 = sst [smem:[#allocation40_spill]] %s6014_s0 }
   0x2   :  { %6056 = sst [smem:[#allocation41_spill]] %s6015_s1 }
   0x3   :  { %6057 = sst [smem:[#allocation42_spill]] %s6016_s2 }
   0x4   :  { %6058 = sst [smem:[#allocation43_spill]] %s6017_s3 }
   0x5   :  { %6059 = sst [smem:[#allocation44_spill]] %s6018_s4 }
   0x6   :  { %6060 = sst [smem:[#allocation45_spill]] %s6019_s5 }
   0x7   :  { %6061 = sst [smem:[#allocation46_spill]] %s6020_s6 }
   0x8   :  { %6062 = sst [smem:[#allocation47_spill]] %s6021_s7 }
   0x9   :  { %6063 = sst [smem:[#allocation48_spill]] %s6022_s8 }
   0xa   :  { %6064 = sst [smem:[#allocation49_spill]] %s6023_s9 }
   0xb   :  { %6065 = sst [smem:[#allocation50_spill]] %s6024_s10 }
   0xc   :  { %6066 = sst [smem:[#allocation51_spill]] %s6026_s12 }
   0xd   :  { %6067 = sst [smem:[#allocation52_spill]] %s6027_s13 }
   0xe   :  { %6068 = sst [smem:[#allocation53_spill]] %s6028_s14 }
   0xf   :  { %6069 = sst [smem:[#allocation54_spill]] %s6030_s16 }
  0x10   :  { %6070 = sst [smem:[#allocation55_spill]] %s6031_s17 }
  0x11   :  { %6071 = sst [smem:[#allocation56_spill]] %s6034_s20 }
  0x12   :  { %6072 = sst [smem:[#allocation57_spill]] %s6035_s21 }
  0x13   :  { %6073 = sst [smem:[#allocation58_spill]] %s6036_s22 }
  0x14   :  { %6074 = sst [smem:[#allocation59_spill]] %s6037_s23 }
  0x15   :  { %6075 = sst [smem:[#allocation60_spill]] %s6038_s24 }
  0x16   :  { %30 = vsyncpa [#allocation3], 0 }
  0x17   :  { %32 = vsyncpa [#allocation3 + $0x1], 0 }
  0x18   :  { %33 = vsyncpa [#allocation6], 0 }
  0x19   :  { %35 = vsyncpa [#allocation6 + $0x1], 0 }
  0x1a   :  { %36 = vsyncpa [#allocation9], 0 }
  0x1b   :  { %37 = vsyncpa [#allocation12], 0 }
  0x1c   :  { %38 = vsyncpa [#allocation15], 0 }
  0x1d   :  { %39 = vsyncpa [#allocation18], 0 }
  0x1e   :  { %40 = vsyncpa [#allocation21], 0 }
  0x1f   :  { %41 = vsyncpa [#allocation4], 0 }
  0x20   :  { %43 = vsyncpa [#allocation4 + $0x1], 0 }
  0x21   :  { %44 = vsyncpa [#allocation24], 0 }
  0x22   :  { %46 = vsyncpa [#allocation24 + $0x1], 0  ;;  %s4832_s5 = smov 0   ;;  %s4834_s26 = smov 0  }
  0x23   :  { %s4836_s27 = smov 0   ;;  %s4838_s28 = smov 0  }
  0x24 LB: > { %6076 = sst [smem:[#allocation36_spill]] %s4676_s27  ;;  %s4856_s7 = sadd.s32 4294967295, %s4680_s28   ;;  %s4680_s28 = sphi %s4838_s28, %s6114_s28   ;;  %s4676_s27 = sphi %s4836_s27, %s6116_s27   ;;  %s4672_s26 = sphi %s4834_s26, %s6118_s26   ;;  %s4668_s5 = sphi %s4832_s5, %s6117_s5  }
  0x25   : > { %s6077_s29 = sld [smem:[#allocation42_spill]]  ;;  %p3563_p0 = scmp.ge.s32.totalorder %s4680_s28, 1 }
  0x26   : > { %p73_p1 = scmp.eq.s32.totalorder %s4856_s7, 0  ;;  %p607_p2 = scmp.lt.s32.totalorder %s4680_s28, 3 }
  0x27   : > { %s4682_s3 = smov [#allocation7]   ;;  %s6079_s1 = sld [smem:[#allocation43_spill]] }
  0x28   : > { %p4861_p3 = pnand %p3563_p0, %p607_p2  ;;  %s620_s25 = sshll.u32 %s4682_s3, 4  ;;  %s621_s25 = int_to_ptr.vmem [resolvable:$true] %s620_s25 }
  0x29   : > { %s6044_s3 = smov 128   ;;  %s6046_s22 = smov 8  }
  0x2a   : > { %p3860_p4 = pneg %p4861_p3  ;;  %s4686_s8 = smov 64  }
  0x2b   : > { %s618_s0 = sshll.u32 %s6077_s29, 4  ;;  %s4683_s29 = smov [#allocation8]   ;;  %s619_s0 = int_to_ptr.hbm [resolvable:$true] %s618_s0 }
  0x2c   : > { %p4873_p6 = pnand %p3860_p4, %p73_p1  ;;  %s634_s24 = sshll.u32 %s4683_s29, 4  ;;  %s635_s24 = int_to_ptr.vmem [resolvable:$true] %s634_s24 }
  0x2d   : > { %s632_s6 = sshll.u32 %s6079_s1, 4  ;;  %s4687_s4 = smov 4   ;;  %s633_s6 = int_to_ptr.hbm [resolvable:$true] %s632_s6 }
  0x2e   : > { %3863 = dma.hbm_to_vmem [thread:$0]  (!%p4873_p6), %s619_s0, 256, %s621_s25, [#allocation6], %s6044_s3, %s6044_s3, %s6046_s22  }
  0x2f   : > { %3866 = dma.hbm_to_vmem [thread:$0]  (!%p4873_p6), %s633_s6, 512, %s635_s24, [#allocation9], %s4686_s8, %s4686_s8, %s4687_s4  }
  0x30   : > { %s6081_s21 = sld [smem:[#allocation45_spill]]  ;;  %s4688_s20 = smov [#allocation11]  }
  0x31   : > { %s662_s17 = sshll.u32 %s4688_s20, 4  ;;  %s6082_s25 = sld [smem:[#allocation48_spill]]  ;;  %s663_s17 = int_to_ptr.vmem [resolvable:$true] %s662_s17 }
  0x32   : > { %s4689_s24 = smov [#allocation14]   ;;  %s6083_s12 = sld [smem:[#allocation51_spill]] }
  0x33   : > { %s693_s6 = sshll.u32 %s4689_s24, 4  ;;  %s6084_s1 = sld [smem:[#allocation44_spill]]  ;;  %s694_s6 = int_to_ptr.vmem [resolvable:$true] %s693_s6 }
  0x34   : > { %s4691_s22 = smov [#allocation10]   ;;  %s6086_s10 = sld [smem:[#allocation50_spill]] }
  0x35   : > { %s6087_s14 = sld [smem:[#allocation53_spill]]  ;;  %s4695_s13 = smov [#allocation20]  }
  0x36   : > { %s660_s29 = sshll.u32 %s6081_s21, 4  ;;  %s6088_s16 = sld [smem:[#allocation54_spill]]  ;;  %s661_s29 = int_to_ptr.hbm [resolvable:$true] %s660_s29 }
  0x37   : > { %s691_s3 = sshll.u32 %s6082_s25, 4  ;;  %s648_s25 = sshll.u32 %s4691_s22, 4  ;;  %s692_s3 = int_to_ptr.hbm [resolvable:$true] %s691_s3  ;;  %s649_s25 = int_to_ptr.vmem [resolvable:$true] %s648_s25 }
  0x38   : > { %3872 = dma.hbm_to_vmem [thread:$0]  (!%p4873_p6), %s661_s29, 512, %s663_s17, [#allocation12], %s4686_s8, %s4686_s8, %s4687_s4  }
  0x39   : > { %s725_s21 = sshll.u32 %s6083_s12, 4  ;;  %s646_s0 = sshll.u32 %s6084_s1, 4  ;;  %s726_s21 = int_to_ptr.hbm [resolvable:$true] %s725_s21  ;;  %s647_s0 = int_to_ptr.hbm [resolvable:$true] %s646_s0 }
  0x3a   : > { %3878 = dma.hbm_to_vmem [thread:$0]  (!%p4873_p6), %s692_s3, 512, %s694_s6, [#allocation15], %s4686_s8, %s4686_s8, %s4687_s4  }
  0x3b   : > { %s4690_s17 = smov [#allocation17]   ;;  %s6085_s12 = sld [smem:[#allocation46_spill]] }
  0x3c   : > { %s727_s29 = sshll.u32 %s4690_s17, 4  ;;  %s708_s20 = sshll.u32 %s6086_s10, 4  ;;  %s728_s29 = int_to_ptr.vmem [resolvable:$true] %s727_s29  ;;  %s709_s20 = int_to_ptr.hbm [resolvable:$true] %s708_s20 }
  0x3d   : > { %3884 = dma.hbm_to_vmem [thread:$0]  (!%p4873_p6), %s726_s21, 512, %s728_s29, [#allocation18], %s4686_s8, %s4686_s8, %s4687_s4  }
  0x3e   : > { %3869 = dma.hbm_to_vmem [thread:$0]  (!%p4873_p6), %s647_s0, 512, %s649_s25, [#allocation9], %s4686_s8, %s4686_s8, %s4687_s4  }
  0x3f   : > { %s4692_s1 = smov [#allocation13]   ;;  %s742_s22 = sshll.u32 %s6087_s14, 4  ;;  %s743_s22 = int_to_ptr.hbm [resolvable:$true] %s742_s22 }
  0x40   : > { %s676_s21 = sshll.u32 %s4692_s1, 4  ;;  %s759_s23 = sshll.u32 %s6088_s16, 4  ;;  %s677_s21 = int_to_ptr.vmem [resolvable:$true] %s676_s21  ;;  %s760_s23 = int_to_ptr.hbm [resolvable:$true] %s759_s23 }
  0x41   : > { %s674_s3 = sshll.u32 %s6085_s12, 4  ;;  %s4693_s12 = smov [#allocation16]   ;;  %s675_s3 = int_to_ptr.hbm [resolvable:$true] %s674_s3 }
  0x42   : > { %3875 = dma.hbm_to_vmem [thread:$0]  (!%p4873_p6), %s675_s3, 512, %s677_s21, [#allocation12], %s4686_s8, %s4686_s8, %s4687_s4  }
  0x43   : > { %s710_s17 = sshll.u32 %s4693_s12, 4  ;;  %s4694_s3 = smov [#allocation19]   ;;  %s711_s17 = int_to_ptr.vmem [resolvable:$true] %s710_s17 }
  0x44   : > { %3881 = dma.hbm_to_vmem [thread:$0]  (!%p4873_p6), %s709_s20, 512, %s711_s17, [#allocation15], %s4686_s8, %s4686_s8, %s4687_s4  }
  0x45   : > { %s744_s6 = sshll.u32 %s4694_s3, 4  ;;  %s761_s20 = sshll.u32 %s4695_s13, 4  ;;  %s745_s6 = int_to_ptr.vmem [resolvable:$true] %s744_s6  ;;  %s762_s20 = int_to_ptr.vmem [resolvable:$true] %s761_s20 }
  0x46   : > { %3887 = dma.hbm_to_vmem [thread:$0]  (!%p4873_p6), %s743_s22, 512, %s745_s6, [#allocation18], %s4686_s8, %s4686_s8, %s4687_s4  }
  0x47   : > { %3890 = dma.hbm_to_vmem [thread:$0]  (!%p4873_p6), %s760_s23, 512, %s762_s20, [#allocation21], %s4686_s8, %s4686_s8, %s4687_s4  }
  0x48   : > { %s6048_s1 = sadd.s32 4294967294, %s4680_s28   ;;  %s4953_s21 = sadd.s32 1, %s4680_s28  }
  0x49   : > { %6089 = sst [smem:[#allocation37_spill]] %s4953_s21  ;;  %s56_s12 = ssub.s32 %s4680_s28, %s4953_s21 }
  0x4a   : > { %s59_s17 = sadd.s32 1, %s4676_s27  ;;  %p57_p7 = scmp.eq.s32.totalorder %s56_s12, 0 }
  0x4b   : > { %p66_p8 = scmp.ne.s32.totalorder %s4676_s27, %s4672_s26  ;;  %p67_p9 = scmp.eq.s32.totalorder %s4680_s28, 0 }
  0x4c   : > { %p72_p10 = scmp.ne.s32.totalorder %s4672_s26, %s4668_s5  ;;  %p542_p13 = scmp.eq.s32.totalorder %s4856_s7, 1 }
  0x4d   : > { %s4964_s29 = scalar_select %p57_p7, %s4676_s27, %s59_s17  }
  0x4e   : > { %p4966_p11 = por %p67_p9, %p66_p8  ;;  %p4972_p12 = por %p73_p1, %p72_p10 }
  0x4f   : > { %6090 = sst [smem:[#allocation38_spill]] %s4964_s29  ;;  %p548_p0 = scmp.eq.s32.totalorder %s6048_s1, 1 }
  0x50   : > { %p3918_p2 = scmp.lt.s32.totalorder %s4680_s28, 2  ;;  %s790_s4 = sand.u32 1, %s4676_s27  }
  0x51   : > { %p4981_p4 = por %p542_p13, %p66_p8  ;;  %p4985_p6 = por %p548_p0, %p72_p10 }
  0x52   : > { %s4989_s25 = sshll.u32 %s790_s4, 4  ;;  %s3769_s24 = sshll.u32 %s4680_s28, 4 }
  0x53   : > { %s6094_s22 = scalar_select %p4985_p6, 1, 0 }
  0x54   : > { %s6096_s6 = sld [smem:[#allocation40_spill]]  ;;  %s794_s20 = scalar_lea.vmem [#allocation2], %s4989_s25 }
  0x55   : > { %6095 = sst [smem:[#allocation39_spill]] %s6094_s22  ;;  %s802_s12 = sshll.u32 %s794_s20, 4  ;;  %s803_s12 = int_to_ptr.vmem [resolvable:$true] %s802_s12 }
  0x56   : > { %p4998_p7 = pnand %p3918_p2, %p4966_p11  ;;  %s6098_s16 = sld [smem:[#allocation41_spill]] }
  0x57   : > { %s791_s21 = scalar_lea.sflag [#allocation3], %s790_s4 }
  0x58   : > { %p4470_p9 = pneg %p4998_p7 }
  0x5a   : > { %s799_s13 = scalar_lea.hbm %s6096_s6, %s3769_s24  ;;  %s4473_s20 = scalar_lea.hbm %s6096_s6, 32 }
  0x5b   : > { %s800_s17 = sshll.u32 %s799_s13, 4  ;;  %s801_s17 = int_to_ptr.hbm [resolvable:$true] %s800_s17 }
  0x5c   : > { %s821_s29 = scalar_lea.hbm %s6098_s16, %s3769_s24  ;;  %s4466_s23 = sshra.s32 %s801_s17, 4  ;;  %s4467_s23 = int_to_ptr.hbm [resolvable:$true] %s4466_s23 }
  0x5d   : > { %s822_s27 = sshll.u32 %s821_s29, 4  ;;  %s4468_s3 = scalar_lea.hbm %s4467_s23, 16  ;;  %s823_s27 = int_to_ptr.hbm [resolvable:$true] %s822_s27 }
  0x5e   : > { %p4469_p8 = scmp.ne.s32.totalorder %s4467_s23, %s4468_s3  ;;  %p4474_p13 = scmp.lt.s32.totalorder %s4467_s23, %s6096_s6 }
  0x5f   : > { %p4475_p0 = scmp.lt.s32.totalorder %s4473_s20, %s4468_s3 }
  0x60   : > { %p4471_p10 = pnand %p4470_p9, %p4469_p8 }
  0x61   : > { %p4476_p2 = por %p4475_p0, %p4474_p13 }
  0x62   : > { %p4472_p11 = pneg %p4471_p10 }
  0x64   : > { %p4477_p5 = pnand %p4476_p2, %p4472_p11 }
  0x66   : > { %4480 = shalt.err (!%p4477_p5)
}
  0x67   : > { %s6099_s29 = smov 8   ;;  %s6100_s4 = smov 128  }
  0x68   : > { %3894 = dma.hbm_to_vmem [thread:$0]  (!%p4998_p7), %s801_s17, 256, %s803_s12, %s791_s21, %s6100_s4, %s6100_s4, %s6099_s29  }
  0x69   : > { %s816_s24 = scalar_lea.vmem [#allocation5], %s4989_s25  ;;  %s812_s13 = sand.u32 1, %s4680_s28  }
  0x6a   : > { %s824_s2 = sshll.u32 %s816_s24, 4  ;;  %s813_s10 = scalar_lea.sflag [#allocation6], %s812_s13  ;;  %s825_s2 = int_to_ptr.vmem [resolvable:$true] %s824_s2 }
  0x6b   : > { %s4496_s23 = sshra.s32 %s823_s27, 4  ;;  %s4503_s6 = scalar_lea.hbm %s6098_s16, 32  ;;  %s4497_s23 = int_to_ptr.hbm [resolvable:$true] %s4496_s23 }
  0x6c   : > { %s4498_s3 = scalar_lea.hbm %s4497_s23, 16  ;;  %p4504_p11 = scmp.lt.s32.totalorder %s4497_s23, %s6098_s16 }
  0x6d   : > { %p4499_p8 = scmp.ne.s32.totalorder %s4497_s23, %s4498_s3  ;;  %p4505_p13 = scmp.lt.s32.totalorder %s4503_s6, %s4498_s3 }
  0x6f   : > { %p4501_p5 = pnand %p4499_p8, %p4470_p9  ;;  %p4506_p0 = por %p4505_p13, %p4504_p11 }
  0x71   : > { %p4502_p10 = pneg %p4501_p5 }
  0x73   : > { %p4507_p2 = pnand %p4506_p0, %p4502_p10 }
  0x75   : > { %4510 = shalt.err (!%p4507_p2)
}
  0x76   : > { %3897 = dma.hbm_to_vmem [thread:$0]  (!%p4998_p7), %s823_s27, 256, %s825_s2, %s813_s10, %s6100_s4, %s6100_s4, %s6099_s29  }
  0x77   : > { %836 = sbr.rel (%p4861_p3) target bundleno = 2359 (0x937), region = 108  ;;  %s5040_s25 = sand.u32 (!%p4861_p3), 1, %s4672_s26  }
  0x78   : > { %s5043_s22 = sshll.u32 (!%p4861_p3), %s5040_s25, 4  ;;  %s839_s6 = scalar_lea.sflag (!%p4861_p3), [#allocation3], %s5040_s25 }
  0x79   : > { %s5047_s12 = scalar_lea.vmem (!%p4861_p3), [#allocation2], %s5043_s22 }
  0x7c   : > { %4627 = dma.done.wait (%p4972_p12), %s839_s6, 256  }
  0x7d   : > { %4629 = vsyncadd (%p4972_p12), %s839_s6, 4294967040  ;;  %s6054_s27 = sand.u32 1, %s4856_s7   ;;  %s5057_s1 = scalar_lea.vmem [#allocation5], %s5043_s22 }
  0x7e   : > { %s849_s30 = scalar_lea.sflag [#allocation6], %s6054_s27 }
  0x7f   : > { %4631 = dma.done.wait (%p4972_p12), %s849_s30, 256  }
  0x80   : > { %4633 = vsyncadd (%p4972_p12), %s849_s30, 4294967040 }
  0x81   : > { %4635 = dma.done.wait (%p73_p1), [#allocation6], 256  }
  0x82   : > { %4637 = vsyncadd (%p73_p1), [#allocation6], 4294967040 }
  0x83   : > { %4639 = dma.done.wait (%p73_p1), [#allocation9], 1024  }
  0x84   : > { %4641 = vsyncadd (%p73_p1), [#allocation9], 4294966272 }
  0x85   : > { %4643 = dma.done.wait (%p73_p1), [#allocation12], 1024  }
  0x86   : > { %4645 = vsyncadd (%p73_p1), [#allocation12], 4294966272 }
  0x87   : > { %4647 = dma.done.wait (%p73_p1), [#allocation15], 1024  }
  0x88   : > { %4649 = vsyncadd (%p73_p1), [#allocation15], 4294966272 }
  0x89   : > { %4651 = dma.done.wait (%p73_p1), [#allocation18], 1024  }
  0x8a   : > { %4653 = vsyncadd (%p73_p1), [#allocation18], 4294966272 }
  0x8b   : > { %4655 = dma.done.wait (%p73_p1), [#allocation21], 512  }
  0x8c   : > { %4657 = vsyncadd (%p73_p1), [#allocation21], 4294966784  ;;  %v3774_v0 = vld [vmem:[#allocation8 + $0x18] sm:$0xff]  ;;  %v3773_v2 = vld [vmem:[#allocation8 + $0x10] sm:$0xff]  ;;  %vm1024_vm0 = vcmask 523264   ;;  %s4696_s8 = smov 80  }
  0x8d   : > { %v3778_v1 = vld [vmem:[#allocation10 + $0x18] sm:$0xff]  ;;  %1032 = vmatpush.bf16.msra.mxu0 %v3774_v0  ;;  %v3777_v3 = vld [vmem:[#allocation10 + $0x10] sm:$0xff]  ;;  %v3772_v5 = vld [vmem:[#allocation8 + $0x8] sm:$0xff]  ;;  %s4697_s17 = smov 112   ;;  %s4698_s29 = smov 96   ;;  %vm1158_vm1 = vcmask 1047556  }
  0x8e   : > { %1078 = vmatpush.bf16.msra.mxu1 %v3778_v1  ;;  %v3782_v4 = vld [vmem:[#allocation11 + $0x18] sm:$0xff]  ;;  %v3776_v6 = vld [vmem:[#allocation10 + $0x8] sm:$0xff]  ;;  %v3781_v7 = vld [vmem:[#allocation11 + $0x10] sm:$0xff]  ;;  %v4699_v27 = vmov 1983009808   ;;  %vm1892_vm2 = vcmask 130048  }
  0x8f   : > { %1127 = vmatpush.bf16.msra.mxu2 %v3782_v4  ;;  %v3771_v8 = vld [vmem:[#allocation8] sm:$0xff]  ;;  %v3780_v9 = vld [vmem:[#allocation11 + $0x8] sm:$0xff]  ;;  %v1163_v28 = vunpack.c.l.s4 %v4699_v27  ;;  %v4700_v41 = vmov 1934713408   ;;  %s4701_s4 = smov 16   ;;  %s3596_s24 = sshll.u32 %s5040_s25, 6 }
  0x90   : > { %v3775_v10 = vld [vmem:[#allocation10] sm:$0xff]  ;;  %v985_v12 = vld [vmem:[%s5047_s12 + $0x8] sm:$0xff]  ;;  %v1187_v42 = vunpack.c.l.s4 %v4700_v41  ;;  %s5576_s2 = scalar_lea.vmem [#allocation25], %s3596_s24  ;;  %s4702_s13 = smov 32   ;;  %vm2481_vm3 = vcmask 261120   ;;  %vm2484_vm4 = vcmask 392192  }
  0x91   : > { %1033 = vmatpush.bf16.msra.mxu0 %v3773_v2  ;;  %v984_v11 = vld [vmem:[%s5047_s12] sm:$0xff]  ;;  %v987_v16 = vld [vmem:[%s5057_s1 + $0x8] sm:$0xff]  ;;  %v5108_v34 = vunpack.c.0.s8 %v1163_v28  ;;  %s4703_s10 = smov 48   ;;  %s6101_s9 = sld [smem:[#allocation49_spill]] }
  0x92   : > { %1079 = vmatpush.bf16.msra.mxu1 %v3777_v3  ;;  %v990_v13 = vpack.c.bf16 %v985_v12, %v984_v11  ;;  %v3779_v14 = vld [vmem:[#allocation11] sm:$0xff]  ;;  %s6102_s21 = sld [smem:[#allocation47_spill]] }
  0x93   : > { %1128 = vmatpush.bf16.msra.mxu2 %v3781_v7  ;;  %v986_v15 = vld [vmem:[%s5057_s1] sm:$0xff]  ;;  %v5149_v7 = vunpack.c.0.s8 %v1187_v42  ;;  %s6104_s20 = sld [smem:[#allocation55_spill]] }
  0x94   : > { %v991_v17 = vpack.c.bf16 %v987_v16, %v986_v15  ;;  %s6105_s6 = sld [smem:[#allocation56_spill]] }
  0x95   : > { %1034 = vmatpush.bf16.msra.mxu0 %v3772_v5 }
  0x96   : > { %1080 = vmatpush.bf16.msra.mxu1 %v3776_v6 }
  0x97   : > { %1129 = vmatpush.bf16.msra.mxu2 %v3780_v9 }
  0x99   : > { %1035 = vmatpush.bf16.msra.mxu0 %v3771_v8 }
  0x9a   : > { %1081 = vmatpush.bf16.msra.mxu1 %v3775_v10 }
  0x9b   : > { %1130 = vmatpush.bf16.msra.mxu2 %v3779_v14 }
  0x9c   : > { %3613 = vmatmul.msk.bf16.vlgmr.msra.gmra.mxu0 %vm1024_vm0, %v990_v13 }
  0x9d   : > { %3630 = vmatmul.msk.bf16.vlgmr.msra.gmra.mxu1 %vm1024_vm0, %v990_v13 }
  0x9e   : > { %3647 = vmatmul.msk.bf16.vlgmr.msra.gmra.mxu2 %vm1024_vm0, %v991_v17 }
 0x119   : > { %v1037_v18 = vpop.f32.mrf.mxu0 }
 0x11a   : > { %v5094_v19 = vpop.f32.mrf.mxu1  ;;  %v1160_v32 = vrot.slane %v1037_v18, 4 }
 0x11b   : > { %v1400_v0 = vrot.slane %v5094_v19, 4 }
 0x121   : > { %v1039_v20 = vpop.f32.mrf.mxu0  ;;  %v5106_v31 = vpop.f32.mrf.mxu2 }
 0x122   : > { %v5096_v21 = vpop.f32.mrf.mxu1  ;;  %v4007_v23 = vpack.i.bf16 %v1039_v20, %v1037_v18  ;;  %v1216_v33 = vrot.slane %v1039_v20, 4 }
 0x123   : > { %v3997_v22 = vpack.i.bf16 %v5096_v21, %v5094_v19  ;;  %v1456_v4 = vrot.slane %v5096_v21, 4 }
 0x124   : > { %4008 = vrot.lane.b32.xlu2 %v4007_v23, %s4698_s29 }
 0x125   : > { %3998 = vrot.lane.b32.xlu1 %v3997_v22, %s4696_s8  ;;  %3988 = vrot.lane.b32.xlu0 %v3997_v22, %s4697_s17 }
 0x129   : > { %v5128_v56 = vpop.f32.mrf.mxu2 }
 0x12a   : > { %v5134_v59 = vpack.i.bf16 %v5128_v56, %v5106_v31 }
 0x12c   : > { %4013 = vrot.lane.b32.xlu2 %v4007_v23, %s4696_s8 }
 0x12d   : > { %3993 = vrot.lane.b32.xlu0 %v3997_v22, %s4698_s29  ;;  %4003 = vrot.lane.b32.xlu1 %v4007_v23, %s4697_s17 }
 0x134   : > { %4028 = vrot.lane.b32.xlu2 %v5134_v59, %s4696_s8  ;;  %s5907_s8 = scalar_lea.vmem [#allocation22], %s5043_s22 }
 0x135   : > { %4018 = vrot.lane.b32.xlu0 %v5134_v59, %s4697_s17  ;;  %4023 = vrot.lane.b32.xlu1 %v5134_v59, %s4698_s29  ;;  %s3809_s29 = sshll.u32 %s4856_s7, 6 }
 0x17e   : > { %v4009_v24 = vpop.permute.xlu2 %4008 }
 0x17f   : > { %v4011_v25 = vunpack.i.h.bf16 %v4009_v24  ;;  %v4010_v26 = vunpack.i.l.bf16 %v4009_v24 }
 0x181   : > { %v1214_v29 = vrot.slane %v4011_v25, 4  ;;  %v1157_v30 = vrot.slane %v4010_v26, 4  ;;  %v1161_v37 = vsel %vm1158_vm1, %v4010_v26, %v1160_v32  ;;  %v1217_v38 = vsel %vm1158_vm1, %v4011_v25, %v1216_v33 }
 0x182   : > { %v5123_v50 = vperm.slane %v1161_v37, %v5108_v34  ;;  %v5126_v51 = vperm.slane %v1217_v38, %v5108_v34 }
 0x183   : > { %v1215_v35 = vsel %vm1158_vm1, %v1214_v29, %v1039_v20  ;;  %v1159_v36 = vsel %vm1158_vm1, %v1157_v30, %v1037_v18 }
 0x184   : > { %v5117_v48 = vperm.slane %v1215_v35, %v5108_v34  ;;  %v5120_v49 = vperm.slane %v1159_v36, %v5108_v34  ;;  %v1196_v5 = vrot.slane %v5123_v50, 4  ;;  %v1252_v6 = vrot.slane %v5126_v51, 4 }
 0x186   : > { %v5114_v43 = vpop.permute.xlu2 %4013  ;;  %v1240_v8 = vrot.slane %v5117_v48, 4  ;;  %v1184_v9 = vrot.slane %v5120_v49, 4 }
 0x187   : > { %v4016_v57 = vunpack.i.h.bf16 %v5114_v43  ;;  %v4015_v58 = vunpack.i.l.bf16 %v5114_v43 }
 0x189   : > { %v1226_v10 = vrot.slane %v4016_v57, 4  ;;  %v1170_v14 = vrot.slane %v4015_v58, 4 }
 0x197   : > { %v3999_v39 = vpop.permute.xlu1 %3998  ;;  %v3989_v40 = vpop.permute.xlu0 %3988 }
 0x198   : > { %v4001_v44 = vunpack.i.h.bf16 %v3999_v39  ;;  %v4000_v45 = vunpack.i.l.bf16 %v3999_v39  ;;  %v3991_v46 = vunpack.i.h.bf16 %v3989_v40  ;;  %v3990_v47 = vunpack.i.l.bf16 %v3989_v40 }
 0x19a   : > { %v1466_v52 = vrot.slane %v4001_v44, 4  ;;  %v1410_v53 = vrot.slane %v4000_v45, 4  ;;  %v1468_v54 = vrot.slane %v3991_v46, 4  ;;  %v1412_v55 = vrot.slane %v3990_v47, 4 }
 0x19c   : > { %v1467_v60 = vsel %vm1158_vm1, %v1466_v52, %v3991_v46  ;;  %v1469_v61 = vsel %vm1158_vm1, %v4001_v44, %v1468_v54  ;;  %v1411_v62 = vsel %vm1158_vm1, %v1410_v53, %v3990_v47  ;;  %v1413_v63 = vsel %vm1158_vm1, %v4000_v45, %v1412_v55 }
 0x19d   : > { %v1473_v1 = vperm.slane %v1467_v60, %v5108_v34  ;;  %v1477_v2 = vperm.slane %v1469_v61, %v5108_v34  ;;  %v1417_v3 = vperm.slane %v1411_v62, %v5108_v34  ;;  %v1421_v11 = vperm.slane %v1413_v63, %v5108_v34 }
 0x19f   : > { %v3994_v12 = vpop.permute.xlu0 %3993  ;;  %v5158_v13 = vpop.permute.xlu1 %4003  ;;  %v1478_v18 = vrot.slane %v1473_v1, 4  ;;  %v1490_v20 = vrot.slane %v1477_v2, 4  ;;  %v1422_v22 = vrot.slane %v1417_v3, 4  ;;  %v1434_v28 = vrot.slane %v1421_v11, 4 }
 0x1a0   : > { %v3996_v15 = vunpack.i.h.bf16 %v3994_v12  ;;  %v3995_v16 = vunpack.i.l.bf16 %v3994_v12  ;;  %v4006_v17 = vunpack.i.h.bf16 %v5158_v13  ;;  %v4005_v23 = vunpack.i.l.bf16 %v5158_v13 }
 0x1a2   : > { %v1454_v24 = vrot.slane %v3996_v15, 4  ;;  %v1398_v25 = vrot.slane %v3995_v16, 4  ;;  %v1401_v26 = vsel %vm1158_vm1, %v3995_v16, %v1400_v0  ;;  %v1457_v27 = vsel %vm1158_vm1, %v3996_v15, %v1456_v4 }
 0x1a3   : > { %v1409_v29 = vperm.slane %v1401_v26, %v5108_v34  ;;  %v1465_v30 = vperm.slane %v1457_v27, %v5108_v34  ;;  %v1227_v32 = vsel %vm1158_vm1, %v1226_v10, %v4006_v17  ;;  %v1228_v36 = vrot.slane %v4006_v17, 4 }
 0x1a4   : > { %v1455_v33 = vsel %vm1158_vm1, %v1454_v24, %v5096_v21  ;;  %v1399_v35 = vsel %vm1158_vm1, %v1398_v25, %v5094_v19  ;;  %v1233_v37 = vperm.slane %v1227_v32, %v5108_v34  ;;  %v1171_v21 = vsel %vm1158_vm1, %v1170_v14, %v4005_v23 }
 0x1a5   : > { %v1461_v38 = vperm.slane %v1455_v33, %v5108_v34  ;;  %v1405_v39 = vperm.slane %v1399_v35, %v5108_v34  ;;  %v1435_v40 = vsel %vm1158_vm1, %v1434_v28, %v1409_v29  ;;  %v1436_v41 = vrot.slane %v1409_v29, 4 }
 0x1a6   : > { %v1441_v42 = vperm.slane %v1435_v40, %v5149_v7  ;;  %v1491_v44 = vsel %vm1158_vm1, %v1490_v20, %v1465_v30  ;;  %v1492_v45 = vrot.slane %v1465_v30, 4  ;;  %v1229_v12 = vsel %vm1158_vm1, %v4016_v57, %v1228_v36 }
 0x1a7   : > { %v1480_v19 = vrot.slane %v1461_v38, 4  ;;  %v1423_v46 = vsel %vm1158_vm1, %v1422_v22, %v1405_v39  ;;  %v1424_v47 = vrot.slane %v1405_v39, 4  ;;  %v1437_v52 = vsel %vm1158_vm1, %v1421_v11, %v1436_v41 }
 0x1a8   : > { %v5185_v53 = vperm.slane %v1423_v46, %v5149_v7  ;;  %v1445_v54 = vperm.slane %v1437_v52, %v5149_v7  ;;  %v1450_v55 = vrot.slane %v1441_v42, 4  ;;  %v1479_v60 = vsel %vm1158_vm1, %v1478_v18, %v1461_v38 }
 0x1a9   : > { %v1425_v61 = vsel %vm1158_vm1, %v1417_v3, %v1424_v47  ;;  %v1481_v62 = vsel %vm1158_vm1, %v1473_v1, %v1480_v19  ;;  %v5192_v63 = vperm.slane %v1479_v60, %v5149_v7  ;;  %v1493_v0 = vsel %vm1158_vm1, %v1477_v2, %v1492_v45 }
 0x1aa   : > { %v1433_v4 = vperm.slane %v1425_v61, %v5149_v7  ;;  %v1446_v10 = vrot.slane %v5185_v53, 4  ;;  %v1452_v11 = vrot.slane %v1445_v54, 4  ;;  %v5201_v14 = vsel %vm1158_vm1, 0.0, %v1450_v55 }
 0x1ab   : > { %v1489_v3 = vperm.slane %v1481_v62, %v5149_v7  ;;  %v1497_v1 = vperm.slane %v1491_v44, %v5149_v7  ;;  %v1501_v15 = vperm.slane %v1493_v0, %v5149_v7  ;;  %v1502_v17 = vrot.slane %v5192_v63, 4 }
 0x1ac   : > { %v5206_v16 = vrot.slane %v1433_v4, 4  ;;  %v5209_v2 = vsel %vm1158_vm1, 0.0, %v1452_v11  ;;  %v1521_v18 = vsel %vm1158_vm1, %v1452_v11, %v1441_v42  ;;  %v1237_v24 = vperm.slane %v1229_v12, %v5108_v34 }
 0x1ad   : > { %v5213_v20 = vrot.slane %v1489_v3, 4  ;;  %v1506_v57 = vrot.slane %v1497_v1, 4  ;;  %v1508_v22 = vrot.slane %v1501_v15, 4  ;;  %v5221_v26 = vperm.slane %v1521_v18, %v5108_v34 }
 0x1ae   : > { %v5218_v25 = vsel %vm1158_vm1, 0.0, %v5206_v16  ;;  %v1238_v27 = vrot.slane %v1233_v37, 4  ;;  %v1241_v28 = vsel %vm1158_vm1, %v1233_v37, %v1240_v8  ;;  %v1526_v33 = vrot.slane %v5209_v2, 4 }
 0x1af   : > { %v5228_v29 = vsel %vm1158_vm1, 0.0, %v5213_v20  ;;  %v5231_v30 = vsel %vm1158_vm1, 0.0, %v1506_v57  ;;  %v5234_v32 = vsel %vm1158_vm1, 0.0, %v1508_v22  ;;  %v1515_v35 = vrot.slane %v5218_v25, 4 }
 0x1b0   : > { %v1569_v36 = vrot.slane %v5228_v29, 4  ;;  %v1575_v38 = vsel %vm1158_vm1, %v1508_v22, %v1497_v1  ;;  %v1239_v8 = vsel %vm1158_vm1, %v1238_v27, %v5117_v48  ;;  %v1580_v37 = vrot.slane %v5234_v32, 4 }
 0x1b1   : > { %v1245_v39 = vperm.slane %v1239_v8, %v5149_v7  ;;  %v1249_v40 = vperm.slane %v1241_v28, %v5149_v7  ;;  %v1250_v41 = vrot.slane %v1237_v24, 4  ;;  %v5246_v42 = vperm.slane %v1575_v38, %v5108_v34 }
 0x1b2   : > { %v1172_v44 = vrot.slane %v4005_v23, 4  ;;  %v1177_v45 = vperm.slane %v1171_v21, %v5108_v34  ;;  %v1253_v19 = vsel %vm1158_vm1, %v1237_v24, %v1252_v6  ;;  %v1503_v25 = vsel %vm1158_vm1, 0.0, %v1502_v17 }
 0x1b3   : > { %v1262_v48 = vrot.slane %v1245_v39, 4  ;;  %v1264_v46 = vrot.slane %v1249_v40, 4  ;;  %v1251_v47 = vsel %vm1158_vm1, %v1250_v41, %v5126_v51  ;;  %v1261_v52 = vperm.slane %v1253_v19, %v5149_v7 }
 0x1b4   : > { %v1173_v54 = vsel %vm1158_vm1, %v4015_v58, %v1172_v44  ;;  %v1182_v55 = vrot.slane %v1177_v45, 4  ;;  %v1185_v13 = vsel %vm1158_vm1, %v1177_v45, %v1184_v9  ;;  %v1257_v23 = vperm.slane %v1251_v47, %v5149_v7 }
 0x1b5   : > { %v1265_v6 = vsel %vm1158_vm1, 0.0, %v1264_v46  ;;  %v1324_v21 = vsel %vm1158_vm1, %v1264_v46, %v1245_v39  ;;  %v1181_v60 = vperm.slane %v1173_v54, %v5108_v34  ;;  %v1447_v51 = vsel %vm1158_vm1, 0.0, %v1446_v10 }
 0x1b6   : > { %v1263_v61 = vsel %vm1158_vm1, 0.0, %v1262_v48  ;;  %v1329_v43 = vrot.slane %v1265_v6, 4  ;;  %v1183_v58 = vsel %vm1158_vm1, %v1182_v55, %v5120_v49  ;;  %v1193_v62 = vperm.slane %v1185_v13, %v5149_v7 }
 0x1b7   : > { %v1189_v9 = vperm.slane %v1183_v58, %v5149_v7  ;;  %v1194_v0 = vrot.slane %v1181_v60, 4  ;;  %v1197_v4 = vsel %vm1158_vm1, %v1181_v60, %v1196_v5  ;;  %v1266_v11 = vrot.slane %v1257_v23, 4 }
 0x1b8   : > { %v5277_v12 = vperm.slane %v1324_v21, %v5108_v34  ;;  %v1205_v10 = vperm.slane %v1197_v4, %v5149_v7  ;;  %v1208_v3 = vrot.slane %v1193_v62, 4  ;;  %v1268_v1 = vrot.slane %v1261_v52, 4 }
 0x1b9   : > { %v5281_v15 = vsel %vm1158_vm1, %v1329_v43, %v1263_v61  ;;  %v1195_v49 = vsel %vm1158_vm1, %v1194_v0, %v5123_v50  ;;  %v1206_v18 = vrot.slane %v1189_v9, 4  ;;  %v1267_v57 = vsel %vm1158_vm1, 0.0, %v1266_v11 }
 0x1ba   : > { %v1201_v22 = vperm.slane %v1195_v49, %v5149_v7  ;;  %v1209_v5 = vsel %vm1158_vm1, 0.0, %v1208_v3  ;;  %v1212_v24 = vrot.slane %v1205_v10, 4  ;;  %v1270_v28 = vsel %vm1158_vm1, %v1208_v3, %v1189_v9 }
 0x1bb   : > { %v1207_v27 = vsel %vm1158_vm1, 0.0, %v1206_v18  ;;  %v1275_v38 = vrot.slane %v1209_v5, 4  ;;  %v1335_v8 = vsel %vm1158_vm1, %v1268_v1, %v1257_v23  ;;  %v1269_v40 = vsel %vm1158_vm1, 0.0, %v1268_v1 }
 0x1bc   : > { %v1210_v39 = vrot.slane %v1201_v22, 4  ;;  %v1213_v50 = vsel %vm1158_vm1, 0.0, %v1212_v24  ;;  %v1281_v41 = vsel %vm1158_vm1, %v1212_v24, %v1201_v22  ;;  %v5296_v44 = vperm.slane %v1270_v28, %v5108_v34 }
 0x1bd   : > { %v5299_v45 = vsel %vm1158_vm1, %v1275_v38, %v1207_v27  ;;  %v5302_v17 = vperm.slane %v1281_v41, %v5108_v34  ;;  %v1286_v19 = vrot.slane %v1213_v50, 4  ;;  %v5306_v46 = vperm.slane %v1335_v8, %v5108_v34 }
 0x1be   : > { %v1211_v48 = vsel %vm1158_vm1, 0.0, %v1210_v39  ;;  %v1510_v47 = vsel %vm1158_vm1, %v5206_v16, %v5185_v53  ;;  %v1516_v52 = vsel %vm1158_vm1, %v1515_v35, %v1447_v51  ;;  %v1340_v54 = vrot.slane %v1269_v40, 4 }
 0x1bf   : > { %v1514_v55 = vperm.slane %v1510_v47, %v5108_v34  ;;  %v1520_v13 = vperm.slane %v1516_v52, %v5108_v34  ;;  %v1527_v23 = vsel %vm1158_vm1, %v1526_v33, %v5201_v14  ;;  %v5319_v6 = vsel %vm1158_vm1, %v1286_v19, %v1211_v48 }
 0x1c0   : > { %v1531_v21 = vperm.slane %v1527_v23, %v5108_v34  ;;  %v1546_v60 = vrot.slane %v5221_v26, 4  ;;  %v1564_v53 = vsel %vm1158_vm1, %v5213_v20, %v5192_v63  ;;  %v1570_v2 = vsel %vm1158_vm1, %v1569_v36, %v1503_v25 }
 0x1c1   : > { %v1534_v16 = vrot.slane %v1514_v55, 4  ;;  %v1568_v35 = vperm.slane %v1564_v53, %v5108_v34  ;;  %v1581_v14 = vsel %vm1158_vm1, %v1580_v37, %v5231_v30  ;;  %v1574_v51 = vperm.slane %v1570_v2, %v5108_v34 }
 0x1c2   : > { %v1547_v33 = vsel %vm1158_vm1, %v1531_v21, %v1546_v60  ;;  %v1585_v61 = vperm.slane %v1581_v14, %v5108_v34  ;;  %v1600_v63 = vrot.slane %v5246_v42, 4  ;;  %v5339_v20 = vsel %vm1158_vm1, %v1340_v54, %v1267_v57 }
 0x1c3   : > { %v1535_v29 = vsel %vm1158_vm1, %v1520_v13, %v1534_v16  ;;  %v1555_v36 = vperm.slane %v1547_v33, %v5149_v7  ;;  %v1588_v43 = vrot.slane %v1568_v35, 4  ;;  %v1532_v37 = vrot.slane %v1520_v13, 4 }
 0x1c4   : > { %v1543_v32 = vperm.slane %v1535_v29, %v5149_v7  ;;  %v1601_v30 = vsel %vm1158_vm1, %v1585_v61, %v1600_v63  ;;  %v1544_v58 = vrot.slane %v1531_v21, 4  ;;  %v1586_v4 = vrot.slane %v1574_v51, 4 }
 0x1c5   : > { %v1560_v62 = vrot.slane %v1555_v36, 4  ;;  %v1589_v9 = vsel %vm1158_vm1, %v1574_v51, %v1588_v43  ;;  %v1609_v0 = vperm.slane %v1601_v30, %v5149_v7  ;;  %v1533_v10 = vsel %vm1158_vm1, %v1532_v37, %v1514_v55 }
 0x1c6   : > { %v1597_v11 = vperm.slane %v1589_v9, %v5149_v7  ;;  %v1545_v3 = vsel %vm1158_vm1, %v1544_v58, %v5221_v26  ;;  %v1598_v1 = vrot.slane %v1585_v61, 4  ;;  %v1539_v57 = vperm.slane %v1533_v10, %v5149_v7 }
 0x1c7   : > { %v1561_v49 = vsel %vm1158_vm1, %v1560_v62, %v1543_v32  ;;  %v1614_v18 = vrot.slane %v1609_v0, 4  ;;  %v1551_v22 = vperm.slane %v1545_v3, %v5149_v7  ;;  %v1587_v24 = vsel %vm1158_vm1, %v1586_v4, %v1568_v35 }
 0x1c8   : > { %v1870_v5 = vpack.c.bf16 %v1561_v49, %v1561_v49  ;;  %v1599_v25 = vsel %vm1158_vm1, %v1598_v1, %v5246_v42  ;;  %v1562_v27 = vrot.slane %v1543_v32, 4  ;;  %v1593_v26 = vperm.slane %v1587_v24, %v5149_v7 }
 0x1c9   : > { %v1615_v28 = vsel %vm1158_vm1, %v1614_v18, %v1597_v11  ;;  %v1556_v38 = vrot.slane %v1551_v22, 4  ;;  %v1605_v8 = vperm.slane %v1599_v25, %v5149_v7  ;;  %v1616_v41 = vrot.slane %v1597_v11, 4 }
 0x1ca   : > { %v1871_v39 = vpack.c.bf16 %v1615_v28, %v1615_v28  ;;  %v1950_v50 = vunpack.c.l.b16 %v1870_v5  ;;  %v1563_v40 = vsel %vm1158_vm1, %v1555_v36, %v1562_v27  ;;  %v1558_v52 = vrot.slane %v1539_v57, 4 }
 0x1cb   : > { %v1557_v19 = vsel %vm1158_vm1, %v1556_v38, %v1539_v57  ;;  %v1610_v48 = vrot.slane %v1605_v8, 4  ;;  %v1872_v47 = vpack.c.bf16 %v1563_v40, %v1563_v40  ;;  %v1617_v55 = vsel %vm1158_vm1, %v1609_v0, %v1616_v41 }
 0x1cc   : > { %v1951_v54 = vunpack.c.l.b16 %v1871_v39  ;;  %v1866_v42 = vpack.c.bf16 %v1557_v19, %v1557_v19  ;;  %v1612_v13 = vrot.slane %v1593_v26, 4  ;;  %v1873_v21 = vpack.c.bf16 %v1617_v55, %v1617_v55 }
 0x1cd   : > { %v1611_v23 = vsel %vm1158_vm1, %v1610_v48, %v1593_v26  ;;  %v1980_v60 = vunpack.c.l.b16 %v1872_v47  ;;  %v1559_v53 = vsel %vm1158_vm1, %v1551_v22, %v1558_v52  ;;  %v1280_v36 = vperm.slane %v5299_v45, %v5108_v34 }
 0x1ce   : > { %v1952_v16 = vpack.c.b16 %v1951_v54, %v1950_v50  ;;  %v1867_v35 = vpack.c.bf16 %v1611_v23, %v1611_v23  ;;  %v1889_v2 = vunpack.c.l.b16 %v1866_v42  ;;  %v1613_v14 = vsel %vm1158_vm1, %v1605_v8, %v1612_v13 }
 0x1cf   : > { %v1981_v33 = vunpack.c.l.b16 %v1873_v21  ;;  %v1868_v51 = vpack.c.bf16 %v1559_v53, %v1559_v53  ;;  %v1869_v61 = vpack.c.bf16 %v1613_v14, %v1613_v14  ;;  %v1291_v43 = vperm.slane %v5319_v6, %v5108_v34 }
 0x1d0   : > { %v1957_v63 = vsel %vm1892_vm2, %v1952_v16, 0  ;;  %v1890_v29 = vunpack.c.l.b16 %v1867_v35  ;;  %v1294_v58 = vrot.slane %v5296_v44, 4  ;;  %v1306_v9 = vrot.slane %v5302_v17, 4 }
 0x1d1   : > { %1966 = vmatpush.bf16.xpose.msrb.mxu0 %v1957_v63  ;;  %v1982_v32 = vpack.c.b16 %v1981_v33, %v1980_v60  ;;  %v1920_v30 = vunpack.c.l.b16 %v1868_v51  ;;  %v1921_v37 = vunpack.c.l.b16 %v1869_v61  ;;  %v1334_v0 = vperm.slane %v5281_v15, %v5108_v34 }
 0x1d2   : > { %v1891_v62 = vpack.c.b16 %v1890_v29, %v1889_v2  ;;  %v1345_v45 = vperm.slane %v5339_v20, %v5108_v34  ;;  %v1295_v11 = vsel %vm1158_vm1, %v1280_v36, %v1294_v58  ;;  %v1348_v10 = vrot.slane %v5277_v12, 4 }
 0x1d3   : > { %v1987_v6 = vsel %vm1892_vm2, %v1982_v32, 0  ;;  %v1922_v4 = vpack.c.b16 %v1921_v37, %v1920_v30  ;;  %v1303_v3 = vperm.slane %v1295_v11, %v5149_v7  ;;  %v1307_v1 = vsel %vm1158_vm1, %v1291_v43, %v1306_v9  ;;  %v4024_v11 = vpop.permute.xlu1 %4023 }
 0x1d4   : > { %v1897_v59 = vsel %vm1892_vm2, %v1891_v62, 0  ;;  %1996 = vmatpush.bf16.xpose.msrb.mxu1 %v1987_v6  ;;  %v1360_v49 = vrot.slane %v5306_v46, 4  ;;  %v1315_v20 = vperm.slane %v1307_v1, %v5149_v7  ;;  %v1349_v18 = vsel %vm1158_vm1, %v1334_v0, %v1348_v10 }
 0x1d5   : > { %1906 = vmatpush.bf16.xpose.msra.mxu3 %v1897_v59  ;;  %v1927_v15 = vsel %vm1892_vm2, %v1922_v4, 0  ;;  %v1292_v57 = vrot.slane %v1280_v36, 4  ;;  %v1304_v5 = vrot.slane %v1291_v43, 4  ;;  %v1346_v24 = vrot.slane %v1334_v0, 4 }
 0x1d6   : > { %v1361_v22 = vsel %vm1158_vm1, %v1345_v45, %v1360_v49  ;;  %v1320_v25 = vrot.slane %v1315_v20, 4  ;;  %v1358_v28 = vrot.slane %v1345_v45, 4  ;;  %v1357_v38 = vperm.slane %v1349_v18, %v5149_v7  ;;  %v4019_v49 = vpop.permute.xlu0 %4018 }
 0x1d7   : > { %v1369_v27 = vperm.slane %v1361_v22, %v5149_v7  ;;  %v1293_v26 = vsel %vm1158_vm1, %v1292_v57, %v5296_v44  ;;  %v1305_v8 = vsel %vm1158_vm1, %v1304_v5, %v5302_v17  ;;  %v1322_v39 = vrot.slane %v1303_v3, 4 }
 0x1d8   : > { %v1321_v50 = vsel %vm1158_vm1, %v1320_v25, %v1303_v3  ;;  %v1311_v41 = vperm.slane %v1305_v8, %v5149_v7  ;;  %v1347_v48 = vsel %vm1158_vm1, %v1346_v24, %v5277_v12  ;;  %v1359_v47 = vsel %vm1158_vm1, %v1358_v28, %v5306_v46 }
 0x1d9   : > { %v1374_v40 = vrot.slane %v1369_v27, 4  ;;  %v1862_v19 = vpack.c.bf16 %v1321_v50, %v1321_v50  ;;  %v1323_v52 = vsel %vm1158_vm1, %v1315_v20, %v1322_v39  ;;  %v1299_v54 = vperm.slane %v1293_v26, %v5149_v7  ;;  %v4029_v39 = vpop.permute.xlu2 %4028 }
 0x1da   : > { %v1316_v17 = vrot.slane %v1311_v41, 4  ;;  %v1365_v42 = vperm.slane %v1359_v47, %v5149_v7  ;;  %v1376_v23 = vrot.slane %v1357_v38, 4  ;;  %v1864_v21 = vpack.c.bf16 %v1323_v52, %v1323_v52 }
 0x1db   : > { %v1375_v44 = vsel %vm1158_vm1, %v1374_v40, %v1357_v38  ;;  %v1945_v13 = vunpack.c.l.b16 %v1862_v19  ;;  %v1353_v12 = vperm.slane %v1347_v48, %v5149_v7  ;;  %v1318_v30 = vrot.slane %v1299_v54, 4 }
 0x1dc   : > { %v1863_v55 = vpack.c.bf16 %v1375_v44, %v1375_v44  ;;  %v1317_v60 = vsel %vm1158_vm1, %v1316_v17, %v1299_v54  ;;  %v1370_v53 = vrot.slane %v1365_v42, 4  ;;  %v1377_v35 = vsel %vm1158_vm1, %v1369_v27, %v1376_v23 }
 0x1dd   : > { %1936 = vmatpush.bf16.xpose.msrb.mxu3 %v1927_v15  ;;  %v1858_v46 = vpack.c.bf16 %v1317_v60, %v1317_v60  ;;  %v1865_v14 = vpack.c.bf16 %v1377_v35, %v1377_v35  ;;  %v1975_v33 = vunpack.c.l.b16 %v1864_v21  ;;  %v1372_v37 = vrot.slane %v1353_v12, 4 }
 0x1de   : > { %v1946_v16 = vunpack.c.l.b16 %v1863_v55  ;;  %v1371_v2 = vsel %vm1158_vm1, %v1370_v53, %v1353_v12  ;;  %v1319_v58 = vsel %vm1158_vm1, %v1311_v41, %v1318_v30  ;;  %v4025_v10 = vunpack.i.l.bf16 %v4024_v11 }
 0x1df   : > { %v1859_v61 = vpack.c.bf16 %v1371_v2, %v1371_v2  ;;  %v1884_v63 = vunpack.c.l.b16 %v1858_v46  ;;  %v1976_v29 = vunpack.c.l.b16 %v1865_v14  ;;  %v1373_v62 = vsel %vm1158_vm1, %v1365_v42, %v1372_v37 }
 0x1e0   : > { %v5410_v51 = vpack.c.b16 %v1946_v16, %v1945_v13  ;;  %v1860_v9 = vpack.c.bf16 %v1319_v58, %v1319_v58  ;;  %v1861_v0 = vpack.c.bf16 %v1373_v62, %v1373_v62  ;;  %v4026_v59 = vunpack.i.h.bf16 %v4024_v11 }
 0x1e1   : > { %v1885_v36 = vunpack.c.l.b16 %v1859_v61  ;;  %v5414_v43 = vpack.c.b16 %v1976_v29, %v1975_v33  ;;  %v1640_v3 = vrot.slane %v5106_v31, 4  ;;  %v1696_v1 = vrot.slane %v5128_v56, 4 }
 0x1e2   : > { %3650 = vmatmul.msk.bf16.vlgmr.msrb.gmra.mxu0 %vm1892_vm2, %v5410_v51  ;;  %v1915_v45 = vunpack.c.l.b16 %v1860_v9  ;;  %v1916_v6 = vunpack.c.l.b16 %v1861_v0  ;;  %v1638_v15 = vrot.slane %v4025_v10, 4  ;;  %v1694_v20 = vrot.slane %v4026_v59, 4 }
 0x1e3   : > { %v5416_v32 = vpack.c.b16 %v1885_v36, %v1884_v63  ;;  %3651 = vmatmul.msk.bf16.vlgmr.msrb.gmra.mxu1 %vm1892_vm2, %v5414_v43  ;;  %v4021_v18 = vunpack.i.h.bf16 %v4019_v49  ;;  %v4020_v57 = vunpack.i.l.bf16 %v4019_v49  ;;  %v1697_v22 = vsel %vm1158_vm1, %v4026_v59, %v1696_v1 }
 0x1e4   : > { %v5424_v4 = vpack.c.b16 %v1916_v6, %v1915_v45  ;;  %v1641_v5 = vsel %vm1158_vm1, %v4025_v10, %v1640_v3  ;;  %v1639_v24 = vsel %vm1158_vm1, %v1638_v15, %v5106_v31  ;;  %v1695_v25 = vsel %vm1158_vm1, %v1694_v20, %v5128_v56 }
 0x1e5   : > { %3648 = vmatmul.msk.bf16.vlgmr.msra.gmra.mxu3 %vm1892_vm2, %v5416_v32  ;;  %v1705_v27 = vperm.slane %v1697_v22, %v5108_v34  ;;  %v1649_v28 = vperm.slane %v1641_v5, %v5108_v34  ;;  %v1708_v38 = vrot.slane %v4021_v18, 4  ;;  %v1652_v26 = vrot.slane %v4020_v57, 4 }
 0x1e6   : > { %v1645_v8 = vperm.slane %v1639_v24, %v5108_v34  ;;  %v1701_v50 = vperm.slane %v1695_v25, %v5108_v34  ;;  %v4031_v40 = vunpack.i.h.bf16 %v4029_v39  ;;  %v4030_v41 = vunpack.i.l.bf16 %v4029_v39 }
 0x1e7   : > { %v1732_v19 = vrot.slane %v1705_v27, 4  ;;  %v1676_v48 = vrot.slane %v1649_v28, 4 }
 0x1e8   : > { %v1706_v47 = vrot.slane %v4031_v40, 4  ;;  %v1709_v31 = vsel %vm1158_vm1, %v4031_v40, %v1708_v38  ;;  %v1650_v52 = vrot.slane %v4030_v41, 4  ;;  %v1653_v56 = vsel %vm1158_vm1, %v4030_v41, %v1652_v26 }
 0x1e9   : > { %v1664_v44 = vrot.slane %v1645_v8, 4  ;;  %v1717_v54 = vperm.slane %v1709_v31, %v5108_v34  ;;  %v1661_v17 = vperm.slane %v1653_v56, %v5108_v34  ;;  %v1720_v42 = vrot.slane %v1701_v50, 4 }
 0x1ea   : > { %v1707_v55 = vsel %vm1158_vm1, %v1706_v47, %v4021_v18  ;;  %v1651_v13 = vsel %vm1158_vm1, %v1650_v52, %v4020_v57 }
 0x1eb   : > { %v1713_v23 = vperm.slane %v1707_v55, %v5108_v34  ;;  %v1730_v21 = vrot.slane %v1717_v54, 4  ;;  %v1657_v60 = vperm.slane %v1651_v13, %v5108_v34  ;;  %v1674_v12 = vrot.slane %v1661_v17, 4 }
 0x1ec   : > { %v1677_v53 = vsel %vm1158_vm1, %v1661_v17, %v1676_v48  ;;  %v1733_v16 = vsel %vm1158_vm1, %v1717_v54, %v1732_v19 }
 0x1ed   : > { %v1718_v46 = vrot.slane %v1713_v23, 4  ;;  %v1662_v35 = vrot.slane %v1657_v60, 4  ;;  %v1665_v2 = vsel %vm1158_vm1, %v1657_v60, %v1664_v44  ;;  %v1675_v14 = vsel %vm1158_vm1, %v1674_v12, %v1649_v28 }
 0x1ee   : > { %v1673_v33 = vperm.slane %v1665_v2, %v5149_v7  ;;  %v1681_v61 = vperm.slane %v1675_v14, %v5149_v7  ;;  %v1685_v63 = vperm.slane %v1677_v53, %v5149_v7  ;;  %v1721_v29 = vsel %vm1158_vm1, %v1713_v23, %v1720_v42 }
 0x1ef   : > { %v1663_v36 = vsel %vm1158_vm1, %v1662_v35, %v1645_v8  ;;  %v1719_v30 = vsel %vm1158_vm1, %v1718_v46, %v1701_v50  ;;  %v1729_v37 = vperm.slane %v1721_v29, %v5149_v7  ;;  %v1731_v58 = vsel %vm1158_vm1, %v1730_v21, %v1705_v27 }
 0x1f0   : > { %v1669_v62 = vperm.slane %v1663_v36, %v5149_v7  ;;  %v1688_v9 = vrot.slane %v1673_v33, 4  ;;  %v1690_v0 = vrot.slane %v1681_v61, 4  ;;  %v1692_v45 = vrot.slane %v1685_v63, 4 }
 0x1f1   : > { %v1725_v6 = vperm.slane %v1719_v30, %v5149_v7  ;;  %v1737_v11 = vperm.slane %v1731_v58, %v5149_v7  ;;  %v1741_v10 = vperm.slane %v1733_v16, %v5149_v7  ;;  %v1744_v59 = vrot.slane %v1729_v37, 4 }
 0x1f2   : > { %v1686_v3 = vrot.slane %v1669_v62, 4  ;;  %v1689_v1 = vsel %vm1158_vm1, 0.0, %v1688_v9  ;;  %v1691_v49 = vsel %vm1158_vm1, 0.0, %v1690_v0  ;;  %v1693_v15 = vsel %vm1158_vm1, 0.0, %v1692_v45 }
 0x1f3   : > { %v1742_v20 = vrot.slane %v1725_v6, 4  ;;  %v1745_v18 = vsel %vm1158_vm1, 0.0, %v1744_v59  ;;  %v1746_v57 = vrot.slane %v1737_v11, 4  ;;  %v1748_v22 = vrot.slane %v1741_v10, 4 }
 0x1f4   : > { %v1687_v5 = vsel %vm1158_vm1, 0.0, %v1686_v3  ;;  %v1755_v24 = vrot.slane %v1689_v1, 4  ;;  %v1761_v25 = vsel %vm1158_vm1, %v1692_v45, %v1681_v61  ;;  %v1766_v27 = vrot.slane %v1693_v15, 4 }
 0x1f5   : > { %3649 = vmatmul.msk.bf16.vlgmr.msrb.gmra.mxu3 %vm1892_vm2, %v5424_v4  ;;  %v1743_v28 = vsel %vm1158_vm1, 0.0, %v1742_v20  ;;  %v1747_v38 = vsel %vm1158_vm1, 0.0, %v1746_v57  ;;  %v1749_v26 = vsel %vm1158_vm1, 0.0, %v1748_v22  ;;  %v1809_v8 = vrot.slane %v1745_v18, 4 }
 0x1f6   : > { %v1767_v39 = vsel %vm1158_vm1, %v1766_v27, %v1691_v49  ;;  %v1815_v50 = vsel %vm1158_vm1, %v1748_v22, %v1737_v11  ;;  %v1820_v40 = vrot.slane %v1749_v26, 4  ;;  %v1750_v41 = vsel %vm1158_vm1, %v1688_v9, %v1669_v62 }
 0x1f7   : > { %v1754_v19 = vperm.slane %v1750_v41, %v5108_v34  ;;  %v1756_v48 = vsel %vm1158_vm1, %v1755_v24, %v1687_v5  ;;  %v1765_v47 = vperm.slane %v1761_v25, %v5108_v34  ;;  %v1771_v31 = vperm.slane %v1767_v39, %v5108_v34 }
 0x1f8   : > { %v1821_v52 = vsel %vm1158_vm1, %v1820_v40, %v1747_v38  ;;  %v1760_v56 = vperm.slane %v1756_v48, %v5108_v34  ;;  %v1804_v44 = vsel %vm1158_vm1, %v1744_v59, %v1725_v6  ;;  %v1810_v54 = vsel %vm1158_vm1, %v1809_v8, %v1743_v28 }
 0x1f9   : > { %v1784_v17 = vrot.slane %v1771_v31, 4  ;;  %v1808_v42 = vperm.slane %v1804_v44, %v5108_v34  ;;  %v1814_v55 = vperm.slane %v1810_v54, %v5108_v34  ;;  %v1819_v13 = vperm.slane %v1815_v50, %v5108_v34 }
 0x1fa   : > { %v1772_v23 = vrot.slane %v1760_v56, 4  ;;  %v1825_v21 = vperm.slane %v1821_v52, %v5108_v34  ;;  %v1774_v60 = vrot.slane %v1754_v19, 4  ;;  %v1786_v12 = vrot.slane %v1765_v47, 4 }
 0x1fb   : > { %v1826_v53 = vrot.slane %v1814_v55, 4  ;;  %v1828_v16 = vrot.slane %v1808_v42, 4  ;;  %v1840_v46 = vrot.slane %v1819_v13, 4  ;;  %v1785_v2 = vsel %vm1158_vm1, %v1784_v17, %v1765_v47 }
 0x1fc   : > { %v1773_v35 = vsel %vm1158_vm1, %v1772_v23, %v1754_v19  ;;  %v1775_v14 = vsel %vm1158_vm1, %v1760_v56, %v1774_v60  ;;  %v1838_v61 = vrot.slane %v1825_v21, 4  ;;  %v1787_v29 = vsel %vm1158_vm1, %v1771_v31, %v1786_v12  ;;  %v988_v56 = vld [vmem:[#allocation7] sm:$0xff] }
 0x1fd   : > { %v5492_v33 = vperm.slane %v1773_v35, %v5149_v7  ;;  %v1783_v63 = vperm.slane %v1775_v14, %v5149_v7  ;;  %v1827_v36 = vsel %vm1158_vm1, %v1826_v53, %v1808_v42  ;;  %v1795_v30 = vperm.slane %v1787_v29, %v5149_v7 }
 0x1fe   : > { %v1829_v58 = vsel %vm1158_vm1, %v1814_v55, %v1828_v16  ;;  %v1841_v62 = vsel %vm1158_vm1, %v1825_v21, %v1840_v46  ;;  %v1791_v9 = vperm.slane %v1785_v2, %v5149_v7  ;;  %v1833_v11 = vperm.slane %v1827_v36, %v5149_v7  ;;  %v989_v55 = vld [vmem:[#allocation7 + $0x8] sm:$0xff] }
 0x1ff   : > { %v1802_v37 = vrot.slane %v1783_v63, 4  ;;  %v1837_v0 = vperm.slane %v1829_v58, %v5149_v7  ;;  %v1849_v45 = vperm.slane %v1841_v62, %v5149_v7  ;;  %v1800_v6 = vrot.slane %v1795_v30, 4 }
 0x200   : > { %v1839_v10 = vsel %vm1158_vm1, %v1838_v61, %v1819_v13  ;;  %v1798_v3 = vrot.slane %v5492_v33, 4  ;;  %v1852_v26 = vrot.slane %v1833_v11, 4 }
 0x201   : > { %v1803_v59 = vsel %vm1158_vm1, %v1795_v30, %v1802_v37  ;;  %v1856_v1 = vrot.slane %v1837_v0, 4  ;;  %v1801_v15 = vsel %vm1158_vm1, %v1800_v6, %v1783_v63  ;;  %v1854_v20 = vrot.slane %v1849_v45, 4 }
 0x202   : > { %v1880_v49 = vpack.c.bf16 %v1803_v59, %v1803_v59  ;;  %v1878_v18 = vpack.c.bf16 %v1801_v15, %v1801_v15  ;;  %v1799_v57 = vsel %vm1158_vm1, %v1791_v9, %v1798_v3  ;;  %v1845_v22 = vperm.slane %v1839_v10, %v5149_v7 }
 0x203   : > { %v1857_v5 = vsel %vm1158_vm1, %v1849_v45, %v1856_v1  ;;  %v1855_v25 = vsel %vm1158_vm1, %v1854_v20, %v1837_v0  ;;  %v1876_v8 = vpack.c.bf16 %v1799_v57, %v1799_v57  ;;  %v1796_v63 = vrot.slane %v1791_v9, 4 }
 0x204   : > { %v5511_v24 = vunpack.c.l.b16 %v1880_v49  ;;  %v1881_v27 = vpack.c.bf16 %v1857_v5, %v1857_v5  ;;  %v1879_v28 = vpack.c.bf16 %v1855_v25, %v1855_v25  ;;  %v5514_v38 = vunpack.c.l.b16 %v1878_v18 }
 0x205   : > { %v1853_v40 = vsel %vm1158_vm1, %v1845_v22, %v1852_v26  ;;  %v5521_v19 = vunpack.c.l.b16 %v1876_v8  ;;  %v1850_v29 = vrot.slane %v1845_v22, 4  ;;  %v1797_v58 = vsel %vm1158_vm1, %v1796_v63, %v5492_v33 }
 0x206   : > { %v5516_v39 = vunpack.c.l.b16 %v1881_v27  ;;  %v5518_v50 = vunpack.c.l.b16 %v1879_v28  ;;  %v1877_v41 = vpack.c.bf16 %v1853_v40, %v1853_v40  ;;  %v1874_v0 = vpack.c.bf16 %v1797_v58, %v1797_v58 }
 0x207   : > { %v1851_v62 = vsel %vm1158_vm1, %v1850_v29, %v1833_v11 }
 0x208   : > { %v2118_v48 = vpack.c.b16 %v5516_v39, %v5511_v24  ;;  %v2117_v47 = vpack.c.b16 %v5518_v50, %v5514_v38  ;;  %v5527_v31 = vunpack.c.l.b16 %v1877_v41  ;;  %v1875_v45 = vpack.c.bf16 %v1851_v62, %v1851_v62 }
 0x209   : > { %v2107_v59 = vunpack.c.l.b16 %v1874_v0 }
 0x20a   : > { %v2116_v52 = vpack.c.b16 %v5527_v31, %v5521_v19  ;;  %v2108_v3 = vunpack.c.l.b16 %v1875_v45 }
 0x20c   : > { %v2115_v9 = vpack.c.b16 %v2108_v3, %v2107_v59 }
 0x25f   : > { %v1968_v44 = vpop.f32.mrf.mxu0 }
 0x260   : > { %v1969_v54 = vadd.f32 %v1968_v44, %v988_v56  ;;  %v1998_v42 = vpop.f32.mrf.mxu1 }
 0x261   : > { %v1999_v49 = vadd.f32 %v1998_v42, %v988_v56 }
 0x262   : > { %v2015_v17 = vsel %vm1892_vm2, %v1969_v54, -inf }
 0x263   : > { %2016 = vmax.xlane.f32.xlu0 %v2015_v17  ;;  %v2021_v15 = vsel %vm1892_vm2, %v1999_v49, -inf }
 0x267   : > { %v1970_v13 = vpop.f32.mrf.mxu0 }
 0x268   : > { %v1971_v23 = vadd.f32 %v1970_v13, %v989_v55  ;;  %v1908_v21 = vpop.f32.mrf.mxu3  ;;  %v2000_v16 = vpop.f32.mrf.mxu1 }
 0x269   : > { %v5532_v60 = vadd.f32 %v1908_v21, %v988_v56  ;;  %v2001_v46 = vadd.f32 %v2000_v16, %v989_v55 }
 0x26a   : > { %v2018_v12 = vsel %vm1892_vm2, %v1971_v23, -inf }
 0x26b   : > { %2019 = vmax.xlane.f32.xlu1 %v2018_v12  ;;  %v2003_v53 = vsel %vm1892_vm2, %v5532_v60, -inf  ;;  %v2024_v61 = vsel %vm1892_vm2, %v2001_v46, -inf }
 0x26c   : > { %2004 = vmax.xlane.f32.xlu0 %v2003_v53 }
 0x270   : > { %v1910_v35 = vpop.f32.mrf.mxu3 }
 0x271   : > { %v1911_v2 = vadd.f32 %v1910_v35, %v989_v55 }
 0x273   : > { %v2006_v14 = vsel %vm1892_vm2, %v1911_v2, -inf }
 0x274   : > { %2007 = vmax.xlane.f32.xlu1 %v2006_v14  ;;  %2025 = vmax.xlane.f32.xlu0 %v2024_v61 }
 0x278   : > { %v1938_v36 = vpop.f32.mrf.mxu3 }
 0x279   : > { %v1939_v30 = vadd.f32 %v1938_v36, %v988_v56 }
 0x27b   : > { %v2009_v37 = vsel %vm1892_vm2, %v1939_v30, -inf }
 0x27c   : > { %2010 = vmax.xlane.f32.xlu2 %v2009_v37 }
 0x280   : > { %v1940_v6 = vpop.f32.mrf.mxu3 }
 0x281   : > { %v1941_v10 = vadd.f32 %v1940_v6, %v989_v55 }
 0x283   : > { %v2012_v1 = vsel %vm1892_vm2, %v1941_v10, -inf }
 0x284   : > { %2013 = vmax.xlane.f32.xlu2 %v2012_v1 }
 0x288   : > { %2119 = vrot.lane.b32.xlu0 %v2115_v9, %s4701_s4 }
 0x28c   : > { %2022 = vmax.xlane.f32.xlu2 %v2021_v15 }
 0x2d6   : > { %v2017_v33 = vpop.xlane.xlu0 %2016 }
 0x2d7   : > { %v2031_v11 = vsub.f32 %v1969_v54, %v2017_v33 }
 0x2d9   : > { %v2043_v20 = vmul.f32 1.442695, %v2031_v11 }
 0x2db   : > { %4112 = vpow2.f32 %v2043_v20 }
 0x2de   : > { %v2020_v18 = vpop.xlane.xlu1 %2019 }
 0x2df   : > { %v2032_v57 = vsub.f32 %v1971_v23, %v2020_v18  ;;  %v2005_v22 = vpop.xlane.xlu0 %2004 }
 0x2e0   : > { %v2027_v63 = vsub.f32 %v5532_v60, %v2005_v22 }
 0x2e1   : > { %v4113_v5 = vpop.eup %4112  ;;  %v2045_v25 = vmul.f32 1.442695, %v2032_v57 }
 0x2e2   : > { %v2063_v27 = vsel %vm1892_vm2, %v4113_v5, 0.0  ;;  %v2035_v36 = vmul.f32 1.442695, %v2027_v63 }
 0x2e3   : > { %4114 = vpow2.f32 %v2045_v25  ;;  %2064 = vadd.xlane.f32.xlu2 %v2063_v27 }
 0x2e7   : > { %v2026_v28 = vpop.xlane.xlu0 %2025  ;;  %v2008_v8 = vpop.xlane.xlu1 %2007 }
 0x2e8   : > { %v2034_v40 = vsub.f32 %v2001_v46, %v2026_v28  ;;  %v2028_v44 = vsub.f32 %v1911_v2, %v2008_v8 }
 0x2e9   : > { %v4115_v26 = vpop.eup %4114 }
 0x2ea   : > { %v2066_v41 = vsel %vm1892_vm2, %v4115_v26, 0.0  ;;  %v2049_v56 = vmul.f32 1.442695, %v2034_v40  ;;  %v2037_v54 = vmul.f32 1.442695, %v2028_v44 }
 0x2eb   : > { %2067 = vadd.xlane.f32.xlu0 %v2066_v41 }
 0x2ec   : > { %4116 = vpow2.f32 %v2049_v56 }
 0x2ed   : > { %4118 = vpow2.f32 %v2037_v54 }
 0x2ef   : > { %v2011_v17 = vpop.xlane.xlu2 %2010 }
 0x2f0   : > { %v2029_v42 = vsub.f32 %v1939_v30, %v2011_v17 }
 0x2f2   : > { %v2039_v55 = vmul.f32 1.442695, %v2029_v42  ;;  %v4117_v13 = vpop.eup %4116 }
 0x2f3   : > { %v2072_v23 = vsel %vm1892_vm2, %v4117_v13, 0.0  ;;  %v4119_v12 = vpop.eup %4118 }
 0x2f4   : > { %4120 = vpow2.f32 %v2039_v55  ;;  %2073 = vadd.xlane.f32.xlu2 %v2072_v23  ;;  %v2054_v2 = vsel %vm1892_vm2, %v4119_v12, 0.0 }
 0x2f7   : > { %v2014_v21 = vpop.xlane.xlu2 %2013 }
 0x2f8   : > { %v2030_v37 = vsub.f32 %v1941_v10, %v2014_v21 }
 0x2fa   : > { %v4121_v53 = vpop.eup %4120  ;;  %v2120_v16 = vpop.permute.xlu0 %2119 }
 0x2fb   : > { %v2057_v46 = vsel %vm1892_vm2, %v4121_v53, 0.0  ;;  %v2128_v35 = vsel %vm1892_vm2, %v5416_v32, %v2120_v16  ;;  %v2041_v32 = vmul.f32 1.442695, %v2030_v37 }
 0x2fc   : > { %2058 = vadd.xlane.f32.xlu0 %v2057_v46  ;;  %2162 = vmatpush.bf16.msrb.mxu2 %v2128_v35 }
 0x2fd   : > { %2055 = vadd.xlane.f32.xlu2 %v2054_v2 }
 0x2ff   : > { %v2023_v14 = vpop.xlane.xlu2 %2022 }
 0x300   : > { %v2033_v61 = vsub.f32 %v1999_v49, %v2023_v14 }
 0x302   : > { %v2047_v29 = vmul.f32 1.442695, %v2033_v61 }
 0x304   : > { %4122 = vpow2.f32 %v2047_v29 }
 0x305   : > { %4124 = vpow2.f32 %v2035_v36 }
 0x306   : > { %4126 = vpow2.f32 %v2041_v32 }
 0x30a   : > { %v4123_v30 = vpop.eup %4122 }
 0x30b   : > { %v2069_v58 = vsel %vm1892_vm2, %v4123_v30, 0.0  ;;  %v5555_v62 = vpop.eup %4124 }
 0x30c   : > { %2070 = vadd.xlane.f32.xlu1 %v2069_v58  ;;  %v2051_v60 = vsel %vm1892_vm2, %v5555_v62, 0.0  ;;  %v5567_v0 = vpop.eup %4126 }
 0x30d   : > { %v2060_v45 = vsel %vm1892_vm2, %v5567_v0, 0.0 }
 0x310   : > { %2125 = vrot.lane.b32.xlu0 %v2118_v48, %s4701_s4 }
 0x314   : > { %2052 = vadd.xlane.f32.xlu1 %v2051_v60 }
 0x315   : > { %2123 = vrot.lane.b32.xlu2 %v2117_v47, %s4701_s4 }
 0x31c   : > { %2061 = vadd.xlane.f32.xlu1 %v2060_v45 }
 0x335   : > { %2121 = vrot.lane.b32.xlu1 %v2116_v52, %s4701_s4 }
 0x356   : > { %v2065_v24 = vpop.xlane.xlu2 %2064 }
 0x357   : > { %4128 = vrcp.f32 %v2065_v24 }
 0x35d   : > { %v4129_v39 = vpop.eup %4128 }
 0x35e   : > { %v2087_v48 = vmul.f32 %v4129_v39, %v4113_v5  ;;  %v2068_v6 = vpop.xlane.xlu0 %2067 }
 0x35f   : > { %4130 = vrcp.f32 %v2068_v6 }
 0x360   : > { %2095 = vst.msk [vmem:[%s5576_s2 + $0x20] sm:$0xff] %vm1892_vm2, %v2087_v48  ;;  %v2143_v3 = vpack.c.bf16 %v2087_v48, %v2087_v48 }
 0x362   : > { %v2193_v20 = vunpack.c.l.b16 %v2143_v3 }
 0x365   : > { %v4131_v38 = vpop.eup %4130 }
 0x366   : > { %v2088_v50 = vmul.f32 %v4131_v38, %v4115_v26 }
 0x367   : > { %v2074_v19 = vpop.xlane.xlu2 %2073 }
 0x368   : > { %2096 = vst.msk [vmem:[%s5576_s2 + $0x28] sm:$0xff] %vm1892_vm2, %v2088_v50  ;;  %4132 = vrcp.f32 %v2074_v19  ;;  %v2144_v59 = vpack.c.bf16 %v2088_v50, %v2088_v50 }
 0x36a   : > { %v2194_v49 = vunpack.c.l.b16 %v2144_v59 }
 0x36c   : > { %v2195_v57 = vpack.c.b16 %v2194_v49, %v2193_v20 }
 0x36e   : > { %v4133_v47 = vpop.eup %4132 }
 0x36f   : > { %v2059_v31 = vpop.xlane.xlu0 %2058  ;;  %v2090_v52 = vmul.f32 %v4133_v47, %v4117_v13 }
 0x370   : > { %v2056_v10 = vpop.xlane.xlu2 %2055  ;;  %4134 = vrcp.f32 %v2059_v31 }
 0x371   : > { %4136 = vrcp.f32 %v2056_v10  ;;  %2098 = vst.msk [vmem:[%s5576_s2 + $0x38] sm:$0xff] %vm1892_vm2, %v2090_v52  ;;  %v2146_v28 = vpack.c.bf16 %v2090_v52, %v2090_v52 }
 0x373   : > { %v2216_v40 = vunpack.c.l.b16 %v2146_v28 }
 0x376   : > { %v4135_v1 = vpop.eup %4134 }
 0x377   : > { %v4137_v9 = vpop.eup %4136  ;;  %v2085_v15 = vmul.f32 %v4135_v1, %v4121_v53 }
 0x378   : > { %v2084_v33 = vmul.f32 %v4137_v9, %v4119_v12  ;;  %v2124_v11 = vpop.permute.xlu2 %2123 }
 0x379   : > { %2093 = vst.msk [vmem:[%s5576_s2 + $0x10] sm:$0xff] %vm1892_vm2, %v2085_v15  ;;  %v2134_v18 = vsel %vm1892_vm2, %v5410_v51, %v2124_v11  ;;  %v2141_v16 = vpack.c.bf16 %v2085_v15, %v2085_v15 }
 0x37a   : > { %2092 = vst.msk [vmem:[%s5576_s2 + $0x8] sm:$0xff] %vm1892_vm2, %v2084_v33  ;;  %2206 = vmatpush.bf16.msra.mxu0 %v2134_v18  ;;  %v2140_v54 = vpack.c.bf16 %v2084_v33, %v2084_v33 }
 0x37b   : > { %v2171_v2 = vunpack.c.l.b16 %v2141_v16 }
 0x37c   : > { %v2150_v13 = vunpack.c.l.b16 %v2140_v54 }
 0x37d   : > { %3654 = vmatmul.msk.bf16.vlgmr.msra.gmra.mxu0 %vm1892_vm2, %v2195_v57 }
 0x37f   : > { %v2071_v22 = vpop.xlane.xlu1 %2070 }
 0x380   : > { %4138 = vrcp.f32 %v2071_v22 }
 0x382   : > { %v2126_v5 = vpop.permute.xlu0 %2125 }
 0x383   : > { %v2137_v25 = vsel %vm1892_vm2, %v5414_v43, %v2126_v5 }
 0x384   : > { %2228 = vmatpush.bf16.msra.mxu1 %v2137_v25 }
 0x386   : > { %v4139_v27 = vpop.eup %4138 }
 0x387   : > { %v2089_v26 = vmul.f32 %v4139_v27, %v4123_v30  ;;  %v2053_v8 = vpop.xlane.xlu1 %2052 }
 0x388   : > { %4140 = vrcp.f32 %v2053_v8 }
 0x389   : > { %2097 = vst.msk [vmem:[%s5576_s2 + $0x30] sm:$0xff] %vm1892_vm2, %v2089_v26  ;;  %v2145_v51 = vpack.c.bf16 %v2089_v26, %v2089_v26 }
 0x38b   : > { %v2215_v41 = vunpack.c.l.b16 %v2145_v51 }
 0x38d   : > { %v2217_v56 = vpack.c.b16 %v2216_v40, %v2215_v41 }
 0x38e   : > { %v4141_v44 = vpop.eup %4140 }
 0x38f   : > { %v2083_v17 = vmul.f32 %v4141_v44, %v5555_v62  ;;  %v2062_v42 = vpop.xlane.xlu1 %2061  ;;  %3655 = vmatmul.msk.bf16.vlgmr.msra.gmra.mxu1 %vm1892_vm2, %v2217_v56 }
 0x390   : > { %4142 = vrcp.f32 %v2062_v42 }
 0x391   : > { %2091 = vst.msk [vmem:[%s5576_s2] sm:$0xff] %vm1892_vm2, %v2083_v17  ;;  %v2139_v43 = vpack.c.bf16 %v2083_v17, %v2083_v17 }
 0x393   : > { %v2149_v55 = vunpack.c.l.b16 %v2139_v43 }
 0x395   : > { %v2151_v23 = vpack.c.b16 %v2150_v13, %v2149_v55 }
 0x396   : > { %v4143_v21 = vpop.eup %4142 }
 0x397   : > { %v2086_v12 = vmul.f32 %v4143_v21, %v5567_v0  ;;  %3652 = vmatmul.msk.bf16.vlgmr.msrb.gmra.mxu2 %vm1892_vm2, %v2151_v23 }
 0x399   : > { %2094 = vst.msk [vmem:[%s5576_s2 + $0x18] sm:$0xff] %vm1892_vm2, %v2086_v12  ;;  %v2142_v53 = vpack.c.bf16 %v2086_v12, %v2086_v12 }
 0x39b   : > { %v2172_v46 = vunpack.c.l.b16 %v2142_v53 }
 0x39d   : > { %v2173_v61 = vpack.c.b16 %v2172_v46, %v2171_v2 }
 0x3a7   : > { %v2122_v35 = vpop.permute.xlu1 %2121 }
 0x3a8   : > { %v2131_v14 = vsel %vm1892_vm2, %v5424_v4, %v2122_v35 }
 0x3a9   : > { %2184 = vmatpush.bf16.msra.mxu3 %v2131_v14 }
 0x3ac   : > { %3653 = vmatmul.msk.bf16.vlgmr.msra.gmra.mxu3 %vm1892_vm2, %v2173_v61 }
 0x3fa   : > { %v2208_v29 = vpop.f32.mrf.mxu0 }
 0x3fb   : > { %v2235_v30 = vrot.slane %v2208_v29, 4 }
 0x402   : > { %v2210_v32 = vpop.f32.mrf.mxu0 }
 0x403   : > { %v2291_v45 = vrot.slane %v2210_v32, 4 }
 0x40c   : > { %v2230_v37 = vpop.f32.mrf.mxu1 }
 0x40d   : > { %v2247_v4 = vrot.slane %v2230_v37, 4 }
 0x414   : > { %v2232_v3 = vpop.f32.mrf.mxu1 }
 0x415   : > { %v2303_v57 = vrot.slane %v2232_v3, 4 }
 0x41a   : > { %v2164_v63 = vpop.f32.mrf.mxu2 }
 0x41b   : > { %v2237_v36 = vrot.slane %v2164_v63, 4  ;;  %v2236_v62 = vsel %vm1158_vm1, %v2235_v30, %v2164_v63 }
 0x41c   : > { %v2242_v24 = vperm.slane %v2236_v62, %v5108_v34 }
 0x41d   : > { %v2238_v60 = vsel %vm1158_vm1, %v2208_v29, %v2237_v36 }
 0x41e   : > { %v2246_v39 = vperm.slane %v2238_v60, %v5108_v34  ;;  %v2261_v47 = vrot.slane %v2242_v24, 4 }
 0x420   : > { %v2273_v52 = vrot.slane %v2246_v39, 4 }
 0x422   : > { %v2166_v58 = vpop.f32.mrf.mxu2 }
 0x423   : > { %v2293_v0 = vrot.slane %v2166_v58, 4  ;;  %v2292_v48 = vsel %vm1158_vm1, %v2291_v45, %v2166_v58 }
 0x424   : > { %v2298_v10 = vperm.slane %v2292_v48, %v5108_v34 }
 0x425   : > { %v2294_v38 = vsel %vm1158_vm1, %v2210_v32, %v2293_v0 }
 0x426   : > { %v2302_v1 = vperm.slane %v2294_v38, %v5108_v34  ;;  %v2317_v27 = vrot.slane %v2298_v10, 4 }
 0x428   : > { %v2329_v28 = vrot.slane %v2302_v1, 4 }
 0x42f   : > { %v2186_v6 = vpop.f32.mrf.mxu3 }
 0x430   : > { %v2248_v50 = vsel %vm1158_vm1, %v2247_v4, %v2186_v6  ;;  %v2249_v19 = vrot.slane %v2186_v6, 4 }
 0x431   : > { %v2254_v31 = vperm.slane %v2248_v50, %v5108_v34 }
 0x432   : > { %v2250_v59 = vsel %vm1158_vm1, %v2230_v37, %v2249_v19 }
 0x433   : > { %v2258_v9 = vperm.slane %v2250_v59, %v5108_v34  ;;  %v2259_v49 = vrot.slane %v2254_v31, 4  ;;  %v2262_v15 = vsel %vm1158_vm1, %v2254_v31, %v2261_v47 }
 0x434   : > { %v2270_v33 = vperm.slane %v2262_v15, %v5149_v7 }
 0x435   : > { %v2260_v11 = vsel %vm1158_vm1, %v2259_v49, %v2242_v24  ;;  %v2271_v20 = vrot.slane %v2258_v9, 4  ;;  %v2274_v18 = vsel %vm1158_vm1, %v2258_v9, %v2273_v52 }
 0x436   : > { %v5623_v22 = vperm.slane %v2260_v11, %v5149_v7  ;;  %v2282_v5 = vperm.slane %v2274_v18, %v5149_v7  ;;  %v2285_v25 = vrot.slane %v2270_v33, 4 }
 0x437   : > { %v2188_v26 = vpop.f32.mrf.mxu3  ;;  %v2272_v8 = vsel %vm1158_vm1, %v2271_v20, %v2246_v39 }
 0x438   : > { %v2304_v51 = vsel %vm1158_vm1, %v2303_v57, %v2188_v26  ;;  %v2305_v40 = vrot.slane %v2188_v26, 4  ;;  %v2283_v41 = vrot.slane %v5623_v22, 4  ;;  %v2286_v56 = vsel %vm1158_vm1, 0.0, %v2285_v25 }
 0x439   : > { %v2310_v44 = vperm.slane %v2304_v51, %v5108_v34  ;;  %v2347_v54 = vsel %vm1158_vm1, %v2285_v25, %v5623_v22  ;;  %v2352_v17 = vrot.slane %v2286_v56, 4  ;;  %v2278_v42 = vperm.slane %v2272_v8, %v5149_v7 }
 0x43a   : > { %v2306_v43 = vsel %vm1158_vm1, %v2232_v3, %v2305_v40  ;;  %v2284_v55 = vsel %vm1158_vm1, 0.0, %v2283_v41  ;;  %v5637_v13 = vperm.slane %v2347_v54, %v5108_v34  ;;  %v2289_v23 = vrot.slane %v2282_v5, 4 }
 0x43b   : > { %v2314_v21 = vperm.slane %v2306_v43, %v5108_v34  ;;  %v2315_v12 = vrot.slane %v2310_v44, 4  ;;  %v2318_v53 = vsel %vm1158_vm1, %v2310_v44, %v2317_v27  ;;  %v4032_v16 = vpack.i.bf16 %v2270_v33, %v2284_v55 }
 0x43c   : > { %v2326_v46 = vperm.slane %v2318_v53, %v5149_v7  ;;  %v2353_v35 = vsel %vm1158_vm1, %v2352_v17, %v2284_v55  ;;  %v2358_v37 = vsel %vm1158_vm1, %v2289_v23, %v2278_v42  ;;  %v2371_v58 = vrot.slane %v5637_v13, 4 }
 0x43d   : > { %v2316_v2 = vsel %vm1158_vm1, %v2315_v12, %v2298_v10  ;;  %v2327_v14 = vrot.slane %v2314_v21, 4  ;;  %4033 = vrot.lane.b32.xlu2 %v4032_v16, %s4697_s17  ;;  %v2330_v61 = vsel %vm1158_vm1, %v2314_v21, %v2329_v28  ;;  %v2357_v63 = vperm.slane %v2353_v35, %v5108_v34 }
 0x43e   : > { %v5648_v29 = vperm.slane %v2316_v2, %v5149_v7  ;;  %v2338_v36 = vperm.slane %v2330_v61, %v5149_v7  ;;  %v2341_v30 = vrot.slane %v2326_v46, 4  ;;  %v2290_v62 = vsel %vm1158_vm1, 0.0, %v2289_v23 }
 0x43f   : > { %v2328_v32 = vsel %vm1158_vm1, %v2327_v14, %v2302_v1  ;;  %v2362_v60 = vperm.slane %v2358_v37, %v5108_v34  ;;  %v2369_v50 = vrot.slane %v2357_v63, 4  ;;  %v2363_v59 = vrot.slane %v2290_v62, 4 }
 0x440   : > { %v4037_v0 = vpack.i.bf16 %v2338_v36, %v2282_v5  ;;  %v2342_v45 = vsel %vm1158_vm1, 0.0, %v2341_v30  ;;  %v2401_v24 = vsel %vm1158_vm1, %v2341_v30, %v5648_v29  ;;  %v2334_v4 = vperm.slane %v2328_v32, %v5149_v7 }
 0x441   : > { %v4042_v39 = vpack.i.bf16 %v2342_v45, %v2286_v56  ;;  %v2405_v48 = vperm.slane %v2401_v24, %v5108_v34  ;;  %v2406_v6 = vrot.slane %v2342_v45, 4  ;;  %v2345_v38 = vrot.slane %v2338_v36, 4 }
 0x442   : > { %4038 = vrot.lane.b32.xlu0 %v4037_v0, %s4697_s17  ;;  %v4047_v19 = vpack.i.bf16 %v2334_v4, %v2278_v42  ;;  %v2339_v47 = vrot.slane %v5648_v29, 4  ;;  %v2343_v31 = vrot.slane %v2334_v4, 4  ;;  %v2287_v3 = vrot.slane %v2278_v42, 4 }
 0x443   : > { %4043 = vrot.lane.b32.xlu1 %v4042_v39, %s4697_s17  ;;  %v2346_v52 = vsel %vm1158_vm1, 0.0, %v2345_v38  ;;  %v2412_v10 = vsel %vm1158_vm1, %v2345_v38, %v2334_v4  ;;  %v2425_v1 = vrot.slane %v2405_v48, 4  ;;  %v2383_v33 = vrot.slane %v2362_v60, 4 }
 0x444   : > { %v2416_v9 = vperm.slane %v2412_v10, %v5108_v34  ;;  %v2417_v49 = vrot.slane %v2346_v52, 4  ;;  %v2340_v15 = vsel %vm1158_vm1, 0.0, %v2339_v47  ;;  %v2344_v20 = vsel %vm1158_vm1, 0.0, %v2343_v31 }
 0x445   : > { %4048 = vrot.lane.b32.xlu2 %v4047_v19, %s4697_s17  ;;  %v2407_v11 = vsel %vm1158_vm1, %v2406_v6, %v2340_v15  ;;  %v2288_v18 = vsel %vm1158_vm1, 0.0, %v2287_v3  ;;  %v4062_v5 = vpack.i.bf16 %v2346_v52, %v2326_v46  ;;  %v4052_v28 = vpack.i.bf16 %v2340_v15, %v2290_v62 }
 0x446   : > { %v2437_v57 = vrot.slane %v2416_v9, 4  ;;  %v2411_v25 = vperm.slane %v2407_v11, %v5108_v34  ;;  %v2418_v27 = vsel %vm1158_vm1, %v2417_v49, %v2344_v20  ;;  %v2364_v8 = vsel %vm1158_vm1, %v2363_v59, %v2288_v18 }
 0x447   : > { %v2422_v26 = vperm.slane %v2418_v27, %v5108_v34  ;;  %v2372_v51 = vsel %vm1158_vm1, %v2357_v63, %v2371_v58  ;;  %v2368_v41 = vperm.slane %v2364_v8, %v5108_v34  ;;  %v2370_v43 = vsel %vm1158_vm1, %v2369_v50, %v5637_v13 }
 0x448   : > { %v2423_v40 = vrot.slane %v2411_v25, 4  ;;  %v2380_v56 = vperm.slane %v2372_v51, %v5149_v7  ;;  %v2426_v44 = vsel %vm1158_vm1, %v2411_v25, %v2425_v1  ;;  %v2376_v12 = vperm.slane %v2370_v43, %v5149_v7 }
 0x449   : > { %v2435_v54 = vrot.slane %v2422_v26, 4  ;;  %v2434_v17 = vperm.slane %v2426_v44, %v5149_v7  ;;  %v2438_v42 = vsel %vm1158_vm1, %v2422_v26, %v2437_v57  ;;  %v2381_v55 = vrot.slane %v2368_v41, 4 }
 0x44a   : > { %4063 = vrot.lane.b32.xlu0 %v4062_v5, %s4697_s17  ;;  %v2384_v23 = vsel %vm1158_vm1, %v2368_v41, %v2383_v33  ;;  %v2446_v21 = vperm.slane %v2438_v42, %v5149_v7  ;;  %v2424_v16 = vsel %vm1158_vm1, %v2423_v40, %v2405_v48  ;;  %v2399_v35 = vrot.slane %v2380_v56, 4 }
 0x44b   : > { %4053 = vrot.lane.b32.xlu1 %v4052_v28, %s4697_s17  ;;  %v2392_v53 = vperm.slane %v2384_v23, %v5149_v7  ;;  %v2436_v46 = vsel %vm1158_vm1, %v2435_v54, %v2416_v9  ;;  %v2382_v13 = vsel %vm1158_vm1, %v2381_v55, %v2362_v60  ;;  %v2395_v14 = vrot.slane %v2376_v12, 4 }
 0x44c   : > { %v2451_v2 = vrot.slane %v2446_v21, 4  ;;  %v2430_v61 = vperm.slane %v2424_v16, %v5149_v7  ;;  %v2388_v36 = vperm.slane %v2382_v13, %v5149_v7  ;;  %v2442_v30 = vperm.slane %v2436_v46, %v5149_v7 }
 0x44d   : > { %v2397_v63 = vrot.slane %v2392_v53, 4  ;;  %v5697_v37 = vsel %vm1158_vm1, %v2392_v53, %v2399_v35  ;;  %v4067_v58 = vpack.i.bf16 %v2344_v20, %v5648_v29  ;;  %v2453_v0 = vrot.slane %v2434_v17, 4 }
 0x44e   : > { %v5701_v32 = vsel %vm1158_vm1, %v2451_v2, %v2434_v17  ;;  %v2449_v62 = vrot.slane %v2430_v61, 4  ;;  %v2393_v45 = vrot.slane %v2388_v36, 4  ;;  %v5707_v24 = vsel %vm1158_vm1, %v2388_v36, %v2395_v14 }
 0x44f   : > { %v5704_v60 = vsel %vm1158_vm1, %v2397_v63, %v2380_v56  ;;  %v2447_v4 = vrot.slane %v2442_v30, 4  ;;  %v4057_v39 = vpack.i.bf16 %v2288_v18, %v5623_v22  ;;  %v5716_v6 = vsel %vm1158_vm1, %v2446_v21, %v2453_v0 }
 0x450   : > { %v4092_v48 = vpack.i.bf16 %v5701_v32, %v5704_v60  ;;  %v5713_v29 = vsel %vm1158_vm1, %v2442_v30, %v2449_v62  ;;  %v4097_v50 = vpack.i.bf16 %v5716_v6, %v5697_v37  ;;  %v5723_v19 = vsel %vm1158_vm1, %v2393_v45, %v2376_v12  ;;  %v3787_v32 = vld [vmem:[#allocation14] sm:$0xff]  ;;  %v3784_v60 = vld [vmem:[#allocation13 + $0x8] sm:$0xff] }
 0x451   : > { %v4087_v38 = vpack.i.bf16 %v5713_v29, %v5707_v24  ;;  %v5726_v22 = vsel %vm1158_vm1, %v2447_v4, %v2430_v61  ;;  %v3783_v24 = vld [vmem:[#allocation13] sm:$0xff] }
 0x452   : > { %4068 = vrot.lane.b32.xlu0 %v4067_v58, %s4697_s17 }
 0x453   : > { %4058 = vrot.lane.b32.xlu1 %v4057_v39, %s4697_s17  ;;  %s3807_s17 = sshll.u32 %s4856_s7, 4 }
 0x497   : > { %v4034_v47 = vpop.permute.xlu2 %4033 }
 0x498   : > { %v4035_v25 = vunpack.i.l.bf16 %v4034_v47  ;;  %v4036_v56 = vunpack.i.h.bf16 %v4034_v47 }
 0x49a   : > { %v2551_v46 = vrot.slane %v4036_v56, 4 }
 0x49f   : > { %v4049_v9 = vpop.permute.xlu2 %4048 }
 0x4a0   : > { %v4051_v18 = vunpack.i.h.bf16 %v4049_v9  ;;  %v4050_v27 = vunpack.i.l.bf16 %v4049_v9 }
 0x4b4   : > { %v4039_v31 = vpop.permute.xlu0 %4038 }
 0x4b5   : > { %v4044_v52 = vpop.permute.xlu1 %4043  ;;  %v4041_v10 = vunpack.i.h.bf16 %v4039_v31  ;;  %v4040_v59 = vunpack.i.l.bf16 %v4039_v31 }
 0x4b6   : > { %v4045_v3 = vunpack.i.l.bf16 %v4044_v52  ;;  %v4046_v1 = vunpack.i.h.bf16 %v4044_v52 }
 0x4b7   : > { %v2619_v49 = vrot.slane %v4041_v10, 4  ;;  %v2563_v33 = vrot.slane %v4040_v59, 4 }
 0x4b8   : > { %v2557_v11 = vrot.slane %v4045_v3, 4  ;;  %v2613_v57 = vrot.slane %v4046_v1, 4 }
 0x4b9   : > { %v2620_v28 = vsel %vm1158_vm1, %v2619_v49, %v4051_v18  ;;  %v2564_v8 = vsel %vm1158_vm1, %v2563_v33, %v4050_v27 }
 0x4ba   : > { %v2558_v51 = vsel %vm1158_vm1, %v2557_v11, %v4035_v25  ;;  %v2624_v54 = vperm.slane %v2620_v28, %v5108_v34  ;;  %v2568_v42 = vperm.slane %v2564_v8, %v5108_v34 }
 0x4bb   : > { %v2562_v43 = vperm.slane %v2558_v51, %v5108_v34 }
 0x4bc   : > { %v4064_v15 = vpop.permute.xlu0 %4063  ;;  %v2645_v14 = vrot.slane %v2624_v54, 4  ;;  %v2589_v45 = vrot.slane %v2568_v42, 4 }
 0x4bd   : > { %v4054_v20 = vpop.permute.xlu1 %4053  ;;  %v4066_v40 = vunpack.i.h.bf16 %v4064_v15  ;;  %v4065_v41 = vunpack.i.l.bf16 %v4064_v15  ;;  %v2575_v4 = vrot.slane %v2562_v43, 4 }
 0x4be   : > { %v4056_v5 = vunpack.i.h.bf16 %v4054_v20  ;;  %v4055_v44 = vunpack.i.l.bf16 %v4054_v20 }
 0x4bf   : > { %v2625_v23 = vrot.slane %v4066_v40, 4  ;;  %v2607_v21 = vrot.slane %v4065_v41, 4 }
 0x4c0   : > { %v2614_v26 = vsel %vm1158_vm1, %v2613_v57, %v4056_v5  ;;  %v2569_v35 = vrot.slane %v4055_v44, 4 }
 0x4c1   : > { %v2618_v17 = vperm.slane %v2614_v26, %v5108_v34 }
 0x4c3   : > { %v2631_v61 = vrot.slane %v2618_v17, 4 }
 0x4c4   : > { %v4069_v55 = vpop.permute.xlu0 %4068 }
 0x4c5   : > { %v4071_v12 = vunpack.i.h.bf16 %v4069_v55  ;;  %v4070_v53 = vunpack.i.l.bf16 %v4069_v55  ;;  %v4059_v16 = vpop.permute.xlu1 %4058 }
 0x4c6   : > { %v4061_v2 = vunpack.i.h.bf16 %v4059_v16  ;;  %v4060_v13 = vunpack.i.l.bf16 %v4059_v16 }
 0x4c7   : > { %v2626_v63 = vsel %vm1158_vm1, %v2625_v23, %v4071_v12  ;;  %v2608_v36 = vsel %vm1158_vm1, %v2607_v21, %v4070_v53 }
 0x4c8   : > { %v2630_v30 = vperm.slane %v2626_v63, %v5108_v34  ;;  %v2612_v58 = vperm.slane %v2608_v36, %v5108_v34  ;;  %v2552_v62 = vsel %vm1158_vm1, %v2551_v46, %v4060_v13  ;;  %v2570_v0 = vsel %vm1158_vm1, %v2569_v35, %v4061_v2  ;;  %v3790_v2 = vld [vmem:[#allocation14 + $0x18] sm:$0xff]  ;;  %v3789_v13 = vld [vmem:[#allocation14 + $0x10] sm:$0xff] }
 0x4c9   : > { %v2556_v39 = vperm.slane %v2552_v62, %v5108_v34  ;;  %v2574_v47 = vperm.slane %v2570_v0, %v5108_v34  ;;  %2791 = vmatpush.bf16.msrb.mxu3 %v3790_v2  ;;  %v3785_v63 = vld [vmem:[#allocation13 + $0x10] sm:$0xff] }
 0x4ca   : > { %v2643_v31 = vrot.slane %v2630_v30, 4  ;;  %v2646_v52 = vsel %vm1158_vm1, %v2630_v30, %v2645_v14  ;;  %v2632_v10 = vsel %vm1158_vm1, %v2631_v61, %v2612_v58  ;;  %v2633_v59 = vrot.slane %v2612_v58, 4  ;;  %v3786_v14 = vld [vmem:[#allocation13 + $0x18] sm:$0xff]  ;;  %v3788_v61 = vld [vmem:[#allocation14 + $0x8] sm:$0xff] }
 0x4cb   : > { %v2576_v3 = vsel %vm1158_vm1, %v2575_v4, %v2556_v39  ;;  %v2577_v1 = vrot.slane %v2556_v39, 4  ;;  %v2587_v9 = vrot.slane %v2574_v47, 4  ;;  %v2590_v49 = vsel %vm1158_vm1, %v2574_v47, %v2589_v45  ;;  %2737 = vmatpush.bf16.msra.mxu2 %v3786_v14 }
 0x4cc   : > { %v2598_v15 = vperm.slane %v2590_v49, %v5149_v7  ;;  %v2634_v33 = vsel %vm1158_vm1, %v2618_v17, %v2633_v59  ;;  %v2654_v11 = vperm.slane %v2646_v52, %v5149_v7  ;;  %v2582_v34 = vperm.slane %v2576_v3, %v5149_v7 }
 0x4cd   : > { %v2578_v20 = vsel %vm1158_vm1, %v2562_v43, %v2577_v1  ;;  %v2642_v18 = vperm.slane %v2634_v33, %v5149_v7  ;;  %v2588_v57 = vsel %vm1158_vm1, %v2587_v9, %v2568_v42  ;;  %v2638_v5 = vperm.slane %v2632_v10, %v5149_v7  ;;  %2792 = vmatpush.bf16.msrb.mxu3 %v3789_v13 }
 0x4ce   : > { %v2586_v25 = vperm.slane %v2578_v20, %v5149_v7  ;;  %v2603_v27 = vrot.slane %v2598_v15, 4  ;;  %v2659_v28 = vrot.slane %v2654_v11, 4  ;;  %v2594_v26 = vperm.slane %v2588_v57, %v5149_v7 }
 0x4cf   : > { %v2601_v8 = vrot.slane %v2582_v34, 4  ;;  %v2644_v51 = vsel %vm1158_vm1, %v2643_v31, %v2624_v54  ;;  %v2657_v40 = vrot.slane %v2638_v5, 4  ;;  %v2661_v41 = vrot.slane %v2642_v18, 4  ;;  %2738 = vmatpush.bf16.msra.mxu2 %v3785_v63 }
 0x4d0   : > { %v2604_v56 = vsel %vm1158_vm1, %v2603_v27, %v2586_v25  ;;  %v2660_v44 = vsel %vm1158_vm1, %v2659_v28, %v2642_v18  ;;  %v2650_v17 = vperm.slane %v2644_v51, %v5149_v7  ;;  %v2599_v42 = vrot.slane %v2594_v26, 4  ;;  %v4162_v28 = vld [vmem:[%s5057_s1] sm:$0xff] }
 0x4d1   : > { %v4077_v43 = vpack.i.bf16 %v2660_v44, %v2604_v56  ;;  %v2602_v55 = vsel %vm1158_vm1, %v2594_v26, %v2601_v8  ;;  %v2605_v23 = vrot.slane %v2586_v25, 4  ;;  %v2662_v21 = vsel %vm1158_vm1, %v2654_v11, %v2661_v41  ;;  %2793 = vmatpush.bf16.msrb.mxu3 %v3788_v61  ;;  %v4103_v51 = vld [vmem:[%s6102_s21] ss:$0 sm:$0xff]  ;;  %s6108_s21 = sld [smem:[#allocation58_spill]] }
 0x4d2   : > { %v2655_v12 = vrot.slane %v2650_v17, 4  ;;  %v2658_v53 = vsel %vm1158_vm1, %v2650_v17, %v2657_v40  ;;  %v2600_v54 = vsel %vm1158_vm1, %v2599_v42, %v2582_v34  ;;  %v4163_v17 = vld [vmem:[%s5057_s1 + $0x8] sm:$0xff]  ;;  %s6106_s1 = sld [smem:[#allocation57_spill]] }
 0x4d3   : > { %4078 = vrot.lane.b32.xlu1 %v4077_v43, %s4702_s13  ;;  %v4072_v16 = vpack.i.bf16 %v2658_v53, %v2602_v55  ;;  %v2606_v46 = vsel %vm1158_vm1, %v2598_v15, %v2605_v23  ;;  %2739 = vmatpush.bf16.msra.mxu2 %v3784_v60  ;;  %v4164_v43 = vld [vmem:[%s5047_s12] sm:$0xff] }
 0x4d4   : > { %v4082_v35 = vpack.i.bf16 %v2662_v21, %v2606_v46  ;;  %v2656_v7 = vsel %vm1158_vm1, %v2655_v12, %v2638_v5 }
 0x4d5   : > { %4073 = vrot.lane.b32.xlu2 %v4072_v16, %s4701_s4  ;;  %2794 = vmatpush.bf16.msrb.mxu3 %v3787_v32 }
 0x4d6   : > { %4083 = vrot.lane.b32.xlu0 %v4082_v35, %s4703_s10  ;;  %v4704_v35 = vmov 64.0  }
 0x4d7   : > { %2740 = vmatpush.bf16.msra.mxu2 %v3783_v24  ;;  %4144 = vrcp.f32 %v4704_v35 }
 0x4db   : > { %4093 = vrot.lane.b32.xlu1 %v4092_v48, %s4702_s13  ;;  %s3271_s13 = sshll.u32 %s5907_s8, 4  ;;  %s5930_s13 = int_to_ptr.vmem [resolvable:$true] %s3271_s13 }
 0x4dd   : > { %4088 = vrot.lane.b32.xlu2 %v4087_v38, %s4701_s4  ;;  %s975_s4 = scalar_lea.vmem [#allocation23], %s5043_s22  ;;  %s6109_s22 = sld [smem:[#allocation60_spill]] }
 0x4de   : > { %4098 = vrot.lane.b32.xlu0 %v4097_v50, %s4703_s10  ;;  %s6103_s10 = sld [smem:[#allocation52_spill]]  ;;  %s3288_s3 = sshll.u32 %s975_s4, 4  ;;  %s5926_s3 = int_to_ptr.vmem [resolvable:$true] %s3288_s3 }
 0x52f   : > { %v4074_v48 = vpop.permute.xlu2 %4073 }
 0x530   : > { %v4076_v29 = vunpack.i.h.bf16 %v4074_v48  ;;  %v4075_v37 = vunpack.i.l.bf16 %v4074_v48 }
 0x532   : > { %v2688_v36 = vsel %vm1892_vm2, %v2656_v7, %v4076_v29  ;;  %v2687_v30 = vsel %vm1892_vm2, %v2600_v54, %v4075_v37  ;;  %v4165_v54 = vld [vmem:[%s5047_s12 + $0x8] sm:$0xff]  ;;  %v4145_v7 = vpop.eup %4144 }
 0x533   : > { %v2814_v2 = vmul.f32 64.0, %v4145_v7  ;;  %vm2818_vm5 = vweird.f32 %v4145_v7 }
 0x535   : > { %v2815_v13 = vsub.f32 1.0, %v2814_v2 }
 0x537   : > { %v4089_v58 = vpop.permute.xlu2 %4088  ;;  %v2816_v14 = vmul.f32 %v4145_v7, %v2815_v13 }
 0x538   : > { %v4091_v47 = vunpack.i.h.bf16 %v4089_v58  ;;  %v4090_v31 = vunpack.i.l.bf16 %v4089_v58 }
 0x539   : > { %v2817_v61 = vadd.f32 %v4145_v7, %v2816_v14 }
 0x53a   : > { %v2479_v49 = vsel %vm1892_vm2, %v5723_v19, %v4090_v31  ;;  %v2480_v15 = vsel %vm1892_vm2, %v5726_v22, %v4091_v47  ;;  %v4102_v19 = vld [vmem:[%s6101_s9] ss:$0 sm:$0xff] }
 0x53b   : > { %v5811_v63 = vsel %vm2818_vm5, %v4145_v7, %v2817_v61  ;;  %v4104_v7 = vld [vmem:[%s6032_s18] ss:$0 sm:$0xff] }
 0x545   : > { %v4079_v6 = vpop.permute.xlu1 %4078 }
 0x546   : > { %v4081_v38 = vunpack.i.h.bf16 %v4079_v6  ;;  %v4080_v50 = vunpack.i.l.bf16 %v4079_v6 }
 0x548   : > { %v2689_v62 = vsel %vm2481_vm3, %v2687_v30, %v4080_v50  ;;  %v2690_v0 = vsel %vm2481_vm3, %v2688_v36, %v4081_v38  ;;  %v4084_v45 = vpop.permute.xlu0 %4083 }
 0x549   : > { %v4086_v4 = vunpack.i.h.bf16 %v4084_v45  ;;  %v4085_v39 = vunpack.i.l.bf16 %v4084_v45 }
 0x54b   : > { %v2691_v52 = vsel %vm2484_vm4, %v2689_v62, %v4085_v39  ;;  %v2692_v10 = vsel %vm2484_vm4, %v2690_v0, %v4086_v4 }
 0x54c   : > { %v2747_v59 = vpack.c.bf16 %v2692_v10, %v2691_v52 }
 0x54d   : > { %v4094_v3 = vpop.permute.xlu1 %4093 }
 0x54e   : > { %3689 = vmatmul.msk.bf16.vlgmr.msrb.gmra.mxu3 %vm1024_vm0, %v2747_v59  ;;  %v4096_v1 = vunpack.i.h.bf16 %v4094_v3  ;;  %v4095_v9 = vunpack.i.l.bf16 %v4094_v3  ;;  %v3802_v59 = vld [vmem:[#allocation19 + $0x18] sm:$0xff] }
 0x54f   : > { %3128 = vmatpush.bf16.msrb.mxu2 %v3802_v59 }
 0x550   : > { %v2482_v33 = vsel %vm2481_vm3, %v2479_v49, %v4095_v9  ;;  %v2483_v11 = vsel %vm2481_vm3, %v2480_v15, %v4096_v1  ;;  %v4099_v34 = vpop.permute.xlu0 %4098  ;;  %v3801_v9 = vld [vmem:[#allocation19 + $0x10] sm:$0xff] }
 0x551   : > { %v4101_v20 = vunpack.i.h.bf16 %v4099_v34  ;;  %v4100_v18 = vunpack.i.l.bf16 %v4099_v34 }
 0x553   : > { %v2485_v57 = vsel %vm2484_vm4, %v2482_v33, %v4100_v18  ;;  %v2486_v5 = vsel %vm2484_vm4, %v2483_v11, %v4101_v20  ;;  %3129 = vmatpush.bf16.msrb.mxu2 %v3801_v9  ;;  %v3794_v33 = vld [vmem:[#allocation16 + $0x18] sm:$0xff]  ;;  %v3800_v11 = vld [vmem:[#allocation19 + $0x8] sm:$0xff]  ;;  %v3805_v9 = vld [vmem:[#allocation20 + $0x10] sm:$0xff] }
 0x554   : > { %v2693_v25 = vpack.c.bf16 %v2486_v5, %v2485_v57  ;;  %2912 = vmatpush.bf16.msrb.mxu0 %v3794_v33  ;;  %v3796_v33 = vld [vmem:[#allocation17 + $0x8] sm:$0xff] }
 0x556   : > { %3672 = vmatmul.msk.bf16.vlgmr.msra.gmra.mxu2 %vm1024_vm0, %v2693_v25  ;;  %v3793_v25 = vld [vmem:[#allocation16 + $0x10] sm:$0xff] }
 0x557   : > { %3130 = vmatpush.bf16.msrb.mxu2 %v3800_v11  ;;  %v3795_v11 = vld [vmem:[#allocation17] sm:$0xff] }
 0x558   : > { %2913 = vmatpush.bf16.msrb.mxu0 %v3793_v25 }
 0x5d1   : > { %v2796_v22 = vpop.f32.mrf.mxu3 }
 0x5d2   : > { %v2797_v27 = vadd.f32 %v4102_v19, %v2796_v22 }
 0x5d4   : > { %v3034_v26 = vadd.f32 %v4162_v28, %v2797_v27  ;;  %v3792_v28 = vld [vmem:[#allocation16 + $0x8] sm:$0xff] }
 0x5d5   : > { %2914 = vmatpush.bf16.msrb.mxu0 %v3792_v28 }
 0x5d6   : > { %v3036_v8 = vsel %vm1024_vm0, %v3034_v26, 0.0 }
 0x5d7   : > { %3037 = vadd.xlane.f32.xlu2 %v3036_v8 }
 0x5d9   : > { %v2742_v40 = vpop.f32.mrf.mxu2  ;;  %v2798_v41 = vpop.f32.mrf.mxu3 }
 0x5da   : > { %v2743_v56 = vadd.f32 %v4103_v51, %v2742_v40  ;;  %v2799_v44 = vadd.f32 %v4102_v19, %v2798_v41  ;;  %v3799_v19 = vld [vmem:[#allocation19] sm:$0xff] }
 0x5db   : > { %3131 = vmatpush.bf16.msrb.mxu2 %v3799_v19  ;;  %v3791_v41 = vld [vmem:[#allocation16] sm:$0xff] }
 0x5dc   : > { %v3035_v42 = vadd.f32 %v4163_v17, %v2799_v44  ;;  %v2805_v55 = vadd.f32 %v4164_v43, %v2743_v56  ;;  %2915 = vmatpush.bf16.msrb.mxu0 %v3791_v41 }
 0x5de   : > { %v3039_v23 = vsel %vm1024_vm0, %v3035_v42, 0.0  ;;  %v2807_v21 = vsel %vm1024_vm0, %v2805_v55, 0.0 }
 0x5df   : > { %3040 = vadd.xlane.f32.xlu1 %v3039_v23  ;;  %2808 = vadd.xlane.f32.xlu0 %v2807_v21 }
 0x5e1   : > { %v2744_v12 = vpop.f32.mrf.mxu2 }
 0x5e2   : > { %v2745_v53 = vadd.f32 %v4103_v51, %v2744_v12 }
 0x5e4   : > { %v2806_v16 = vadd.f32 %v4165_v54, %v2745_v53 }
 0x5e6   : > { %v2810_v46 = vsel %vm1024_vm0, %v2806_v16, 0.0 }
 0x5e7   : > { %2811 = vadd.xlane.f32.xlu2 %v2810_v46 }
 0x64a   : > { %v3038_v32 = vpop.xlane.xlu2 %3037 }
 0x64b   : > { %v3042_v60 = vmul.f32 %v3038_v32, %v5811_v63 }
 0x64d   : > { %v5814_v24 = vsub.f32 %v3034_v26, %v3042_v60 }
 0x64f   : > { %v3046_v48 = vmul.f32 %v5814_v24, %v5814_v24 }
 0x651   : > { %v3048_v29 = vsel %vm1024_vm0, %v3046_v48, 0.0  ;;  %v4105_v48 = vld [vmem:[%s6033_s19] ss:$0 sm:$0xff] }
 0x652   : > { %v3041_v37 = vpop.xlane.xlu1 %3040  ;;  %3049 = vadd.xlane.f32.xlu1 %v3048_v29  ;;  %v2809_v6 = vpop.xlane.xlu0 %2808 }
 0x653   : > { %v3043_v38 = vmul.f32 %v3041_v37, %v5811_v63  ;;  %v2820_v50 = vmul.f32 %v5811_v63, %v2809_v6 }
 0x655   : > { %v5821_v36 = vsub.f32 %v3035_v42, %v3043_v38  ;;  %v5823_v30 = vsub.f32 %v2805_v55, %v2820_v50 }
 0x657   : > { %v3047_v58 = vmul.f32 %v5821_v36, %v5821_v36  ;;  %v2824_v62 = vmul.f32 %v5823_v30, %v5823_v30 }
 0x659   : > { %v3051_v0 = vsel %vm1024_vm0, %v3047_v58, 0.0  ;;  %v2826_v45 = vsel %vm1024_vm0, %v2824_v62, 0.0 }
 0x65a   : > { %v2812_v4 = vpop.xlane.xlu2 %2811  ;;  %3052 = vadd.xlane.f32.xlu0 %v3051_v0  ;;  %2827 = vadd.xlane.f32.xlu2 %v2826_v45 }
 0x65b   : > { %v2821_v39 = vmul.f32 %v5811_v63, %v2812_v4 }
 0x65d   : > { %v5832_v47 = vsub.f32 %v2806_v16, %v2821_v39 }
 0x65f   : > { %v2825_v31 = vmul.f32 %v5832_v47, %v5832_v47 }
 0x661   : > { %v2829_v52 = vsel %vm1024_vm0, %v2825_v31, 0.0 }
 0x662   : > { %2830 = vadd.xlane.f32.xlu1 %v2829_v52 }
 0x6c5   : > { %v3050_v10 = vpop.xlane.xlu1 %3049 }
 0x6c6   : > { %v3054_v3 = vmul.f32 %v3050_v10, %v5811_v63 }
 0x6c8   : > { %v3056_v1 = vadd.f32 1e-06, %v3054_v3 }
 0x6ca   : > { %4146 = vrsqrt.f32 %v3056_v1  ;;  %vm3064_vm7 = vweird.f32 %v3056_v1 }
 0x6cd   : > { %v2828_v49 = vpop.xlane.xlu2 %2827  ;;  %v3053_v15 = vpop.xlane.xlu0 %3052 }
 0x6ce   : > { %v2832_v34 = vmul.f32 %v2828_v49, %v5811_v63  ;;  %v3055_v20 = vmul.f32 %v3053_v15, %v5811_v63  ;;  %v3797_v49 = vld [vmem:[#allocation17 + $0x10] sm:$0xff]  ;;  %v3804_v15 = vld [vmem:[#allocation20 + $0x8] sm:$0xff] }
 0x6d0   : > { %v4147_v18 = vpop.eup %4146  ;;  %v2834_v57 = vadd.f32 1e-06, %v2832_v34  ;;  %v3057_v5 = vadd.f32 1e-06, %v3055_v20 }
 0x6d1   : > { %v3059_v22 = vmul.f32 %v4147_v18, %v3056_v1  ;;  %vm3065_vm6 = vweird.f32 %v4147_v18  ;;  %v3798_v1 = vld [vmem:[#allocation17 + $0x18] sm:$0xff] }
 0x6d2   : > { %4148 = vrsqrt.f32 %v2834_v57  ;;  %vm3066_vm8 = vmor %vm3064_vm7, %vm3065_vm6  ;;  %vm3074_vm11 = vweird.f32 %v3057_v5  ;;  %vm2842_vm12 = vweird.f32 %v2834_v57  ;;  %2968 = vmatpush.bf16.msrb.mxu1 %v3798_v1 }
 0x6d3   : > { %v3060_v27 = vmul.f32 %v4147_v18, %v3059_v22  ;;  %4150 = vrsqrt.f32 %v3057_v5 }
 0x6d5   : > { %v3061_v26 = vmul.f32 0.5, %v3060_v27  ;;  %v2831_v8 = vpop.xlane.xlu1 %2830 }
 0x6d6   : > { %v2833_v51 = vmul.f32 %v2831_v8, %v5811_v63  ;;  %2969 = vmatpush.bf16.msrb.mxu1 %v3797_v49 }
 0x6d7   : > { %v3062_v40 = vsub.f32 1.5, %v3061_v26 }
 0x6d8   : > { %v4149_v56 = vpop.eup %4148  ;;  %v2835_v44 = vadd.f32 1e-06, %v2833_v51 }
 0x6d9   : > { %v4151_v17 = vpop.eup %4150  ;;  %v2837_v42 = vmul.f32 %v4149_v56, %v2834_v57  ;;  %v3063_v43 = vmul.f32 %v4147_v18, %v3062_v40  ;;  %vm2843_vm10 = vweird.f32 %v4149_v56  ;;  %v4107_v57 = vld [vmem:[%s6025_s11] ss:$0 sm:$0xff] }
 0x6da   : > { %v3069_v55 = vmul.f32 %v4151_v17, %v3057_v5  ;;  %4152 = vrsqrt.f32 %v2835_v44  ;;  %vm3075_vm9 = vweird.f32 %v4151_v17  ;;  %vm2844_vm14 = vmor %vm2842_vm12, %vm2843_vm10  ;;  %vm2852_vm1 = vweird.f32 %v2835_v44  ;;  %2970 = vmatpush.bf16.msrb.mxu1 %v3796_v33 }
 0x6db   : > { %v2838_v23 = vmul.f32 %v4149_v56, %v2837_v42  ;;  %v3067_v53 = vsel %vm3066_vm8, %v4147_v18, %v3063_v43  ;;  %vm3076_vm13 = vmor %vm3074_vm11, %vm3075_vm9  ;;  %v4106_v18 = vld [vmem:[%s6029_s15] ss:$0 sm:$0xff] }
 0x6dc   : > { %v3070_v21 = vmul.f32 %v4151_v17, %v3069_v55  ;;  %v3078_v2 = vmul.f32 %v3067_v53, %v5814_v24  ;;  %v4109_v43 = vld [vmem:[%s6104_s20] ss:$0 sm:$0xff]  ;;  %s3305_s20 = sshll.u32 %s5576_s2, 4  ;;  %s5935_s20 = int_to_ptr.vmem [resolvable:$true] %s3305_s20 }
 0x6dd   : > { %v2839_v12 = vmul.f32 0.5, %v2838_v23 }
 0x6de   : > { %v3071_v54 = vmul.f32 0.5, %v3070_v21  ;;  %v3080_v29 = vmul.f32 %v4104_v7, %v3078_v2  ;;  %2971 = vmatpush.bf16.msrb.mxu1 %v3795_v11 }
 0x6df   : > { %v2840_v16 = vsub.f32 1.5, %v2839_v12 }
 0x6e0   : > { %v4153_v46 = vpop.eup %4152  ;;  %v3072_v35 = vsub.f32 1.5, %v3071_v54  ;;  %v3082_v62 = vadd.f32 %v4105_v48, %v3080_v29 }
 0x6e1   : > { %v2841_v13 = vmul.f32 %v4149_v56, %v2840_v16  ;;  %v2847_v14 = vmul.f32 %v4153_v46, %v2835_v44  ;;  %vm2853_vm15 = vweird.f32 %v4153_v46  ;;  %v4108_v44 = vld [vmem:[%s6103_s10] ss:$0 sm:$0xff]  ;;  %s6107_s10 = sld [smem:[#allocation59_spill]] }
 0x6e2   : > { %v3073_v61 = vmul.f32 %v4151_v17, %v3072_v35  ;;  %vm2854_vm2 = vmor %vm2852_vm1, %vm2853_vm15 }
 0x6e3   : > { %v2848_v32 = vmul.f32 %v4153_v46, %v2847_v14  ;;  %v2845_v37 = vsel %vm2844_vm14, %v4149_v56, %v2841_v13 }
 0x6e4   : > { %v3077_v60 = vsel %vm3076_vm13, %v4151_v17, %v3073_v61  ;;  %v2856_v58 = vmul.f32 %v2845_v37, %v5823_v30  ;;  %v3806_v30 = vld [vmem:[#allocation20 + $0x18] sm:$0xff] }
 0x6e5   : > { %v3079_v6 = vmul.f32 %v3077_v60, %v5821_v36  ;;  %v2849_v38 = vmul.f32 0.5, %v2848_v32  ;;  %3184 = vmatpush.bf16.msra.mxu3 %v3806_v30 }
 0x6e6   : > { %v2861_v31 = vmul.f32 %v4104_v7, %v2856_v58 }
 0x6e7   : > { %v3081_v24 = vmul.f32 %v4104_v7, %v3079_v6  ;;  %v2850_v50 = vsub.f32 1.5, %v2849_v38  ;;  %s3287_s23 = scalar_lea.hbm %s6107_s10, %s3807_s17  ;;  %s4546_s30 = scalar_lea.hbm %s6107_s10, 32 }
 0x6e8   : > { %v2866_v10 = vadd.f32 %v4105_v48, %v2861_v31  ;;  %s3290_s24 = sshll.u32 %s3287_s23, 4  ;;  %s3291_s24 = int_to_ptr.hbm [resolvable:$true] %s3290_s24 }
 0x6e9   : > { %v5850_v0 = vadd.f32 %v4105_v48, %v3081_v24  ;;  %v2851_v45 = vmul.f32 %v4153_v46, %v2850_v50  ;;  %3185 = vmatpush.bf16.msra.mxu3 %v3805_v9  ;;  %s4540_s14 = sshra.s32 %s3291_s24, 4  ;;  %s4541_s14 = int_to_ptr.hbm [resolvable:$true] %s4540_s14 }
 0x6ea   : > { %s4542_s2 = scalar_lea.hbm %s4541_s14, 16  ;;  %p4547_p7 = scmp.lt.s32.totalorder %s4541_s14, %s6107_s10 }
 0x6eb   : > { %v2855_v4 = vsel %vm2854_vm2, %v4153_v46, %v2851_v45  ;;  %v3084_v39 = vpack.c.bf16 %v5850_v0, %v3082_v62  ;;  %p4543_p1 = scmp.ne.s32.totalorder %s4541_s14, %s4542_s2  ;;  %p4548_p9 = scmp.lt.s32.totalorder %s4546_s30, %s4542_s2 }
 0x6ec   : > { %v2857_v52 = vmul.f32 %v2855_v4, %v5832_v47  ;;  %v3803_v47 = vld [vmem:[#allocation20] sm:$0xff] }
 0x6ed   : > { %3740 = vmatmul.msk.bf16.vlgmr.msrb.gmra.mxu2 %vm1024_vm0, %v3084_v39  ;;  %3186 = vmatpush.bf16.msra.mxu3 %v3804_v15  ;;  %p4544_p3 = pnand %p4543_p1, %p4981_p4  ;;  %p4549_p8 = por %p4548_p9, %p4547_p7 }
 0x6ee   : > { %v2862_v36 = vmul.f32 %v4104_v7, %v2857_v52 }
 0x6ef   : > { %p4545_p12 = pneg %p4544_p3 }
 0x6f0   : > { %v2867_v59 = vadd.f32 %v4105_v48, %v2862_v36 }
 0x6f1   : > { %3187 = vmatpush.bf16.msra.mxu3 %v3803_v47  ;;  %p4550_p5 = pnand %p4549_p8, %p4545_p12 }
 0x6f2   : > { %v2868_v3 = vpack.c.bf16 %v2867_v59, %v2866_v10 }
 0x6f4   : > { %3706 = vmatmul.msk.bf16.vlgmr.msrb.gmra.mxu0 %vm1024_vm0, %v2868_v3 }
 0x770   : > { %v3133_v34 = vpop.f32.mrf.mxu2 }
 0x771   : > { %v2917_v20 = vpop.f32.mrf.mxu0  ;;  %v3134_v5 = vadd.f32 %v4106_v18, %v3133_v34 }
 0x772   : > { %v2918_v25 = vadd.f32 %v4107_v57, %v2917_v20 }
 0x773   : > { %v3138_v26 = vmax.f32 %v3134_v5, 0.0 }
 0x774   : > { %v2922_v51 = vmax.f32 %v2918_v25, 0.0 }
 0x778   : > { %v3135_v19 = vpop.f32.mrf.mxu2 }
 0x779   : > { %v3136_v22 = vadd.f32 %v4106_v18, %v3135_v19  ;;  %v2919_v27 = vpop.f32.mrf.mxu0 }
 0x77a   : > { %v2920_v28 = vadd.f32 %v4107_v57, %v2919_v27 }
 0x77b   : > { %v3139_v8 = vmax.f32 %v3136_v22, 0.0 }
 0x77c   : > { %v2923_v40 = vmax.f32 %v2920_v28, 0.0 }
 0x77d   : > { %v3140_v41 = vpack.c.bf16 %v3139_v8, %v3138_v26 }
 0x77e   : > { %v2924_v56 = vpack.c.bf16 %v2923_v40, %v2922_v51  ;;  %v4110_v51 = vld [vmem:[%s6105_s6] ss:$0 sm:$0xff]  ;;  %s3270_s6 = scalar_lea.hbm %s6108_s21, %s3807_s17 }
 0x77f   : > { %3757 = vmatmul.msk.bf16.vlgmr.msra.gmra.mxu3 %vm1024_vm0, %v3140_v41  ;;  %s3273_s27 = sshll.u32 %s3270_s6, 4  ;;  %s5932_s27 = int_to_ptr.hbm [resolvable:$true] %s3273_s27 }
 0x780   : > { %3723 = vmatmul.msk.bf16.vlgmr.msrb.gmra.mxu1 %vm1024_vm0, %v2924_v56 }
 0x7fd   : > { %v2973_v17 = vpop.f32.mrf.mxu1 }
 0x7fe   : > { %v2974_v42 = vadd.f32 %v4108_v44, %v2973_v17 }
 0x800   : > { %v2978_v55 = vadd.f32 %v2974_v42, %v2866_v10 }
 0x802   : > { %v3189_v23 = vpop.f32.mrf.mxu3  ;;  %v2980_v21 = vsel %vm1024_vm0, %v2978_v55, 0.0 }
 0x803   : > { %v3190_v12 = vadd.f32 %v4109_v43, %v3189_v23  ;;  %2981 = vadd.xlane.f32.xlu1 %v2980_v21 }
 0x805   : > { %v2975_v53 = vpop.f32.mrf.mxu1  ;;  %v3194_v54 = vadd.f32 %v3190_v12, %v3082_v62 }
 0x806   : > { %v2976_v16 = vadd.f32 %v4108_v44, %v2975_v53 }
 0x807   : > { %v3196_v46 = vsel %vm1024_vm0, %v3194_v54, 0.0 }
 0x808   : > { %3197 = vadd.xlane.f32.xlu0 %v3196_v46  ;;  %v2979_v2 = vadd.f32 %v2976_v16, %v2867_v59 }
 0x80a   : > { %v3191_v35 = vpop.f32.mrf.mxu3  ;;  %v2983_v61 = vsel %vm1024_vm0, %v2979_v2, 0.0 }
 0x80b   : > { %v3192_v7 = vadd.f32 %v4109_v43, %v3191_v35 }
 0x80d   : > { %v3195_v13 = vadd.f32 %v3192_v7, %v5850_v0 }
 0x80f   : > { %v3199_v14 = vsel %vm1024_vm0, %v3195_v13, 0.0 }
 0x810   : > { %3200 = vadd.xlane.f32.xlu2 %v3199_v14  ;;  %2984 = vadd.xlane.f32.xlu0 %v2983_v61 }
 0x876   : > { %v2982_v32 = vpop.xlane.xlu1 %2981 }
 0x877   : > { %v2986_v60 = vmul.f32 %v2982_v32, %v5811_v63 }
 0x879   : > { %v2988_v48 = vsub.f32 %v2978_v55, %v2986_v60 }
 0x87b   : > { %v3198_v29 = vpop.xlane.xlu0 %3197  ;;  %v2990_v37 = vmul.f32 %v2988_v48, %v2988_v48 }
 0x87c   : > { %v3202_v6 = vmul.f32 %v3198_v29, %v5811_v63 }
 0x87d   : > { %v2992_v38 = vsel %vm1024_vm0, %v2990_v37, 0.0 }
 0x87e   : > { %v5878_v24 = vsub.f32 %v3194_v54, %v3202_v6  ;;  %2993 = vadd.xlane.f32.xlu0 %v2992_v38 }
 0x880   : > { %v3206_v50 = vmul.f32 %v5878_v24, %v5878_v24 }
 0x882   : > { %v3208_v58 = vsel %vm1024_vm0, %v3206_v50, 0.0 }
 0x883   : > { %v3201_v62 = vpop.xlane.xlu2 %3200  ;;  %3209 = vadd.xlane.f32.xlu2 %v3208_v58  ;;  %v2985_v0 = vpop.xlane.xlu0 %2984 }
 0x884   : > { %v3203_v45 = vmul.f32 %v3201_v62, %v5811_v63  ;;  %v2987_v4 = vmul.f32 %v2985_v0, %v5811_v63 }
 0x886   : > { %v5885_v39 = vsub.f32 %v3195_v13, %v3203_v45  ;;  %v5887_v31 = vsub.f32 %v2979_v2, %v2987_v4 }
 0x888   : > { %v3207_v52 = vmul.f32 %v5885_v39, %v5885_v39  ;;  %v2991_v36 = vmul.f32 %v5887_v31, %v5887_v31 }
 0x88a   : > { %v3211_v10 = vsel %vm1024_vm0, %v3207_v52, 0.0  ;;  %v2995_v59 = vsel %vm1024_vm0, %v2991_v36, 0.0 }
 0x88b   : > { %3212 = vadd.xlane.f32.xlu1 %v3211_v10  ;;  %2996 = vadd.xlane.f32.xlu2 %v2995_v59 }
 0x8f1   : > { %v2994_v3 = vpop.xlane.xlu0 %2993 }
 0x8f2   : > { %v2998_v30 = vmul.f32 %v2994_v3, %v5811_v63 }
 0x8f4   : > { %v3000_v1 = vadd.f32 1e-06, %v2998_v30 }
 0x8f6   : > { %4154 = vrsqrt.f32 %v3000_v1  ;;  %v3210_v9 = vpop.xlane.xlu2 %3209  ;;  %vm3008_vm4 = vweird.f32 %v3000_v1 }
 0x8f7   : > { %v3214_v49 = vmul.f32 %v3210_v9, %v5811_v63 }
 0x8f9   : > { %v3216_v15 = vadd.f32 1e-06, %v3214_v49 }
 0x8fb   : > { %4156 = vrsqrt.f32 %v3216_v15  ;;  %vm3224_vm7 = vweird.f32 %v3216_v15 }
 0x8fc   : > { %v4155_v33 = vpop.eup %4154 }
 0x8fd   : > { %v3003_v47 = vmul.f32 %v4155_v33, %v3000_v1  ;;  %vm3009_vm3 = vweird.f32 %v4155_v33 }
 0x8fe   : > { %v3213_v11 = vpop.xlane.xlu1 %3212  ;;  %v2997_v34 = vpop.xlane.xlu2 %2996  ;;  %vm3010_vm5 = vmor %vm3008_vm4, %vm3009_vm3 }
 0x8ff   : > { %v3004_v20 = vmul.f32 %v4155_v33, %v3003_v47  ;;  %v3215_v18 = vmul.f32 %v3213_v11, %v5811_v63  ;;  %v2999_v57 = vmul.f32 %v2997_v34, %v5811_v63  ;;  %v4111_v63 = vld [vmem:[%s6106_s1] ss:$0 sm:$0xff]  ;;  %s3304_s1 = scalar_lea.hbm %s6109_s22, %s3809_s29  ;;  %s6110_s29 = sand.u32 1, %s4856_s7  }
 0x900   : > { %s3307_s17 = sshll.u32 %s3304_s1, 4  ;;  %s5941_s23 = scalar_lea.sflag [#allocation24], %s6110_s29  ;;  %s5937_s17 = int_to_ptr.hbm [resolvable:$true] %s3307_s17 }
 0x901   : > { %v4157_v5 = vpop.eup %4156  ;;  %v3005_v25 = vmul.f32 0.5, %v3004_v20  ;;  %v3217_v19 = vadd.f32 1e-06, %v3215_v18  ;;  %v3001_v22 = vadd.f32 1e-06, %v2999_v57 }
 0x902   : > { %v3219_v27 = vmul.f32 %v4157_v5, %v3216_v15  ;;  %vm3225_vm6 = vweird.f32 %v4157_v5 }
 0x903   : > { %v3006_v28 = vsub.f32 1.5, %v3005_v25  ;;  %4158 = vrsqrt.f32 %v3217_v19  ;;  %vm3226_vm8 = vmor %vm3224_vm7, %vm3225_vm6  ;;  %vm3234_vm11 = vweird.f32 %v3217_v19  ;;  %vm3018_vm13 = vweird.f32 %v3001_v22 }
 0x904   : > { %v3220_v26 = vmul.f32 %v4157_v5, %v3219_v27  ;;  %4160 = vrsqrt.f32 %v3001_v22 }
 0x905   : > { %v3007_v8 = vmul.f32 %v4155_v33, %v3006_v28 }
 0x906   : > { %v3221_v40 = vmul.f32 0.5, %v3220_v26 }
 0x907   : > { %v3011_v41 = vsel %vm3010_vm5, %v4155_v33, %v3007_v8 }
 0x908   : > { %v3022_v56 = vmul.f32 %v3011_v41, %v2988_v48  ;;  %v3222_v44 = vsub.f32 1.5, %v3221_v40 }
 0x909   : > { %v4159_v17 = vpop.eup %4158 }
 0x90a   : > { %v4161_v42 = vpop.eup %4160  ;;  %v3027_v43 = vmul.f32 %v4110_v51, %v3022_v56  ;;  %v3223_v55 = vmul.f32 %v4157_v5, %v3222_v44  ;;  %v3229_v23 = vmul.f32 %v4159_v17, %v3217_v19  ;;  %vm3235_vm9 = vweird.f32 %v4159_v17 }
 0x90b   : > { %v3013_v21 = vmul.f32 %v4161_v42, %v3001_v22  ;;  %vm3019_vm10 = vweird.f32 %v4161_v42  ;;  %vm3236_vm12 = vmor %vm3234_vm11, %vm3235_vm9 }
 0x90c   : > { %v3032_v12 = vadd.f32 %v4111_v63, %v3027_v43  ;;  %v3227_v53 = vsel %vm3226_vm8, %v4157_v5, %v3223_v55  ;;  %v3230_v54 = vmul.f32 %v4159_v17, %v3229_v23  ;;  %vm3020_vm14 = vmor %vm3018_vm13, %vm3019_vm10 }
 0x90d   : > { %v3238_v16 = vmul.f32 %v3227_v53, %v5878_v24  ;;  %v3014_v46 = vmul.f32 %v4161_v42, %v3013_v21 }
 0x90e   : > { %v3231_v35 = vmul.f32 0.5, %v3230_v54  ;;  %3244 = vst.msk [vmem:[%s5907_s8] sm:$0xff] %vm1024_vm0, %v3032_v12 }
 0x90f   : > { %v3240_v7 = vmul.f32 %v4110_v51, %v3238_v16  ;;  %v3015_v2 = vmul.f32 0.5, %v3014_v46 }
 0x910   : > { %v3232_v13 = vsub.f32 1.5, %v3231_v35 }
 0x911   : > { %v3242_v14 = vadd.f32 %v4111_v63, %v3240_v7  ;;  %v3016_v61 = vsub.f32 1.5, %v3015_v2 }
 0x912   : > { %v3233_v32 = vmul.f32 %v4159_v17, %v3232_v13 }
 0x913   : > { %v3017_v60 = vmul.f32 %v4161_v42, %v3016_v61  ;;  %3246 = vst.msk [vmem:[%s975_s4] sm:$0xff] %vm1024_vm0, %v3242_v14 }
 0x914   : > { %v3237_v48 = vsel %vm3236_vm12, %v4159_v17, %v3233_v32 }
 0x915   : > { %v3239_v29 = vmul.f32 %v3237_v48, %v5885_v39  ;;  %v3021_v37 = vsel %vm3020_vm14, %v4161_v42, %v3017_v60 }
 0x916   : > { %v3023_v6 = vmul.f32 %v3021_v37, %v5887_v31 }
 0x917   : > { %v3241_v38 = vmul.f32 %v4110_v51, %v3239_v29 }
 0x918   : > { %v3028_v24 = vmul.f32 %v4110_v51, %v3023_v6 }
 0x919   : > { %v3243_v50 = vadd.f32 %v4111_v63, %v3241_v38 }
 0x91a   : > { %v3033_v58 = vadd.f32 %v4111_v63, %v3028_v24 }
 0x91b   : > { %3247 = vst.msk [vmem:[%s975_s4 + $0x8] sm:$0xff] %vm1024_vm0, %v3243_v50 }
 0x91c   : > { %4553 = shalt.err (!%p4550_p5)
}
 0x91d   : > { %s4705_s7 = smov 128   ;;  %s4706_s29 = smov 8   ;;  %3245 = vst.msk [vmem:[%s5907_s8 + $0x8] sm:$0xff] %vm1024_vm0, %v3033_v58 }
 0x91e   : > { %3855 = dma.vmem_to_hbm [thread:$0]  (%p4981_p4), %s5926_s3, 256, %s3291_s24, %s5941_s23, %s4705_s7, %s4705_s7, %s4706_s29  }
 0x91f   : > { %s3249_s14 = scalar_lea.sflag [#allocation4], %s5040_s25  ;;  %s4568_s2 = sshra.s32 %s5932_s27, 4  ;;  %s4569_s2 = int_to_ptr.hbm [resolvable:$true] %s4568_s2 }
 0x920   : > { %s4570_s6 = scalar_lea.hbm %s4569_s2, 16  ;;  %s4574_s1 = scalar_lea.hbm %s6108_s21, 32 }
 0x921   : > { %p4571_p10 = scmp.ne.s32.totalorder %s4569_s2, %s4570_s6  ;;  %p4575_p0 = scmp.lt.s32.totalorder %s4569_s2, %s6108_s21 }
 0x922   : > { %p4576_p2 = scmp.lt.s32.totalorder %s4574_s1, %s4570_s6 }
 0x923   : > { %p4572_p11 = pnand %p4571_p10, %p4981_p4 }
 0x924   : > { %p4577_p1 = por %p4576_p2, %p4575_p0 }
 0x925   : > { %p4573_p13 = pneg %p4572_p11 }
 0x927   : > { %p4578_p3 = pnand %p4577_p1, %p4573_p13 }
 0x929   : > { %4581 = shalt.err (!%p4578_p3)
}
 0x92a   : > { %3854 = dma.vmem_to_hbm [thread:$0]  (%p4981_p4), %s5930_s13, 256, %s5932_s27, %s3249_s14, %s4705_s7, %s4705_s7, %s4706_s29  }
 0x92b   : > { %s4596_s25 = sshra.s32 %s5937_s17, 4  ;;  %s4602_s24 = scalar_lea.hbm %s6109_s22, 128  ;;  %s4597_s25 = int_to_ptr.hbm [resolvable:$true] %s4596_s25 }
 0x92c   : > { %s4598_s8 = scalar_lea.hbm %s4597_s25, 64  ;;  %p4603_p8 = scmp.lt.s32.totalorder %s4597_s25, %s6109_s22 }
 0x92d   : > { %p4599_p12 = scmp.ne.s32.totalorder %s4597_s25, %s4598_s8  ;;  %p4604_p5 = scmp.lt.s32.totalorder %s4602_s24, %s4598_s8 }
 0x92f   : > { %p4600_p7 = pnand %p4599_p12, %p4981_p4  ;;  %p4605_p10 = por %p4604_p5, %p4603_p8 }
 0x931   : > { %p4601_p9 = pneg %p4600_p7 }
 0x933   : > { %p4606_p11 = pnand %p4605_p10, %p4601_p9 }
 0x935   : > { %4609 = shalt.err (!%p4606_p11)
}
 0x936   : > { %3856 = dma.vmem_to_hbm [thread:$0]  (%p4981_p4), %s5935_s20, 1024, %s5937_s17, %s5941_s23, %s4705_s7, %s4705_s7, %s4706_s29  }
 0x937 PF: > { %s3322_s13 = sand.u32 1, %s4668_s5   ;;  %p6112_p13 = scmp.ge.s32.totalorder %s4680_s28, 2 }
 0x938   : > { %s3323_s14 = scalar_lea.sflag [#allocation4], %s3322_s13 }
 0x939   : > { %p3899_p0 = pnand %p6112_p13, %p4985_p6 }
 0x93b   : > { %p3900_p2 = pneg %p3899_p0 }
 0x93d   : > { %4659 = dma.done.wait (%p3900_p2), %s3323_s14, 256  }
 0x93e   : > { %4661 = vsyncadd (%p3900_p2), %s3323_s14, 4294967040  ;;  %s6113_s0 = sadd.s32 4294967294, %s4680_s28  }
 0x93f   : > { %s3332_s12 = sand.u32 1, %s6113_s0  }
 0x940   : > { %s3333_s30 = scalar_lea.sflag [#allocation24], %s3332_s12 }
 0x941   : > { %4663 = dma.done.wait (%p3900_p2), %s3333_s30, 1280  }
 0x942   : > { %4665 = vsyncadd (%p3900_p2), %s3333_s30, 4294966016  ;;  %s6114_s28 = sld [smem:[#allocation37_spill]]  ;;  %s6117_s5 = smov %s4672_s26 }
 0x943   : > { %s6115_s20 = sld [smem:[#allocation36_spill]] }
 0x944   : > { %s6116_s27 = sld [smem:[#allocation38_spill]] }
 0x948   : > { %p49_p4 = scmp.ge.s32.totalorder %s6114_s28, 4  }
 0x949   : > { %s6118_s26 = smov %s6115_s20 }
 0x94a   :  { %51 = sbr.rel (!%p49_p4) target bundleno = 36 (0x24), region = 238 }
 0x94f   :  { %3349 = vsyncpa [#allocation3], 1 }
 0x950   :  { %3351 = vsyncpa [#allocation3 + $0x1], 1 }
 0x951   :  { %3352 = vsyncpa [#allocation6], 1 }
 0x952   :  { %3354 = vsyncpa [#allocation6 + $0x1], 1 }
 0x953   :  { %3355 = vsyncpa [#allocation9], 1 }
 0x954   :  { %3356 = vsyncpa [#allocation12], 1 }
 0x955   :  { %3357 = vsyncpa [#allocation15], 1 }
 0x956   :  { %3358 = vsyncpa [#allocation18], 1 }
 0x957   :  { %3359 = vsyncpa [#allocation21], 1 }
 0x958   :  { %3360 = vsyncpa [#allocation4], 1 }
 0x959   :  { %3362 = vsyncpa [#allocation4 + $0x1], 1 }
 0x95a   :  { %3363 = vsyncpa [#allocation24], 1 }
 0x95b   :  { %3365 = vsyncpa [#allocation24 + $0x1], 1 }

</bundles_post_ra>
